<compile_context>
chip_gen: v7x
topology: tpu7x:2x2x1
jax: 0.10.0
libtpu: 0.0.40
codegen_flags: <defaults>
</compile_context>

<pallas_src>
import functools

import jax
import jax.numpy as jnp
from jax.experimental import pallas as pl
from jax.experimental.pallas import tpu as pltpu

EPS = 1e-5
LANE = 128


def _round_up(x, m):
    return (x + m - 1) // m * m


def _pick_row_tile(h):
    # Largest row tile <= 8 that divides H (8 rows * W * 128 lanes keeps the
    # matmul M-dim >= 128 for typical W while giving several grid steps).
    for th in (8, 4, 2, 1):
        if h % th == 0:
            return th
    return h


# ---------------------------------------------------------------------------
# Pass 1: conv1 (3x3) + shortcut (1x1) fused into one MXU matmul per row tile,
#         plus per-tile BN partial statistics.
# ---------------------------------------------------------------------------
def _conv1_shortcut_kernel(x_ref, xtop_ref, xbot_ref, w_ref,
                           c1_ref, cs_ref, s1_ref, ss_ref, pad_scr):
    TH, W, Cx = x_ref.shape
    Cp = pad_scr.shape[-1]
    Coutp = c1_ref.shape[-1]
    r = pl.program_id(1)
    nr = pl.num_programs(1)

    # --- build the zero-padded (halo) input tile in VMEM -------------------
    if Cx == Cp:
        # Lane-dense path: only the 1-pixel left/right column ring (incl. the
        # corners) has to be re-zeroed; the interior / halo-row stores below
        # cover everything else with dense, unmasked stores.
        zcol = jnp.zeros((TH + 2, 1, Cp), jnp.float32)
        pad_scr[:, 0:1, :] = zcol
        pad_scr[:, W + 1:W + 2, :] = zcol
    else:
        # Tiny-Cin fallback: the lane-padding channels [Cx:Cp] must be zero on
        # EVERY step (megacore can start at any grid index), so clear the whole
        # scratch; the stores below only write the real Cx lanes.
        pad_scr[...] = jnp.zeros_like(pad_scr)

    # Interior rows of the tile.
    pad_scr[1:TH + 1, 1:W + 1, :Cx] = x_ref[...]
    # Top / bottom halo rows come from the neighbouring row tiles; they are the
    # "same"-padding zeros at the image boundary.
    top = xtop_ref[...]
    bot = xbot_ref[...]
    pad_scr[0:1, 1:W + 1, :Cx] = jnp.where(r == 0, jnp.zeros_like(top), top)
    pad_scr[TH + 1:TH + 2, 1:W + 1, :Cx] = jnp.where(r == nr - 1,
                                                     jnp.zeros_like(bot), bot)

    # im2col: fold the 9 taps into the contraction dim (K = 9*Cp), bf16 for MXU.
    cols = [pad_scr[dy:dy + TH, dx:dx + W, :].astype(jnp.bfloat16)
            for dy in range(3) for dx in range(3)]
    patch = jnp.concatenate(cols, axis=-1).reshape(TH * W, 9 * Cp)

    # One matmul computes BOTH the 3x3 conv (columns [:Coutp]) and the 1x1
    # shortcut conv (columns [Coutp:], weights on the centre-tap rows).
    acc = jnp.dot(patch, w_ref[...], preferred_element_type=jnp.float32)
    acc1 = acc[:, :Coutp]
    accs = acc[:, Coutp:]

    # BN partial statistics from the f32 accumulator (before the bf16 cast).
    s1_ref[...] = jnp.concatenate(
        [acc1.sum(axis=0, keepdims=True),
         (acc1 * acc1).sum(axis=0, keepdims=True)], axis=0)
    ss_ref[...] = jnp.concatenate(
        [accs.sum(axis=0, keepdims=True),
         (accs * accs).sum(axis=0, keepdims=True)], axis=0)

    c1_ref[...] = acc1.reshape(TH, W, Coutp).astype(jnp.bfloat16)
    cs_ref[...] = accs.reshape(TH, W, Coutp).astype(jnp.bfloat16)


# ---------------------------------------------------------------------------
# Pass 2: BN1 (pre-folded scale/bias) + ReLU + conv2 (3x3) + BN2 partial stats.
# ---------------------------------------------------------------------------
def _bn_relu_conv2_kernel(c1_ref, c1top_ref, c1bot_ref, scale1_ref, bias1_ref,
                          w2_ref, c2_ref, s2_ref, pad_scr):
    TH, W, Coutp = c1_ref.shape
    r = pl.program_id(1)
    nr = pl.num_programs(1)

    scale = scale1_ref[...].reshape(1, 1, Coutp)
    bias = bias1_ref[...].reshape(1, 1, Coutp)

    # NOTE: the lane-padding channels [Cout:Coutp] stay exactly zero here
    # because gamma/beta were zero-padded (scale = bias = 0  ->  relu(0) = 0),
    # which the halo-only clear below relies on.
    def bn_relu(v):  # bf16 conv1 rows -> f32 post-BN-ReLU rows
        return jnp.maximum(v.astype(jnp.float32) * scale + bias, 0.0)

    # Halo-only clear: left/right column ring (incl. corners).
    zcol = jnp.zeros((TH + 2, 1, Coutp), jnp.float32)
    pad_scr[:, 0:1, :] = zcol
    pad_scr[:, W + 1:W + 2, :] = zcol
    pad_scr[1:TH + 1, 1:W + 1, :] = bn_relu(c1_ref[...])
    top = bn_relu(c1top_ref[...])
    bot = bn_relu(c1bot_ref[...])
    pad_scr[0:1, 1:W + 1, :] = jnp.where(r == 0, jnp.zeros_like(top), top)
    pad_scr[TH + 1:TH + 2, 1:W + 1, :] = jnp.where(r == nr - 1,
                                                   jnp.zeros_like(bot), bot)

    cols = [pad_scr[dy:dy + TH, dx:dx + W, :].astype(jnp.bfloat16)
            for dy in range(3) for dx in range(3)]
    patch = jnp.concatenate(cols, axis=-1).reshape(TH * W, 9 * Coutp)
    acc2 = jnp.dot(patch, w2_ref[...], preferred_element_type=jnp.float32)

    s2_ref[...] = jnp.concatenate(
        [acc2.sum(axis=0, keepdims=True),
         (acc2 * acc2).sum(axis=0, keepdims=True)], axis=0)
    c2_ref[...] = acc2.reshape(TH, W, Coutp).astype(jnp.bfloat16)


# ---------------------------------------------------------------------------
# Pass 3: BN2 apply + shortcut-BN apply + residual add + ReLU (elementwise).
# ---------------------------------------------------------------------------
def _bn_add_relu_kernel(c2_ref, cs_ref, scale2_ref, bias2_ref,
                        scale_s_ref, bias_s_ref, out_ref):
    Coutp = out_ref.shape[-1]
    scale2 = scale2_ref[...].reshape(1, 1, Coutp)
    bias2 = bias2_ref[...].reshape(1, 1, Coutp)
    scale_s = scale_s_ref[...].reshape(1, 1, Coutp)
    bias_s = bias_s_ref[...].reshape(1, 1, Coutp)
    out = (c2_ref[...].astype(jnp.float32) * scale2 + bias2
           + cs_ref[...].astype(jnp.float32) * scale_s + bias_s)
    out_ref[...] = jnp.maximum(out, 0.0)


# ---------------------------------------------------------------------------
# Host-side helpers (one-time packing, outside the jitted forward).
# ---------------------------------------------------------------------------
def _pack_conv1_shortcut_weight(w1, ws, cin_p, cout_p):
    """(3,3,Cin,Cout) conv weight + (Cin,Cout) 1x1 weight -> (9*cin_p, 2*cout_p) bf16."""
    _, _, cin, cout = w1.shape
    wp = jnp.zeros((9 * cin_p, 2 * cout_p), jnp.float32)
    for dy in range(3):
        for dx in range(3):
            t = dy * 3 + dx
            wp = wp.at[t * cin_p:t * cin_p + cin, :cout].set(w1[dy, dx])
    tc = 1 * 3 + 1  # shortcut 1x1 conv lives on the centre tap
    wp = wp.at[tc * cin_p:tc * cin_p + cin, cout_p:cout_p + cout].set(ws)
    return wp.astype(jnp.bfloat16)


def _pack_conv_weight(w, cin_p, cout_p):
    """(3,3,Cin,Cout) conv weight -> (9*cin_p, cout_p) bf16 im2col weight."""
    _, _, cin, cout = w.shape
    wp = jnp.zeros((9 * cin_p, cout_p), jnp.float32)
    for dy in range(3):
        for dx in range(3):
            t = dy * 3 + dx
            wp = wp.at[t * cin_p:t * cin_p + cin, :cout].set(w[dy, dx])
    return wp.astype(jnp.bfloat16)


def _fold_bn(sums, sumsqs, gamma_p, beta_p, n):
    """Fold train-mode BN (biased var) into one per-channel scale + bias."""
    mean = sums / n
    var = jnp.maximum(sumsqs / n - mean * mean, 0.0)
    scale = gamma_p * jax.lax.rsqrt(var + EPS)
    bias = beta_p - mean * scale
    return scale.reshape(1, -1), bias.reshape(1, -1)


def prepare_block_params(params):
    """One-time (outside jit) packing of weights / BN params into kernel layout."""
    cin = params["w1"].shape[2]
    cout = params["w1"].shape[3]
    cp = _round_up(cin, LANE)
    coutp = _round_up(cout, LANE)

    def padc(v):  # pad per-channel BN params with zeros up to full lanes
        return jnp.pad(v.reshape(-1).astype(jnp.float32), (0, coutp - cout))

    return dict(
        w1s=_pack_conv1_shortcut_weight(params["w1"], params["ws"], cp, coutp),
        w2p=_pack_conv_weight(params["w2"], coutp, coutp),
        g1=padc(params["g1"]), b1=padc(params["b1"]),
        g2=padc(params["g2"]), b2=padc(params["b2"]),
        gs=padc(params["gs"]), bs=padc(params["bs"]),
    )


@functools.partial(jax.jit, static_argnames=("cout",))
def basic_block_forward(x_nchw, prep, *, cout):
    B, Cin, H, W = x_nchw.shape
    w1s, w2p = prep["w1s"], prep["w2p"]
    Cp = w1s.shape[0] // 9
    Coutp = w1s.shape[1] // 2
    TH = _pick_row_tile(H)
    nr = H // TH
    N = B * H * W

    x_nhwc = jnp.transpose(x_nchw, (0, 2, 3, 1)).astype(jnp.float32)
    # Lane-dense input DMA: pre-pad the channel dim to full lanes only when
    # most lanes carry real data (avoids huge HBM inflation for tiny Cin; the
    # pass-1 kernel zero-fills the remaining lanes in VMEM otherwise).
    if 64 <= Cin < Cp:
        x_nhwc = jnp.pad(x_nhwc, ((0, 0), (0, 0), (0, 0), (0, Cp - Cin)))
    Cx = x_nhwc.shape[-1]

    f32, bf16 = 4, 2

    def _vmem_limit(est):
        # 2x headroom over the static per-step estimate; never below the 32 MiB
        # default scoped limit, never above v7x's 64 MiB physical VMEM.
        return int(min(max(2 * est, 32 << 20), 64 << 20))

    est_conv1 = ((TH + 2) * (W + 2) * Cp * f32            # halo scratch
                 + TH * W * 9 * Cp * bf16                 # im2col patch
                 + TH * W * 2 * Coutp * f32               # matmul accumulator
                 + 9 * Cp * 2 * Coutp * bf16              # packed weights
                 + 2 * (TH + 2) * W * Cx * f32            # double-buffered input rows
                 + 4 * TH * W * Coutp * bf16              # double-buffered c1 / cs tiles
                 + 4 * 2 * Coutp * f32)                   # double-buffered stats tiles
    est_conv2 = ((TH + 2) * (W + 2) * Coutp * f32
                 + TH * W * 9 * Coutp * bf16
                 + TH * W * Coutp * f32
                 + 9 * Coutp * Coutp * bf16
                 + 2 * (TH + 2) * W * Coutp * bf16
                 + 2 * TH * W * Coutp * bf16
                 + 2 * 2 * Coutp * f32)
    est_add = 3 * 2 * TH * W * Coutp * f32

    grid = (B, nr)

    def _cparams(est):
        return pltpu.CompilerParams(
            dimension_semantics=("parallel", "parallel"),
            vmem_limit_bytes=_vmem_limit(est))

    # Row-tile BlockSpecs.  Halo rows use clamped element-row indices (block
    # size 1 along H) and are zeroed at the image boundary inside the kernel.
    row_in = pl.BlockSpec((None, TH, W, Cx), lambda b, r: (b, r, 0, 0))
    top_in = pl.BlockSpec((None, 1, W, Cx),
                          lambda b, r: (b, jnp.maximum(r * TH - 1, 0), 0, 0))
    bot_in = pl.BlockSpec((None, 1, W, Cx),
                          lambda b, r: (b, jnp.minimum((r + 1) * TH, H - 1), 0, 0))
    row_out = pl.BlockSpec((None, TH, W, Coutp), lambda b, r: (b, r, 0, 0))
    top_out = pl.BlockSpec((None, 1, W, Coutp),
                           lambda b, r: (b, jnp.maximum(r * TH - 1, 0), 0, 0))
    bot_out = pl.BlockSpec((None, 1, W, Coutp),
                           lambda b, r: (b, jnp.minimum((r + 1) * TH, H - 1), 0, 0))
    stats_spec = pl.BlockSpec((None, None, 2, Coutp), lambda b, r: (b, r, 0, 0))
    chan_spec = pl.BlockSpec((1, Coutp), lambda b, r: (0, 0))

    # ---- pass 1: conv1 + fused 1x1 shortcut conv (+ BN partial stats) ----
    c1, cs, s1, ss = pl.pallas_call(
        _conv1_shortcut_kernel,
        grid=grid,
        in_specs=[
            row_in, top_in, bot_in,
            pl.BlockSpec((9 * Cp, 2 * Coutp), lambda b, r: (0, 0)),
        ],
        out_specs=(row_out, row_out, stats_spec, stats_spec),
        out_shape=(
            jax.ShapeDtypeStruct((B, H, W, Coutp), jnp.bfloat16),
            jax.ShapeDtypeStruct((B, H, W, Coutp), jnp.bfloat16),
            jax.ShapeDtypeStruct((B, nr, 2, Coutp), jnp.float32),
            jax.ShapeDtypeStruct((B, nr, 2, Coutp), jnp.float32),
        ),
        scratch_shapes=[pltpu.VMEM((TH + 2, W + 2, Cp), jnp.float32)],
        compiler_params=_cparams(est_conv1),
    )(x_nhwc, x_nhwc, x_nhwc, w1s)

    scale1, bias1 = _fold_bn(s1[:, :, 0, :].sum((0, 1)), s1[:, :, 1, :].sum((0, 1)),
                             prep["g1"], prep["b1"], N)
    scale_s, bias_s = _fold_bn(ss[:, :, 0, :].sum((0, 1)), ss[:, :, 1, :].sum((0, 1)),
                               prep["gs"], prep["bs"], N)

    # ---- pass 2: BN1 + ReLU + conv2 (+ BN2 partial stats) ----
    c2, s2 = pl.pallas_call(
        _bn_relu_conv2_kernel,
        grid=grid,
        in_specs=[
            row_out, top_out, bot_out,
            chan_spec, chan_spec,
            pl.BlockSpec((9 * Coutp, Coutp), lambda b, r: (0, 0)),
        ],
        out_specs=(row_out, stats_spec),
        out_shape=(
            jax.ShapeDtypeStruct((B, H, W, Coutp), jnp.bfloat16),
            jax.ShapeDtypeStruct((B, nr, 2, Coutp), jnp.float32),
        ),
        scratch_shapes=[pltpu.VMEM((TH + 2, W + 2, Coutp), jnp.float32)],
        compiler_params=_cparams(est_conv2),
    )(c1, c1, c1, scale1, bias1, w2p)

    scale2, bias2 = _fold_bn(s2[:, :, 0, :].sum((0, 1)), s2[:, :, 1, :].sum((0, 1)),
                             prep["g2"], prep["b2"], N)

    # ---- pass 3: BN2 + shortcut-BN + residual add + ReLU ----
    out_p = pl.pallas_call(
        _bn_add_relu_kernel,
        grid=grid,
        in_specs=[row_out, row_out,
                  chan_spec, chan_spec, chan_spec, chan_spec],
        out_specs=row_out,
        out_shape=jax.ShapeDtypeStruct((B, H, W, Coutp), jnp.float32),
        compiler_params=_cparams(est_add),
    )(c2, cs, scale2, bias2, scale_s, bias_s)

    out = out_p[..., :cout]
    return jnp.transpose(out, (0, 3, 1, 2))


# ---------------- plain-JAX f32 reference (for verification) ----------------
def _ref_basic_block(x_nchw, params):
    x = jnp.transpose(x_nchw, (0, 2, 3, 1)).astype(jnp.float32)  # NHWC

    def conv(x, w_hwio, pad):
        return jax.lax.conv_general_dilated(
            x, w_hwio, window_strides=(1, 1),
            padding=[(pad, pad), (pad, pad)],
            dimension_numbers=("NHWC", "HWIO", "NHWC"))

    def bn(x, g, b):
        mean = x.mean(axis=(0, 1, 2), keepdims=True)
        var = ((x - mean) ** 2).mean(axis=(0, 1, 2), keepdims=True)
        return (x - mean) / jnp.sqrt(var + EPS) * g.reshape(1, 1, 1, -1) \
            + b.reshape(1, 1, 1, -1)

    out = jax.nn.relu(bn(conv(x, params["w1"], 1), params["g1"], params["b1"]))
    out = bn(conv(out, params["w2"], 1), params["g2"], params["b2"])
    ws = params["ws"].reshape(1, 1, *params["ws"].shape)  # 1x1 conv
    sc = bn(conv(x, ws, 0), params["gs"], params["bs"])
    out = jax.nn.relu(out + sc)
    return jnp.transpose(out, (0, 3, 1, 2))


if __name__ == "__main__":
    # Small shapes: batch=2, in_planes=4, planes=8, spatial=16x16
    # (in_planes != expansion*planes -> shortcut has 1x1 conv + BN).
    B, Cin, H, W = 2, 4, 16, 16
    Cout = 8

    key = jax.random.PRNGKey(0)
    ks = jax.random.split(key, 8)

    x = jax.random.normal(ks[0], (B, Cin, H, W), dtype=jnp.float32)

    params = {
        # conv weights stored HWIO-style: (3,3,Cin,Cout) / (Cin,Cout) for 1x1
        "w1": 0.1 * jax.random.normal(ks[1], (3, 3, Cin, Cout), jnp.float32),
        "w2": 0.1 * jax.random.normal(ks[2], (3, 3, Cout, Cout), jnp.float32),
        "ws": 0.1 * jax.random.normal(ks[3], (Cin, Cout), jnp.float32),
        # BatchNorm affine params
        "g1": 1.0 + 0.1 * jax.random.normal(ks[4], (Cout,), jnp.float32),
        "b1": 0.1 * jax.random.normal(ks[5], (Cout,), jnp.float32),
        "g2": 1.0 + 0.1 * jax.random.normal(ks[6], (Cout,), jnp.float32),
        "b2": 0.1 * jax.random.normal(ks[7], (Cout,), jnp.float32),
        "gs": jnp.ones((Cout,), jnp.float32),
        "bs": jnp.zeros((Cout,), jnp.float32),
    }

    # One-time weight / BN-param packing, outside the jitted forward.
    prep = prepare_block_params(params)

    out = jax.block_until_ready(basic_block_forward(x, prep, cout=Cout))
    ref = jax.block_until_ready(_ref_basic_block(x, params))

    assert out.shape == (B, Cout, H, W), out.shape
    max_err = float(jnp.max(jnp.abs(out - ref)))
    # bf16 MXU operands + bf16 inter-pass intermediates (f32 accumulation and
    # BN statistics) through two chained convs + BN -> relaxed tolerance vs the
    # pure-f32 reference.
    assert jnp.allclose(out, ref, rtol=7.5e-2, atol=7.5e-2), \
        f"max abs diff = {max_err}"

    print("KERNEL_OK")
</pallas_src>

<mosaic_0001>
module attributes {stable_mosaic.version = 11 : i64} {
  func.func @_conv1_shortcut_kernel(%arg0: i32, %arg1: i32, %arg2: memref<1x8x16x4xf32, #tpu.memory_space<vmem>>, %arg3: memref<1x1x16x4xf32, #tpu.memory_space<vmem>>, %arg4: memref<1x1x16x4xf32, #tpu.memory_space<vmem>>, %arg5: memref<1152x256xbf16, #tpu.memory_space<vmem>>, %arg6: memref<1x8x16x128xbf16, #tpu.memory_space<vmem>>, %arg7: memref<1x8x16x128xbf16, #tpu.memory_space<vmem>>, %arg8: memref<1x1x2x128xf32, #tpu.memory_space<vmem>>, %arg9: memref<1x1x2x128xf32, #tpu.memory_space<vmem>>, %arg10: memref<10x18x128xf32, #tpu.memory_space<vmem>>) attributes {dimension_semantics = [#tpu.dimension_semantics<parallel>, #tpu.dimension_semantics<parallel>], iteration_bounds = array<i64: 2, 2>, scalar_prefetch = 0 : i64, scratch_operands = 1 : i64, tpu.core_type = #tpu.core_type<tc>, window_params = [{transform_indices = @transform_0, window_bounds = array<i64: 1, 8, 16, 4>}, {transform_indices = @transform_1, window_bounds = array<i64: 1, 1, 16, 4>}, {transform_indices = @transform_2, window_bounds = array<i64: 1, 1, 16, 4>}, {pipeline_mode = #tpu.pipeline_mode<synchronous>, transform_indices = @transform_3, window_bounds = array<i64: 1152, 256>}, {transform_indices = @transform_4, window_bounds = array<i64: 1, 8, 16, 128>}, {transform_indices = @transform_5, window_bounds = array<i64: 1, 8, 16, 128>}, {transform_indices = @transform_6, window_bounds = array<i64: 1, 1, 2, 128>}, {transform_indices = @transform_7, window_bounds = array<i64: 1, 1, 2, 128>}]} {
    %cst = arith.constant 0.000000e+00 : f32
    %0 = vector.broadcast %cst : f32 to vector<10x18x128xf32>
    %c0 = arith.constant 0 : index
    %c0_0 = arith.constant 0 : index
    %c0_1 = arith.constant 0 : index
    %1 = vector.load %arg10[%c0, %c0_0, %c0_1] : memref<10x18x128xf32, #tpu.memory_space<vmem>>, vector<10x18x128xf32>
    tpu.vector_store %arg10[%c0, %c0_0, %c0_1], %0 {strides = array<i32>} : memref<10x18x128xf32, #tpu.memory_space<vmem>>, vector<10x18x128xf32>,
    %c0_2 = arith.constant 0 : index
    %c0_3 = arith.constant 0 : index
    %c0_4 = arith.constant 0 : index
    %c0_5 = arith.constant 0 : index
    %2 = vector.load %arg2[%c0_2, %c0_3, %c0_4, %c0_5] : memref<1x8x16x4xf32, #tpu.memory_space<vmem>>, vector<1x8x16x4xf32>
    %3 = vector.shape_cast %2 : vector<1x8x16x4xf32> to vector<8x16x4xf32>
    %c1 = arith.constant 1 : index
    %c1_6 = arith.constant 1 : index
    %c0_7 = arith.constant 0 : index
    %4 = vector.load %arg10[%c1, %c1_6, %c0_7] : memref<10x18x128xf32, #tpu.memory_space<vmem>>, vector<8x16x4xf32>
    tpu.vector_store %arg10[%c1, %c1_6, %c0_7], %3 {strides = array<i32>} : memref<10x18x128xf32, #tpu.memory_space<vmem>>, vector<8x16x4xf32>,
    %c0_8 = arith.constant 0 : index
    %c0_9 = arith.constant 0 : index
    %c0_10 = arith.constant 0 : index
    %c0_11 = arith.constant 0 : index
    %5 = vector.load %arg3[%c0_8, %c0_9, %c0_10, %c0_11] : memref<1x1x16x4xf32, #tpu.memory_space<vmem>>, vector<1x1x16x4xf32>
    %6 = vector.shape_cast %5 : vector<1x1x16x4xf32> to vector<1x16x4xf32>
    %c0_12 = arith.constant 0 : index
    %c0_13 = arith.constant 0 : index
    %c0_14 = arith.constant 0 : index
    %c0_15 = arith.constant 0 : index
    %7 = vector.load %arg4[%c0_12, %c0_13, %c0_14, %c0_15] : memref<1x1x16x4xf32, #tpu.memory_space<vmem>>, vector<1x1x16x4xf32>
    %8 = vector.shape_cast %7 : vector<1x1x16x4xf32> to vector<1x16x4xf32>
    %c0_i32 = arith.constant 0 : i32
    %9 = arith.cmpi eq, %arg1, %c0_i32 : i32
    %cst_16 = arith.constant 0.000000e+00 : f32
    %10 = vector.broadcast %cst_16 : f32 to vector<1x16x4xf32>
    %11 = arith.select %9, %10, %6 : vector<1x16x4xf32>
    %c0_17 = arith.constant 0 : index
    %c1_18 = arith.constant 1 : index
    %c0_19 = arith.constant 0 : index
    %12 = vector.load %arg10[%c0_17, %c1_18, %c0_19] : memref<10x18x128xf32, #tpu.memory_space<vmem>>, vector<1x16x4xf32>
    tpu.vector_store %arg10[%c0_17, %c1_18, %c0_19], %11 {strides = array<i32>} : memref<10x18x128xf32, #tpu.memory_space<vmem>>, vector<1x16x4xf32>,
    %c1_i32 = arith.constant 1 : i32
    %13 = arith.cmpi eq, %arg1, %c1_i32 : i32
    %cst_20 = arith.constant 0.000000e+00 : f32
    %14 = vector.broadcast %cst_20 : f32 to vector<1x16x4xf32>
    %15 = arith.select %13, %14, %8 : vector<1x16x4xf32>
    %c9 = arith.constant 9 : index
    %c1_21 = arith.constant 1 : index
    %c0_22 = arith.constant 0 : index
    %16 = vector.load %arg10[%c9, %c1_21, %c0_22] : memref<10x18x128xf32, #tpu.memory_space<vmem>>, vector<1x16x4xf32>
    tpu.vector_store %arg10[%c9, %c1_21, %c0_22], %15 {strides = array<i32>} : memref<10x18x128xf32, #tpu.memory_space<vmem>>, vector<1x16x4xf32>,
    %c0_23 = arith.constant 0 : index
    %c0_24 = arith.constant 0 : index
    %c0_25 = arith.constant 0 : index
    %17 = vector.load %arg10[%c0_23, %c0_24, %c0_25] : memref<10x18x128xf32, #tpu.memory_space<vmem>>, vector<8x16x128xf32>
    %18 = arith.truncf %17 : vector<8x16x128xf32> to vector<8x16x128xbf16>
    %c0_26 = arith.constant 0 : index
    %c1_27 = arith.constant 1 : index
    %c0_28 = arith.constant 0 : index
    %19 = vector.load %arg10[%c0_26, %c1_27, %c0_28] : memref<10x18x128xf32, #tpu.memory_space<vmem>>, vector<8x16x128xf32>
    %20 = arith.truncf %19 : vector<8x16x128xf32> to vector<8x16x128xbf16>
    %c0_29 = arith.constant 0 : index
    %c2 = arith.constant 2 : index
    %c0_30 = arith.constant 0 : index
    %21 = vector.load %arg10[%c0_29, %c2, %c0_30] : memref<10x18x128xf32, #tpu.memory_space<vmem>>, vector<8x16x128xf32>
    %22 = arith.truncf %21 : vector<8x16x128xf32> to vector<8x16x128xbf16>
    %c1_31 = arith.constant 1 : index
    %c0_32 = arith.constant 0 : index
    %c0_33 = arith.constant 0 : index
    %23 = vector.load %arg10[%c1_31, %c0_32, %c0_33] : memref<10x18x128xf32, #tpu.memory_space<vmem>>, vector<8x16x128xf32>
    %24 = arith.truncf %23 : vector<8x16x128xf32> to vector<8x16x128xbf16>
    %c1_34 = arith.constant 1 : index
    %c1_35 = arith.constant 1 : index
    %c0_36 = arith.constant 0 : index
    %25 = vector.load %arg10[%c1_34, %c1_35, %c0_36] : memref<10x18x128xf32, #tpu.memory_space<vmem>>, vector<8x16x128xf32>
    %26 = arith.truncf %25 : vector<8x16x128xf32> to vector<8x16x128xbf16>
    %c1_37 = arith.constant 1 : index
    %c2_38 = arith.constant 2 : index
    %c0_39 = arith.constant 0 : index
    %27 = vector.load %arg10[%c1_37, %c2_38, %c0_39] : memref<10x18x128xf32, #tpu.memory_space<vmem>>, vector<8x16x128xf32>
    %28 = arith.truncf %27 : vector<8x16x128xf32> to vector<8x16x128xbf16>
    %c2_40 = arith.constant 2 : index
    %c0_41 = arith.constant 0 : index
    %c0_42 = arith.constant 0 : index
    %29 = vector.load %arg10[%c2_40, %c0_41, %c0_42] : memref<10x18x128xf32, #tpu.memory_space<vmem>>, vector<8x16x128xf32>
    %30 = arith.truncf %29 : vector<8x16x128xf32> to vector<8x16x128xbf16>
    %c2_43 = arith.constant 2 : index
    %c1_44 = arith.constant 1 : index
    %c0_45 = arith.constant 0 : index
    %31 = vector.load %arg10[%c2_43, %c1_44, %c0_45] : memref<10x18x128xf32, #tpu.memory_space<vmem>>, vector<8x16x128xf32>
    %32 = arith.truncf %31 : vector<8x16x128xf32> to vector<8x16x128xbf16>
    %c2_46 = arith.constant 2 : index
    %c2_47 = arith.constant 2 : index
    %c0_48 = arith.constant 0 : index
    %33 = vector.load %arg10[%c2_46, %c2_47, %c0_48] : memref<10x18x128xf32, #tpu.memory_space<vmem>>, vector<8x16x128xf32>
    %34 = arith.truncf %33 : vector<8x16x128xf32> to vector<8x16x128xbf16>
    %35 = tpu.concatenate %18, %20, %22, %24, %26, %28, %30, %32, %34 in 2 : vector<8x16x128xbf16>, vector<8x16x128xbf16>, vector<8x16x128xbf16>, vector<8x16x128xbf16>, vector<8x16x128xbf16>, vector<8x16x128xbf16>, vector<8x16x128xbf16>, vector<8x16x128xbf16>, vector<8x16x128xbf16> -> vector<8x16x1152xbf16>
    %36 = vector.shape_cast %35 : vector<8x16x1152xbf16> to vector<128x1152xbf16>
    %c0_49 = arith.constant 0 : index
    %c0_50 = arith.constant 0 : index
    %37 = vector.load %arg5[%c0_49, %c0_50] : memref<1152x256xbf16, #tpu.memory_space<vmem>>, vector<1152x256xbf16>
    %cst_51 = arith.constant dense<0.000000e+00> : vector<128x256xf32>
    %38 = tpu.matmul %36, %37, %cst_51 {dimension_numbers = #tpu.dot_dimension_numbers<[1], [0], [0], [1], [0, 0, 1, 1], [], []>} : vector<128x1152xbf16>, vector<1152x256xbf16>, vector<128x256xf32> -> vector<128x256xf32>
    %39 = vector.extract_strided_slice %38 {offsets = [0, 0], sizes = [128, 128], strides = [1, 1]} : vector<128x256xf32> to vector<128x128xf32>
    %40 = vector.extract_strided_slice %38 {offsets = [0, 128], sizes = [128, 128], strides = [1, 1]} : vector<128x256xf32> to vector<128x128xf32>
    %cst_52 = arith.constant dense<0.000000e+00> : vector<128xf32>
    %41 = vector.multi_reduction <add>, %39, %cst_52 [0] : vector<128x128xf32> to vector<128xf32>
    %42 = vector.shape_cast %41 : vector<128xf32> to vector<1x128xf32>
    %43 = arith.mulf %39, %39 : vector<128x128xf32>
    %cst_53 = arith.constant dense<0.000000e+00> : vector<128xf32>
    %44 = vector.multi_reduction <add>, %43, %cst_53 [0] : vector<128x128xf32> to vector<128xf32>
    %45 = vector.shape_cast %44 : vector<128xf32> to vector<1x128xf32>
    %46 = tpu.concatenate %42, %45 in 0 : vector<1x128xf32>, vector<1x128xf32> -> vector<2x128xf32>
    %c0_54 = arith.constant 0 : index
    %c0_55 = arith.constant 0 : index
    %c0_56 = arith.constant 0 : index
    %c0_57 = arith.constant 0 : index
    %47 = vector.load %arg8[%c0_54, %c0_55, %c0_56, %c0_57] : memref<1x1x2x128xf32, #tpu.memory_space<vmem>>, vector<1x1x2x128xf32>
    %48 = vector.shape_cast %47 : vector<1x1x2x128xf32> to vector<2x128xf32>
    %49 = vector.shape_cast %46 : vector<2x128xf32> to vector<1x1x2x128xf32>
    tpu.vector_store %arg8[%c0_54, %c0_55, %c0_56, %c0_57], %49 {strides = array<i32>} : memref<1x1x2x128xf32, #tpu.memory_space<vmem>>, vector<1x1x2x128xf32>,
    %cst_58 = arith.constant dense<0.000000e+00> : vector<128xf32>
    %50 = vector.multi_reduction <add>, %40, %cst_58 [0] : vector<128x128xf32> to vector<128xf32>
    %51 = vector.shape_cast %50 : vector<128xf32> to vector<1x128xf32>
    %52 = arith.mulf %40, %40 : vector<128x128xf32>
    %cst_59 = arith.constant dense<0.000000e+00> : vector<128xf32>
    %53 = vector.multi_reduction <add>, %52, %cst_59 [0] : vector<128x128xf32> to vector<128xf32>
    %54 = vector.shape_cast %53 : vector<128xf32> to vector<1x128xf32>
    %55 = tpu.concatenate %51, %54 in 0 : vector<1x128xf32>, vector<1x128xf32> -> vector<2x128xf32>
    %c0_60 = arith.constant 0 : index
    %c0_61 = arith.constant 0 : index
    %c0_62 = arith.constant 0 : index
    %c0_63 = arith.constant 0 : index
    %56 = vector.load %arg9[%c0_60, %c0_61, %c0_62, %c0_63] : memref<1x1x2x128xf32, #tpu.memory_space<vmem>>, vector<1x1x2x128xf32>
    %57 = vector.shape_cast %56 : vector<1x1x2x128xf32> to vector<2x128xf32>
    %58 = vector.shape_cast %55 : vector<2x128xf32> to vector<1x1x2x128xf32>
    tpu.vector_store %arg9[%c0_60, %c0_61, %c0_62, %c0_63], %58 {strides = array<i32>} : memref<1x1x2x128xf32, #tpu.memory_space<vmem>>, vector<1x1x2x128xf32>,
    %59 = vector.shape_cast %39 : vector<128x128xf32> to vector<8x16x128xf32>
    %60 = arith.truncf %59 : vector<8x16x128xf32> to vector<8x16x128xbf16>
    %c0_64 = arith.constant 0 : index
    %c0_65 = arith.constant 0 : index
    %c0_66 = arith.constant 0 : index
    %c0_67 = arith.constant 0 : index
    %61 = vector.load %arg6[%c0_64, %c0_65, %c0_66, %c0_67] : memref<1x8x16x128xbf16, #tpu.memory_space<vmem>>, vector<1x8x16x128xbf16>
    %62 = vector.shape_cast %61 : vector<1x8x16x128xbf16> to vector<8x16x128xbf16>
    %63 = vector.shape_cast %60 : vector<8x16x128xbf16> to vector<1x8x16x128xbf16>
    tpu.vector_store %arg6[%c0_64, %c0_65, %c0_66, %c0_67], %63 {strides = array<i32>} : memref<1x8x16x128xbf16, #tpu.memory_space<vmem>>, vector<1x8x16x128xbf16>,
    %64 = vector.shape_cast %40 : vector<128x128xf32> to vector<8x16x128xf32>
    %65 = arith.truncf %64 : vector<8x16x128xf32> to vector<8x16x128xbf16>
    %c0_68 = arith.constant 0 : index
    %c0_69 = arith.constant 0 : index
    %c0_70 = arith.constant 0 : index
    %c0_71 = arith.constant 0 : index
    %66 = vector.load %arg7[%c0_68, %c0_69, %c0_70, %c0_71] : memref<1x8x16x128xbf16, #tpu.memory_space<vmem>>, vector<1x8x16x128xbf16>
    %67 = vector.shape_cast %66 : vector<1x8x16x128xbf16> to vector<8x16x128xbf16>
    %68 = vector.shape_cast %65 : vector<8x16x128xbf16> to vector<1x8x16x128xbf16>
    tpu.vector_store %arg7[%c0_68, %c0_69, %c0_70, %c0_71], %68 {strides = array<i32>} : memref<1x8x16x128xbf16, #tpu.memory_space<vmem>>, vector<1x8x16x128xbf16>,
    return
  }
  func.func @transform_0(%arg0: i32, %arg1: i32) -> (i32, i32, i32, i32) {
    %c0_i32 = arith.constant 0 : i32
    %c0_i32_0 = arith.constant 0 : i32
    %c0_i32_1 = arith.constant 0 : i32
    return %arg0, %arg1, %c0_i32, %c0_i32_0 : i32, i32, i32, i32
  }
  func.func @transform_1(%arg0: i32, %arg1: i32) -> (i32, i32, i32, i32) {
    %c8_i32 = arith.constant 8 : i32
    %0 = arith.muli %arg1, %c8_i32 : i32
    %c1_i32 = arith.constant 1 : i32
    %1 = arith.subi %0, %c1_i32 : i32
    %c0_i32 = arith.constant 0 : i32
    %2 = arith.maxsi %1, %c0_i32 : i32
    %c0_i32_0 = arith.constant 0 : i32
    %c0_i32_1 = arith.constant 0 : i32
    %c0_i32_2 = arith.constant 0 : i32
    return %arg0, %2, %c0_i32_0, %c0_i32_1 : i32, i32, i32, i32
  }
  func.func @transform_2(%arg0: i32, %arg1: i32) -> (i32, i32, i32, i32) {
    %c1_i32 = arith.constant 1 : i32
    %0 = arith.addi %arg1, %c1_i32 : i32
    %c8_i32 = arith.constant 8 : i32
    %1 = arith.muli %0, %c8_i32 : i32
    %c15_i32 = arith.constant 15 : i32
    %2 = arith.minsi %1, %c15_i32 : i32
    %c0_i32 = arith.constant 0 : i32
    %c0_i32_0 = arith.constant 0 : i32
    %c0_i32_1 = arith.constant 0 : i32
    return %arg0, %2, %c0_i32, %c0_i32_0 : i32, i32, i32, i32
  }
  func.func @transform_3(%arg0: i32, %arg1: i32) -> (i32, i32) {
    %c0_i32 = arith.constant 0 : i32
    %c0_i32_0 = arith.constant 0 : i32
    %c0_i32_1 = arith.constant 0 : i32
    return %c0_i32, %c0_i32_0 : i32, i32
  }
  func.func @transform_4(%arg0: i32, %arg1: i32) -> (i32, i32, i32, i32) {
    %c0_i32 = arith.constant 0 : i32
    %c0_i32_0 = arith.constant 0 : i32
    %c0_i32_1 = arith.constant 0 : i32
    return %arg0, %arg1, %c0_i32, %c0_i32_0 : i32, i32, i32, i32
  }
  func.func @transform_5(%arg0: i32, %arg1: i32) -> (i32, i32, i32, i32) {
    %c0_i32 = arith.constant 0 : i32
    %c0_i32_0 = arith.constant 0 : i32
    %c0_i32_1 = arith.constant 0 : i32
    return %arg0, %arg1, %c0_i32, %c0_i32_0 : i32, i32, i32, i32
  }
  func.func @transform_6(%arg0: i32, %arg1: i32) -> (i32, i32, i32, i32) {
    %c0_i32 = arith.constant 0 : i32
    %c0_i32_0 = arith.constant 0 : i32
    %c0_i32_1 = arith.constant 0 : i32
    return %arg0, %arg1, %c0_i32, %c0_i32_0 : i32, i32, i32, i32
  }
  func.func @transform_7(%arg0: i32, %arg1: i32) -> (i32, i32, i32, i32) {
    %c0_i32 = arith.constant 0 : i32
    %c0_i32_0 = arith.constant 0 : i32
    %c0_i32_1 = arith.constant 0 : i32
    return %arg0, %arg1, %c0_i32, %c0_i32_0 : i32, i32, i32, i32
  }
}

module attributes {stable_mosaic.version = 11 : i64} {
  func.func @_bn_relu_conv2_kernel(%arg0: i32, %arg1: i32, %arg2: memref<1x8x16x128xbf16, #tpu.memory_space<vmem>>, %arg3: memref<1x1x16x128xbf16, #tpu.memory_space<vmem>>, %arg4: memref<1x1x16x128xbf16, #tpu.memory_space<vmem>>, %arg5: memref<1x128xf32, #tpu.memory_space<vmem>>, %arg6: memref<1x128xf32, #tpu.memory_space<vmem>>, %arg7: memref<1152x128xbf16, #tpu.memory_space<vmem>>, %arg8: memref<1x8x16x128xbf16, #tpu.memory_space<vmem>>, %arg9: memref<1x1x2x128xf32, #tpu.memory_space<vmem>>, %arg10: memref<10x18x128xf32, #tpu.memory_space<vmem>>) attributes {dimension_semantics = [#tpu.dimension_semantics<parallel>, #tpu.dimension_semantics<parallel>], iteration_bounds = array<i64: 2, 2>, scalar_prefetch = 0 : i64, scratch_operands = 1 : i64, tpu.core_type = #tpu.core_type<tc>, window_params = [{transform_indices = @transform_0, window_bounds = array<i64: 1, 8, 16, 128>}, {transform_indices = @transform_1, window_bounds = array<i64: 1, 1, 16, 128>}, {transform_indices = @transform_2, window_bounds = array<i64: 1, 1, 16, 128>}, {pipeline_mode = #tpu.pipeline_mode<synchronous>, transform_indices = @transform_3, window_bounds = array<i64: 1, 128>}, {pipeline_mode = #tpu.pipeline_mode<synchronous>, transform_indices = @transform_4, window_bounds = array<i64: 1, 128>}, {pipeline_mode = #tpu.pipeline_mode<synchronous>, transform_indices = @transform_5, window_bounds = array<i64: 1152, 128>}, {transform_indices = @transform_6, window_bounds = array<i64: 1, 8, 16, 128>}, {transform_indices = @transform_7, window_bounds = array<i64: 1, 1, 2, 128>}]} {
    %c0 = arith.constant 0 : index
    %c0_0 = arith.constant 0 : index
    %0 = vector.load %arg5[%c0, %c0_0] : memref<1x128xf32, #tpu.memory_space<vmem>>, vector<1x128xf32>
    %1 = vector.shape_cast %0 : vector<1x128xf32> to vector<1x1x128xf32>
    %c0_1 = arith.constant 0 : index
    %c0_2 = arith.constant 0 : index
    %2 = vector.load %arg6[%c0_1, %c0_2] : memref<1x128xf32, #tpu.memory_space<vmem>>, vector<1x128xf32>
    %3 = vector.shape_cast %2 : vector<1x128xf32> to vector<1x1x128xf32>
    %cst = arith.constant 0.000000e+00 : f32
    %4 = vector.broadcast %cst : f32 to vector<10x1x128xf32>
    %c0_3 = arith.constant 0 : index
    %c0_4 = arith.constant 0 : index
    %c0_5 = arith.constant 0 : index
    %5 = vector.load %arg10[%c0_3, %c0_4, %c0_5] : memref<10x18x128xf32, #tpu.memory_space<vmem>>, vector<10x1x128xf32>
    tpu.vector_store %arg10[%c0_3, %c0_4, %c0_5], %4 {strides = array<i32>} : memref<10x18x128xf32, #tpu.memory_space<vmem>>, vector<10x1x128xf32>,
    %c0_6 = arith.constant 0 : index
    %c17 = arith.constant 17 : index
    %c0_7 = arith.constant 0 : index
    %6 = vector.load %arg10[%c0_6, %c17, %c0_7] : memref<10x18x128xf32, #tpu.memory_space<vmem>>, vector<10x1x128xf32>
    tpu.vector_store %arg10[%c0_6, %c17, %c0_7], %4 {strides = array<i32>} : memref<10x18x128xf32, #tpu.memory_space<vmem>>, vector<10x1x128xf32>,
    %c0_8 = arith.constant 0 : index
    %c0_9 = arith.constant 0 : index
    %c0_10 = arith.constant 0 : index
    %c0_11 = arith.constant 0 : index
    %7 = vector.load %arg2[%c0_8, %c0_9, %c0_10, %c0_11] : memref<1x8x16x128xbf16, #tpu.memory_space<vmem>>, vector<1x8x16x128xbf16>
    %8 = vector.shape_cast %7 : vector<1x8x16x128xbf16> to vector<8x16x128xbf16>
    %9 = arith.extf %8 : vector<8x16x128xbf16> to vector<8x16x128xf32>
    %10 = vector.broadcast %1 : vector<1x1x128xf32> to vector<8x16x128xf32>
    %11 = arith.mulf %9, %10 : vector<8x16x128xf32>
    %12 = vector.broadcast %3 : vector<1x1x128xf32> to vector<8x16x128xf32>
    %13 = arith.addf %11, %12 : vector<8x16x128xf32>
    %cst_12 = arith.constant 0.000000e+00 : f32
    %14 = vector.broadcast %cst_12 : f32 to vector<8x16x128xf32>
    %15 = arith.maximumf %13, %14 : vector<8x16x128xf32>
    %c1 = arith.constant 1 : index
    %c1_13 = arith.constant 1 : index
    %c0_14 = arith.constant 0 : index
    %16 = vector.load %arg10[%c1, %c1_13, %c0_14] : memref<10x18x128xf32, #tpu.memory_space<vmem>>, vector<8x16x128xf32>
    tpu.vector_store %arg10[%c1, %c1_13, %c0_14], %15 {strides = array<i32>} : memref<10x18x128xf32, #tpu.memory_space<vmem>>, vector<8x16x128xf32>,
    %c0_15 = arith.constant 0 : index
    %c0_16 = arith.constant 0 : index
    %c0_17 = arith.constant 0 : index
    %c0_18 = arith.constant 0 : index
    %17 = vector.load %arg3[%c0_15, %c0_16, %c0_17, %c0_18] : memref<1x1x16x128xbf16, #tpu.memory_space<vmem>>, vector<1x1x16x128xbf16>
    %18 = vector.shape_cast %17 : vector<1x1x16x128xbf16> to vector<1x16x128xbf16>
    %19 = arith.extf %18 : vector<1x16x128xbf16> to vector<1x16x128xf32>
    %20 = vector.broadcast %1 : vector<1x1x128xf32> to vector<1x16x128xf32>
    %21 = arith.mulf %19, %20 : vector<1x16x128xf32>
    %22 = vector.broadcast %3 : vector<1x1x128xf32> to vector<1x16x128xf32>
    %23 = arith.addf %21, %22 : vector<1x16x128xf32>
    %cst_19 = arith.constant 0.000000e+00 : f32
    %24 = vector.broadcast %cst_19 : f32 to vector<1x16x128xf32>
    %25 = arith.maximumf %23, %24 : vector<1x16x128xf32>
    %c0_20 = arith.constant 0 : index
    %c0_21 = arith.constant 0 : index
    %c0_22 = arith.constant 0 : index
    %c0_23 = arith.constant 0 : index
    %26 = vector.load %arg4[%c0_20, %c0_21, %c0_22, %c0_23] : memref<1x1x16x128xbf16, #tpu.memory_space<vmem>>, vector<1x1x16x128xbf16>
    %27 = vector.shape_cast %26 : vector<1x1x16x128xbf16> to vector<1x16x128xbf16>
    %28 = arith.extf %27 : vector<1x16x128xbf16> to vector<1x16x128xf32>
    %29 = vector.broadcast %1 : vector<1x1x128xf32> to vector<1x16x128xf32>
    %30 = arith.mulf %28, %29 : vector<1x16x128xf32>
    %31 = vector.broadcast %3 : vector<1x1x128xf32> to vector<1x16x128xf32>
    %32 = arith.addf %30, %31 : vector<1x16x128xf32>
    %cst_24 = arith.constant 0.000000e+00 : f32
    %33 = vector.broadcast %cst_24 : f32 to vector<1x16x128xf32>
    %34 = arith.maximumf %32, %33 : vector<1x16x128xf32>
    %c0_i32 = arith.constant 0 : i32
    %35 = arith.cmpi eq, %arg1, %c0_i32 : i32
    %cst_25 = arith.constant 0.000000e+00 : f32
    %36 = vector.broadcast %cst_25 : f32 to vector<1x16x128xf32>
    %37 = arith.select %35, %36, %25 : vector<1x16x128xf32>
    %c0_26 = arith.constant 0 : index
    %c1_27 = arith.constant 1 : index
    %c0_28 = arith.constant 0 : index
    %38 = vector.load %arg10[%c0_26, %c1_27, %c0_28] : memref<10x18x128xf32, #tpu.memory_space<vmem>>, vector<1x16x128xf32>
    tpu.vector_store %arg10[%c0_26, %c1_27, %c0_28], %37 {strides = array<i32>} : memref<10x18x128xf32, #tpu.memory_space<vmem>>, vector<1x16x128xf32>,
    %c1_i32 = arith.constant 1 : i32
    %39 = arith.cmpi eq, %arg1, %c1_i32 : i32
    %cst_29 = arith.constant 0.000000e+00 : f32
    %40 = vector.broadcast %cst_29 : f32 to vector<1x16x128xf32>
    %41 = arith.select %39, %40, %34 : vector<1x16x128xf32>
    %c9 = arith.constant 9 : index
    %c1_30 = arith.constant 1 : index
    %c0_31 = arith.constant 0 : index
    %42 = vector.load %arg10[%c9, %c1_30, %c0_31] : memref<10x18x128xf32, #tpu.memory_space<vmem>>, vector<1x16x128xf32>
    tpu.vector_store %arg10[%c9, %c1_30, %c0_31], %41 {strides = array<i32>} : memref<10x18x128xf32, #tpu.memory_space<vmem>>, vector<1x16x128xf32>,
    %c0_32 = arith.constant 0 : index
    %c0_33 = arith.constant 0 : index
    %c0_34 = arith.constant 0 : index
    %43 = vector.load %arg10[%c0_32, %c0_33, %c0_34] : memref<10x18x128xf32, #tpu.memory_space<vmem>>, vector<8x16x128xf32>
    %44 = arith.truncf %43 : vector<8x16x128xf32> to vector<8x16x128xbf16>
    %c0_35 = arith.constant 0 : index
    %c1_36 = arith.constant 1 : index
    %c0_37 = arith.constant 0 : index
    %45 = vector.load %arg10[%c0_35, %c1_36, %c0_37] : memref<10x18x128xf32, #tpu.memory_space<vmem>>, vector<8x16x128xf32>
    %46 = arith.truncf %45 : vector<8x16x128xf32> to vector<8x16x128xbf16>
    %c0_38 = arith.constant 0 : index
    %c2 = arith.constant 2 : index
    %c0_39 = arith.constant 0 : index
    %47 = vector.load %arg10[%c0_38, %c2, %c0_39] : memref<10x18x128xf32, #tpu.memory_space<vmem>>, vector<8x16x128xf32>
    %48 = arith.truncf %47 : vector<8x16x128xf32> to vector<8x16x128xbf16>
    %c1_40 = arith.constant 1 : index
    %c0_41 = arith.constant 0 : index
    %c0_42 = arith.constant 0 : index
    %49 = vector.load %arg10[%c1_40, %c0_41, %c0_42] : memref<10x18x128xf32, #tpu.memory_space<vmem>>, vector<8x16x128xf32>
    %50 = arith.truncf %49 : vector<8x16x128xf32> to vector<8x16x128xbf16>
    %c1_43 = arith.constant 1 : index
    %c1_44 = arith.constant 1 : index
    %c0_45 = arith.constant 0 : index
    %51 = vector.load %arg10[%c1_43, %c1_44, %c0_45] : memref<10x18x128xf32, #tpu.memory_space<vmem>>, vector<8x16x128xf32>
    %52 = arith.truncf %51 : vector<8x16x128xf32> to vector<8x16x128xbf16>
    %c1_46 = arith.constant 1 : index
    %c2_47 = arith.constant 2 : index
    %c0_48 = arith.constant 0 : index
    %53 = vector.load %arg10[%c1_46, %c2_47, %c0_48] : memref<10x18x128xf32, #tpu.memory_space<vmem>>, vector<8x16x128xf32>
    %54 = arith.truncf %53 : vector<8x16x128xf32> to vector<8x16x128xbf16>
    %c2_49 = arith.constant 2 : index
    %c0_50 = arith.constant 0 : index
    %c0_51 = arith.constant 0 : index
    %55 = vector.load %arg10[%c2_49, %c0_50, %c0_51] : memref<10x18x128xf32, #tpu.memory_space<vmem>>, vector<8x16x128xf32>
    %56 = arith.truncf %55 : vector<8x16x128xf32> to vector<8x16x128xbf16>
    %c2_52 = arith.constant 2 : index
    %c1_53 = arith.constant 1 : index
    %c0_54 = arith.constant 0 : index
    %57 = vector.load %arg10[%c2_52, %c1_53, %c0_54] : memref<10x18x128xf32, #tpu.memory_space<vmem>>, vector<8x16x128xf32>
    %58 = arith.truncf %57 : vector<8x16x128xf32> to vector<8x16x128xbf16>
    %c2_55 = arith.constant 2 : index
    %c2_56 = arith.constant 2 : index
    %c0_57 = arith.constant 0 : index
    %59 = vector.load %arg10[%c2_55, %c2_56, %c0_57] : memref<10x18x128xf32, #tpu.memory_space<vmem>>, vector<8x16x128xf32>
    %60 = arith.truncf %59 : vector<8x16x128xf32> to vector<8x16x128xbf16>
    %61 = tpu.concatenate %44, %46, %48, %50, %52, %54, %56, %58, %60 in 2 : vector<8x16x128xbf16>, vector<8x16x128xbf16>, vector<8x16x128xbf16>, vector<8x16x128xbf16>, vector<8x16x128xbf16>, vector<8x16x128xbf16>, vector<8x16x128xbf16>, vector<8x16x128xbf16>, vector<8x16x128xbf16> -> vector<8x16x1152xbf16>
    %62 = vector.shape_cast %61 : vector<8x16x1152xbf16> to vector<128x1152xbf16>
    %c0_58 = arith.constant 0 : index
    %c0_59 = arith.constant 0 : index
    %63 = vector.load %arg7[%c0_58, %c0_59] : memref<1152x128xbf16, #tpu.memory_space<vmem>>, vector<1152x128xbf16>
    %cst_60 = arith.constant dense<0.000000e+00> : vector<128x128xf32>
    %64 = tpu.matmul %62, %63, %cst_60 {dimension_numbers = #tpu.dot_dimension_numbers<[1], [0], [0], [1], [0, 0, 1, 1], [], []>} : vector<128x1152xbf16>, vector<1152x128xbf16>, vector<128x128xf32> -> vector<128x128xf32>
    %cst_61 = arith.constant dense<0.000000e+00> : vector<128xf32>
    %65 = vector.multi_reduction <add>, %64, %cst_61 [0] : vector<128x128xf32> to vector<128xf32>
    %66 = vector.shape_cast %65 : vector<128xf32> to vector<1x128xf32>
    %67 = arith.mulf %64, %64 : vector<128x128xf32>
    %cst_62 = arith.constant dense<0.000000e+00> : vector<128xf32>
    %68 = vector.multi_reduction <add>, %67, %cst_62 [0] : vector<128x128xf32> to vector<128xf32>
    %69 = vector.shape_cast %68 : vector<128xf32> to vector<1x128xf32>
    %70 = tpu.concatenate %66, %69 in 0 : vector<1x128xf32>, vector<1x128xf32> -> vector<2x128xf32>
    %c0_63 = arith.constant 0 : index
    %c0_64 = arith.constant 0 : index
    %c0_65 = arith.constant 0 : index
    %c0_66 = arith.constant 0 : index
    %71 = vector.load %arg9[%c0_63, %c0_64, %c0_65, %c0_66] : memref<1x1x2x128xf32, #tpu.memory_space<vmem>>, vector<1x1x2x128xf32>
    %72 = vector.shape_cast %71 : vector<1x1x2x128xf32> to vector<2x128xf32>
    %73 = vector.shape_cast %70 : vector<2x128xf32> to vector<1x1x2x128xf32>
    tpu.vector_store %arg9[%c0_63, %c0_64, %c0_65, %c0_66], %73 {strides = array<i32>} : memref<1x1x2x128xf32, #tpu.memory_space<vmem>>, vector<1x1x2x128xf32>,
    %74 = vector.shape_cast %64 : vector<128x128xf32> to vector<8x16x128xf32>
    %75 = arith.truncf %74 : vector<8x16x128xf32> to vector<8x16x128xbf16>
    %c0_67 = arith.constant 0 : index
    %c0_68 = arith.constant 0 : index
    %c0_69 = arith.constant 0 : index
    %c0_70 = arith.constant 0 : index
    %76 = vector.load %arg8[%c0_67, %c0_68, %c0_69, %c0_70] : memref<1x8x16x128xbf16, #tpu.memory_space<vmem>>, vector<1x8x16x128xbf16>
    %77 = vector.shape_cast %76 : vector<1x8x16x128xbf16> to vector<8x16x128xbf16>
    %78 = vector.shape_cast %75 : vector<8x16x128xbf16> to vector<1x8x16x128xbf16>
    tpu.vector_store %arg8[%c0_67, %c0_68, %c0_69, %c0_70], %78 {strides = array<i32>} : memref<1x8x16x128xbf16, #tpu.memory_space<vmem>>, vector<1x8x16x128xbf16>,
    return
  }
  func.func @transform_0(%arg0: i32, %arg1: i32) -> (i32, i32, i32, i32) {
    %c0_i32 = arith.constant 0 : i32
    %c0_i32_0 = arith.constant 0 : i32
    %c0_i32_1 = arith.constant 0 : i32
    return %arg0, %arg1, %c0_i32, %c0_i32_0 : i32, i32, i32, i32
  }
  func.func @transform_1(%arg0: i32, %arg1: i32) -> (i32, i32, i32, i32) {
    %c8_i32 = arith.constant 8 : i32
    %0 = arith.muli %arg1, %c8_i32 : i32
    %c1_i32 = arith.constant 1 : i32
    %1 = arith.subi %0, %c1_i32 : i32
    %c0_i32 = arith.constant 0 : i32
    %2 = arith.maxsi %1, %c0_i32 : i32
    %c0_i32_0 = arith.constant 0 : i32
    %c0_i32_1 = arith.constant 0 : i32
    %c0_i32_2 = arith.constant 0 : i32
    return %arg0, %2, %c0_i32_0, %c0_i32_1 : i32, i32, i32, i32
  }
  func.func @transform_2(%arg0: i32, %arg1: i32) -> (i32, i32, i32, i32) {
    %c1_i32 = arith.constant 1 : i32
    %0 = arith.addi %arg1, %c1_i32 : i32
    %c8_i32 = arith.constant 8 : i32
    %1 = arith.muli %0, %c8_i32 : i32
    %c15_i32 = arith.constant 15 : i32
    %2 = arith.minsi %1, %c15_i32 : i32
    %c0_i32 = arith.constant 0 : i32
    %c0_i32_0 = arith.constant 0 : i32
    %c0_i32_1 = arith.constant 0 : i32
    return %arg0, %2, %c0_i32, %c0_i32_0 : i32, i32, i32, i32
  }
  func.func @transform_3(%arg0: i32, %arg1: i32) -> (i32, i32) {
    %c0_i32 = arith.constant 0 : i32
    %c0_i32_0 = arith.constant 0 : i32
    %c0_i32_1 = arith.constant 0 : i32
    return %c0_i32, %c0_i32_0 : i32, i32
  }
  func.func @transform_4(%arg0: i32, %arg1: i32) -> (i32, i32) {
    %c0_i32 = arith.constant 0 : i32
    %c0_i32_0 = arith.constant 0 : i32
    %c0_i32_1 = arith.constant 0 : i32
    return %c0_i32, %c0_i32_0 : i32, i32
  }
  func.func @transform_5(%arg0: i32, %arg1: i32) -> (i32, i32) {
    %c0_i32 = arith.constant 0 : i32
    %c0_i32_0 = arith.constant 0 : i32
    %c0_i32_1 = arith.constant 0 : i32
    return %c0_i32, %c0_i32_0 : i32, i32
  }
  func.func @transform_6(%arg0: i32, %arg1: i32) -> (i32, i32, i32, i32) {
    %c0_i32 = arith.constant 0 : i32
    %c0_i32_0 = arith.constant 0 : i32
    %c0_i32_1 = arith.constant 0 : i32
    return %arg0, %arg1, %c0_i32, %c0_i32_0 : i32, i32, i32, i32
  }
  func.func @transform_7(%arg0: i32, %arg1: i32) -> (i32, i32, i32, i32) {
    %c0_i32 = arith.constant 0 : i32
    %c0_i32_0 = arith.constant 0 : i32
    %c0_i32_1 = arith.constant 0 : i32
    return %arg0, %arg1, %c0_i32, %c0_i32_0 : i32, i32, i32, i32
  }
}

module attributes {stable_mosaic.version = 11 : i64} {
  func.func @_bn_add_relu_kernel(%arg0: i32, %arg1: i32, %arg2: memref<1x8x16x128xbf16, #tpu.memory_space<vmem>>, %arg3: memref<1x8x16x128xbf16, #tpu.memory_space<vmem>>, %arg4: memref<1x128xf32, #tpu.memory_space<vmem>>, %arg5: memref<1x128xf32, #tpu.memory_space<vmem>>, %arg6: memref<1x128xf32, #tpu.memory_space<vmem>>, %arg7: memref<1x128xf32, #tpu.memory_space<vmem>>, %arg8: memref<1x8x16x128xf32, #tpu.memory_space<vmem>>) attributes {dimension_semantics = [#tpu.dimension_semantics<parallel>, #tpu.dimension_semantics<parallel>], iteration_bounds = array<i64: 2, 2>, scalar_prefetch = 0 : i64, scratch_operands = 0 : i64, tpu.core_type = #tpu.core_type<tc>, window_params = [{transform_indices = @transform_0, window_bounds = array<i64: 1, 8, 16, 128>}, {transform_indices = @transform_1, window_bounds = array<i64: 1, 8, 16, 128>}, {pipeline_mode = #tpu.pipeline_mode<synchronous>, transform_indices = @transform_2, window_bounds = array<i64: 1, 128>}, {pipeline_mode = #tpu.pipeline_mode<synchronous>, transform_indices = @transform_3, window_bounds = array<i64: 1, 128>}, {pipeline_mode = #tpu.pipeline_mode<synchronous>, transform_indices = @transform_4, window_bounds = array<i64: 1, 128>}, {pipeline_mode = #tpu.pipeline_mode<synchronous>, transform_indices = @transform_5, window_bounds = array<i64: 1, 128>}, {transform_indices = @transform_6, window_bounds = array<i64: 1, 8, 16, 128>}]} {
    %c0 = arith.constant 0 : index
    %c0_0 = arith.constant 0 : index
    %0 = vector.load %arg4[%c0, %c0_0] : memref<1x128xf32, #tpu.memory_space<vmem>>, vector<1x128xf32>
    %1 = vector.shape_cast %0 : vector<1x128xf32> to vector<1x1x128xf32>
    %c0_1 = arith.constant 0 : index
    %c0_2 = arith.constant 0 : index
    %2 = vector.load %arg5[%c0_1, %c0_2] : memref<1x128xf32, #tpu.memory_space<vmem>>, vector<1x128xf32>
    %3 = vector.shape_cast %2 : vector<1x128xf32> to vector<1x1x128xf32>
    %c0_3 = arith.constant 0 : index
    %c0_4 = arith.constant 0 : index
    %4 = vector.load %arg6[%c0_3, %c0_4] : memref<1x128xf32, #tpu.memory_space<vmem>>, vector<1x128xf32>
    %5 = vector.shape_cast %4 : vector<1x128xf32> to vector<1x1x128xf32>
    %c0_5 = arith.constant 0 : index
    %c0_6 = arith.constant 0 : index
    %6 = vector.load %arg7[%c0_5, %c0_6] : memref<1x128xf32, #tpu.memory_space<vmem>>, vector<1x128xf32>
    %7 = vector.shape_cast %6 : vector<1x128xf32> to vector<1x1x128xf32>
    %c0_7 = arith.constant 0 : index
    %c0_8 = arith.constant 0 : index
    %c0_9 = arith.constant 0 : index
    %c0_10 = arith.constant 0 : index
    %8 = vector.load %arg2[%c0_7, %c0_8, %c0_9, %c0_10] : memref<1x8x16x128xbf16, #tpu.memory_space<vmem>>, vector<1x8x16x128xbf16>
    %9 = vector.shape_cast %8 : vector<1x8x16x128xbf16> to vector<8x16x128xbf16>
    %10 = arith.extf %9 : vector<8x16x128xbf16> to vector<8x16x128xf32>
    %11 = vector.broadcast %1 : vector<1x1x128xf32> to vector<8x16x128xf32>
    %12 = arith.mulf %10, %11 : vector<8x16x128xf32>
    %13 = vector.broadcast %3 : vector<1x1x128xf32> to vector<8x16x128xf32>
    %14 = arith.addf %12, %13 : vector<8x16x128xf32>
    %c0_11 = arith.constant 0 : index
    %c0_12 = arith.constant 0 : index
    %c0_13 = arith.constant 0 : index
    %c0_14 = arith.constant 0 : index
    %15 = vector.load %arg3[%c0_11, %c0_12, %c0_13, %c0_14] : memref<1x8x16x128xbf16, #tpu.memory_space<vmem>>, vector<1x8x16x128xbf16>
    %16 = vector.shape_cast %15 : vector<1x8x16x128xbf16> to vector<8x16x128xbf16>
    %17 = arith.extf %16 : vector<8x16x128xbf16> to vector<8x16x128xf32>
    %18 = vector.broadcast %5 : vector<1x1x128xf32> to vector<8x16x128xf32>
    %19 = arith.mulf %17, %18 : vector<8x16x128xf32>
    %20 = arith.addf %14, %19 : vector<8x16x128xf32>
    %21 = vector.broadcast %7 : vector<1x1x128xf32> to vector<8x16x128xf32>
    %22 = arith.addf %20, %21 : vector<8x16x128xf32>
    %cst = arith.constant 0.000000e+00 : f32
    %23 = vector.broadcast %cst : f32 to vector<8x16x128xf32>
    %24 = arith.maximumf %22, %23 : vector<8x16x128xf32>
    %c0_15 = arith.constant 0 : index
    %c0_16 = arith.constant 0 : index
    %c0_17 = arith.constant 0 : index
    %c0_18 = arith.constant 0 : index
    %25 = vector.load %arg8[%c0_15, %c0_16, %c0_17, %c0_18] : memref<1x8x16x128xf32, #tpu.memory_space<vmem>>, vector<1x8x16x128xf32>
    %26 = vector.shape_cast %25 : vector<1x8x16x128xf32> to vector<8x16x128xf32>
    %27 = vector.shape_cast %24 : vector<8x16x128xf32> to vector<1x8x16x128xf32>
    tpu.vector_store %arg8[%c0_15, %c0_16, %c0_17, %c0_18], %27 {strides = array<i32>} : memref<1x8x16x128xf32, #tpu.memory_space<vmem>>, vector<1x8x16x128xf32>,
    return
  }
  func.func @transform_0(%arg0: i32, %arg1: i32) -> (i32, i32, i32, i32) {
    %c0_i32 = arith.constant 0 : i32
    %c0_i32_0 = arith.constant 0 : i32
    %c0_i32_1 = arith.constant 0 : i32
    return %arg0, %arg1, %c0_i32, %c0_i32_0 : i32, i32, i32, i32
  }
  func.func @transform_1(%arg0: i32, %arg1: i32) -> (i32, i32, i32, i32) {
    %c0_i32 = arith.constant 0 : i32
    %c0_i32_0 = arith.constant 0 : i32
    %c0_i32_1 = arith.constant 0 : i32
    return %arg0, %arg1, %c0_i32, %c0_i32_0 : i32, i32, i32, i32
  }
  func.func @transform_2(%arg0: i32, %arg1: i32) -> (i32, i32) {
    %c0_i32 = arith.constant 0 : i32
    %c0_i32_0 = arith.constant 0 : i32
    %c0_i32_1 = arith.constant 0 : i32
    return %c0_i32, %c0_i32_0 : i32, i32
  }
  func.func @transform_3(%arg0: i32, %arg1: i32) -> (i32, i32) {
    %c0_i32 = arith.constant 0 : i32
    %c0_i32_0 = arith.constant 0 : i32
    %c0_i32_1 = arith.constant 0 : i32
    return %c0_i32, %c0_i32_0 : i32, i32
  }
  func.func @transform_4(%arg0: i32, %arg1: i32) -> (i32, i32) {
    %c0_i32 = arith.constant 0 : i32
    %c0_i32_0 = arith.constant 0 : i32
    %c0_i32_1 = arith.constant 0 : i32
    return %c0_i32, %c0_i32_0 : i32, i32
  }
  func.func @transform_5(%arg0: i32, %arg1: i32) -> (i32, i32) {
    %c0_i32 = arith.constant 0 : i32
    %c0_i32_0 = arith.constant 0 : i32
    %c0_i32_1 = arith.constant 0 : i32
    return %c0_i32, %c0_i32_0 : i32, i32
  }
  func.func @transform_6(%arg0: i32, %arg1: i32) -> (i32, i32, i32, i32) {
    %c0_i32 = arith.constant 0 : i32
    %c0_i32_0 = arith.constant 0 : i32
    %c0_i32_1 = arith.constant 0 : i32
    return %arg0, %arg1, %c0_i32, %c0_i32_0 : i32, i32, i32, i32
  }
}

</mosaic_0001>

<bundles_post_ra>
// kernel: basic_block_forward.5
= control target key start
LH: loop header
LB: loop body
LE: loop exit
PB: predicated region body
PF: predicated region fallthrough
CT: control target
= control target key end

     0   :  { %s875_s21 = smov 0   ;;  %s877_s22 = smov 0   ;;  %s1055_s0 = inlined_call_operand.vmem [shape: bf16[2,16,16,128], index: 0, kind: input, shape index: {}]   ;;  %s1056_s1 = inlined_call_operand.vmem [shape: bf16[2,16,16,128], index: 1, kind: input, shape index: {}]   ;;  %s1057_s2 = inlined_call_operand.vmem [shape: f32[1,128], index: 2, kind: input, shape index: {}]   ;;  %s1058_s3 = inlined_call_operand.vmem [shape: f32[1,128], index: 3, kind: input, shape index: {}]   ;;  %s1059_s4 = inlined_call_operand.vmem [shape: f32[1,128], index: 4, kind: input, shape index: {}]   ;;  %s1060_s5 = inlined_call_operand.vmem [shape: f32[1,128], index: 5, kind: input, shape index: {}]   ;;  %s1061_s6 = inlined_call_operand.vmem [shape: f32[2,16,16,128], index: 6, kind: output, shape index: {}]  }
   0x1   :  { %s879_s23 = smov 0   ;;  %s881_s24 = smov 0  }
   0x2   :  { %s883_s25 = smov 0  }
   0x3 LB: > { %s25_s26 = sadd.s32 1, %s830_s23  ;;  %s28_s27 = sadd.s32 1, %s834_s24  ;;  %s838_s25 = sphi %s883_s25, %s16_s25   ;;  %s834_s24 = sphi %s881_s24, %s1065_s24   ;;  %s830_s23 = sphi %s879_s23, %s1064_s23   ;;  %s826_s22 = sphi %s877_s22, %s1063_s22   ;;  %s822_s21 = sphi %s875_s21, %s1062_s21  }
   0x4   : > { %p26_p0 = scmp.ge.s32.totalorder %s25_s26, 2  ;;  %p663_p1 = scmp.ge.s32.totalorder %s838_s25, 1 }
   0x5   : > { %p252_p2 = scmp.lt.s32.totalorder %s838_s25, 5 }
   0x6   : > { %s1067_s26 = smov (%p26_p0, %s25_s26), 0  ;;  %s1069_s27 = smov (!%p26_p0, %s28_s27), %s834_s24 }
   0x7   : > { %p253_p3 = pnand %p663_p1, %p252_p2  ;;  %p30_p4 = scmp.ge.s32.totalorder %s1069_s27, 2 }
   0x8   : > { %s664_s28 = sshll.u32 (!%p253_p3), %s822_s21, 3  ;;  %p303_p5 = scmp.lt.s32.totalorder (!%p253_p3), %s826_s22, 1  ;;  %v921_v0 = vld [vmem:[%s1057_s2] ss:$0 sm:$0xff] (!%p253_p3) }
   0x9   : > { %s1071_s27 = smov (%p30_p4, %s1069_s27), 0  ;;  %256 = sbr.rel (%p253_p3) target bundleno = 61 (0x3d), region = 44 }
   0xa   : > { %p305_p6 = scmp.lt.s32.totalorder (!%p253_p3), %s664_s28, 15  ;;  %v926_v1 = vld [vmem:[%s1059_s4] ss:$0 sm:$0xff] (!%p253_p3) }
   0xb   : > { %v935_v10 = vld [vmem:[%s1058_s3] ss:$0 sm:$0xff] (!%p253_p3) }
   0xc   : > { %v952_v29 = vld [vmem:[%s1060_s5] ss:$0 sm:$0xff] (!%p253_p3) }
  0x10   : > { %s1073_s22 = smov (!%p303_p5, %s826_s22), 1  ;;  %s1075_s28 = smov (!%p305_p6, %s664_s28), 15 }
  0x11   : > { %s666_s29 = sshll.u32 %s1073_s22, 5  ;;  %s665_s30 = sshll.u32 %s1075_s28, 1 }
  0x12   : > { %s905_s7 = sadd.s32 %s666_s29, %s665_s30 }
  0x13   : > { %s667_s8 = sshll.u32 %s905_s7, 2  ;;  %s675_s28 = sshll.u32 %s905_s7, 3 }
  0x14   : > { %s911_s11 = scalar_lea.vmem %s1055_s0, %s667_s8  ;;  %s916_s14 = scalar_lea.vmem %s1056_s1, %s667_s8 }
  0x15   : > { %v683_v2 = vld [vmem:[%s911_s11] sm:$0xff]   ;;  %v746_v4 = vld [vmem:[%s911_s11 + $0x8] sm:$0xff]   ;;  %v747_v15 = vld [vmem:[%s911_s11 + $0x10] sm:$0xff]   ;;  %s969_s7 = scalar_lea.vmem %s1061_s6, %s675_s28 }
  0x16   : > { %v715_v3 = vld [vmem:[%s916_s14] sm:$0xff]   ;;  %v684_v5 = vunpack.c.l.bf16 %v683_v2  ;;  %v685_v7 = vunpack.c.h.bf16 %v683_v2  ;;  %v753_v9 = vld [vmem:[%s916_s14 + $0x8] sm:$0xff]   ;;  %v688_v11 = vunpack.c.l.bf16 %v746_v4  ;;  %v689_v13 = vunpack.c.h.bf16 %v746_v4  ;;  %v754_v16 = vld [vmem:[%s916_s14 + $0x10] sm:$0xff]  }
  0x17   : > { %v716_v6 = vunpack.c.l.bf16 %v715_v3  ;;  %v717_v8 = vunpack.c.h.bf16 %v715_v3  ;;  %v720_v12 = vunpack.c.l.bf16 %v753_v9  ;;  %v721_v14 = vunpack.c.h.bf16 %v753_v9  ;;  %v748_v34 = vld [vmem:[%s911_s11 + $0x18] sm:$0xff]   ;;  %v749_v56 = vld [vmem:[%s911_s11 + $0x20] sm:$0xff]  }
  0x18   : > { %v377_v17 = vmul.f32 %v684_v5, %v921_v0  ;;  %v378_v19 = vmul.f32 %v685_v7, %v921_v0  ;;  %v379_v21 = vmul.f32 %v688_v11, %v921_v0  ;;  %v380_v23 = vmul.f32 %v689_v13, %v921_v0  ;;  %v755_v39 = vld [vmem:[%s916_s14 + $0x18] sm:$0xff]   ;;  %v756_v57 = vld [vmem:[%s916_s14 + $0x20] sm:$0xff]  }
  0x19   : > { %v453_v18 = vmul.f32 %v716_v6, %v926_v1  ;;  %v454_v20 = vmul.f32 %v717_v8, %v926_v1  ;;  %v455_v22 = vmul.f32 %v720_v12, %v926_v1  ;;  %v456_v24 = vmul.f32 %v721_v14, %v926_v1  ;;  %v750_v8 = vld [vmem:[%s911_s11 + $0x28] sm:$0xff]  }
  0x1a   : > { %v399_v25 = vadd.f32 %v935_v10, %v377_v17  ;;  %v400_v26 = vadd.f32 %v935_v10, %v378_v19  ;;  %v692_v27 = vunpack.c.l.bf16 %v747_v15  ;;  %v724_v28 = vunpack.c.l.bf16 %v754_v16  ;;  %v757_v14 = vld [vmem:[%s916_s14 + $0x28] sm:$0xff]  }
  0x1b   : > { %v401_v30 = vadd.f32 %v935_v10, %v379_v21  ;;  %v402_v31 = vadd.f32 %v935_v10, %v380_v23  ;;  %v693_v32 = vunpack.c.h.bf16 %v747_v15  ;;  %v725_v33 = vunpack.c.h.bf16 %v754_v16 }
  0x1c   : > { %v469_v35 = vadd.f32 %v453_v18, %v399_v25  ;;  %v470_v36 = vadd.f32 %v454_v20, %v400_v26  ;;  %v381_v37 = vmul.f32 %v692_v27, %v921_v0  ;;  %v457_v38 = vmul.f32 %v724_v28, %v926_v1  ;;  %v751_v27 = vld [vmem:[%s911_s11 + $0x30] sm:$0xff]  }
  0x1d   : > { %v471_v40 = vadd.f32 %v455_v22, %v401_v30  ;;  %v472_v41 = vadd.f32 %v456_v24, %v402_v31  ;;  %v382_v42 = vmul.f32 %v693_v32, %v921_v0  ;;  %v458_v43 = vmul.f32 %v725_v33, %v926_v1  ;;  %v758_v33 = vld [vmem:[%s916_s14 + $0x30] sm:$0xff]  }
  0x1e   : > { %v491_v44 = vadd.f32 %v952_v29, %v469_v35  ;;  %v492_v45 = vadd.f32 %v952_v29, %v470_v36  ;;  %v403_v46 = vadd.f32 %v935_v10, %v381_v37  ;;  %v696_v47 = vunpack.c.l.bf16 %v748_v34 }
  0x1f   : > { %v493_v48 = vadd.f32 %v952_v29, %v471_v40  ;;  %v494_v49 = vadd.f32 %v952_v29, %v472_v41  ;;  %v404_v50 = vadd.f32 %v935_v10, %v382_v42  ;;  %v728_v51 = vunpack.c.l.bf16 %v755_v39 }
  0x20   : > { %v507_v52 = vmax.f32 %v491_v44, 0.0  ;;  %v508_v53 = vmax.f32 %v492_v45, 0.0  ;;  %v473_v54 = vadd.f32 %v457_v38, %v403_v46  ;;  %v383_v55 = vmul.f32 %v696_v47, %v921_v0 }
  0x21   : > { %v509_v58 = vmax.f32 %v493_v48, 0.0  ;;  %v510_v59 = vmax.f32 %v494_v49, 0.0  ;;  %v474_v60 = vadd.f32 %v458_v43, %v404_v50  ;;  %v459_v61 = vmul.f32 %v728_v51, %v926_v1  ;;  %v752_v50 = vld [vmem:[%s911_s11 + $0x38] sm:$0xff]  }
  0x22   : > { %523 = vst [vmem:[%s969_s7] sm:$0xff] %v507_v52  ;;  %524 = vst [vmem:[%s969_s7 + $0x8] sm:$0xff] %v508_v53  ;;  %v495_v62 = vadd.f32 %v952_v29, %v473_v54  ;;  %v405_v63 = vadd.f32 %v935_v10, %v383_v55  ;;  %v697_v2 = vunpack.c.h.bf16 %v748_v34  ;;  %v729_v3 = vunpack.c.h.bf16 %v755_v39  ;;  %v759_v51 = vld [vmem:[%s916_s14 + $0x38] sm:$0xff]  }
  0x23   : > { %525 = vst [vmem:[%s969_s7 + $0x10] sm:$0xff] %v509_v58  ;;  %526 = vst [vmem:[%s969_s7 + $0x18] sm:$0xff] %v510_v59  ;;  %v496_v4 = vadd.f32 %v952_v29, %v474_v60  ;;  %v700_v5 = vunpack.c.l.bf16 %v749_v56  ;;  %v732_v6 = vunpack.c.l.bf16 %v756_v57  ;;  %v701_v7 = vunpack.c.h.bf16 %v749_v56 }
  0x24   : > { %v511_v9 = vmax.f32 %v495_v62, 0.0  ;;  %v475_v11 = vadd.f32 %v459_v61, %v405_v63  ;;  %v384_v12 = vmul.f32 %v697_v2, %v921_v0  ;;  %v460_v13 = vmul.f32 %v729_v3, %v926_v1 }
  0x25   : > { %v512_v15 = vmax.f32 %v496_v4, 0.0  ;;  %v385_v16 = vmul.f32 %v700_v5, %v921_v0  ;;  %v461_v17 = vmul.f32 %v732_v6, %v926_v1  ;;  %v386_v18 = vmul.f32 %v701_v7, %v921_v0 }
  0x26   : > { %527 = vst [vmem:[%s969_s7 + $0x20] sm:$0xff] %v511_v9  ;;  %v497_v19 = vadd.f32 %v952_v29, %v475_v11  ;;  %v406_v20 = vadd.f32 %v935_v10, %v384_v12  ;;  %v733_v21 = vunpack.c.h.bf16 %v756_v57  ;;  %v704_v22 = vunpack.c.l.bf16 %v750_v8 }
  0x27   : > { %528 = vst [vmem:[%s969_s7 + $0x28] sm:$0xff] %v512_v15  ;;  %v407_v23 = vadd.f32 %v935_v10, %v385_v16  ;;  %v408_v24 = vadd.f32 %v935_v10, %v386_v18  ;;  %v736_v25 = vunpack.c.l.bf16 %v757_v14  ;;  %v705_v26 = vunpack.c.h.bf16 %v750_v8 }
  0x28   : > { %v513_v28 = vmax.f32 %v497_v19, 0.0  ;;  %v476_v30 = vadd.f32 %v460_v13, %v406_v20  ;;  %v462_v31 = vmul.f32 %v733_v21, %v926_v1  ;;  %v387_v32 = vmul.f32 %v704_v22, %v921_v0 }
  0x29   : > { %v477_v34 = vadd.f32 %v461_v17, %v407_v23  ;;  %v463_v35 = vmul.f32 %v736_v25, %v926_v1  ;;  %v388_v36 = vmul.f32 %v705_v26, %v921_v0  ;;  %v737_v37 = vunpack.c.h.bf16 %v757_v14 }
  0x2a   : > { %529 = vst [vmem:[%s969_s7 + $0x30] sm:$0xff] %v513_v28  ;;  %v498_v38 = vadd.f32 %v952_v29, %v476_v30  ;;  %v478_v39 = vadd.f32 %v462_v31, %v408_v24  ;;  %v409_v40 = vadd.f32 %v935_v10, %v387_v32  ;;  %v708_v41 = vunpack.c.l.bf16 %v751_v27 }
  0x2b   : > { %v499_v42 = vadd.f32 %v952_v29, %v477_v34  ;;  %v410_v43 = vadd.f32 %v935_v10, %v388_v36  ;;  %v464_v44 = vmul.f32 %v737_v37, %v926_v1  ;;  %v740_v45 = vunpack.c.l.bf16 %v758_v33 }
  0x2c   : > { %v514_v46 = vmax.f32 %v498_v38, 0.0  ;;  %v500_v47 = vadd.f32 %v952_v29, %v478_v39  ;;  %v479_v48 = vadd.f32 %v463_v35, %v409_v40  ;;  %v389_v49 = vmul.f32 %v708_v41, %v921_v0 }
  0x2d   : > { %v515_v52 = vmax.f32 %v499_v42, 0.0  ;;  %v480_v53 = vadd.f32 %v464_v44, %v410_v43  ;;  %v465_v54 = vmul.f32 %v740_v45, %v926_v1  ;;  %v709_v55 = vunpack.c.h.bf16 %v751_v27 }
  0x2e   : > { %530 = vst [vmem:[%s969_s7 + $0x38] sm:$0xff] %v514_v46  ;;  %v516_v56 = vmax.f32 %v500_v47, 0.0  ;;  %v501_v57 = vadd.f32 %v952_v29, %v479_v48  ;;  %v411_v58 = vadd.f32 %v935_v10, %v389_v49  ;;  %v741_v59 = vunpack.c.h.bf16 %v758_v33 }
  0x2f   : > { %531 = vst [vmem:[%s969_s7 + $0x40] sm:$0xff] %v515_v52  ;;  %v502_v60 = vadd.f32 %v952_v29, %v480_v53  ;;  %v390_v61 = vmul.f32 %v709_v55, %v921_v0  ;;  %v712_v62 = vunpack.c.l.bf16 %v752_v50  ;;  %v744_v63 = vunpack.c.l.bf16 %v759_v51 }
  0x30   : > { %532 = vst [vmem:[%s969_s7 + $0x48] sm:$0xff] %v516_v56  ;;  %v517_v2 = vmax.f32 %v501_v57, 0.0  ;;  %v481_v3 = vadd.f32 %v465_v54, %v411_v58  ;;  %v466_v4 = vmul.f32 %v741_v59, %v926_v1  ;;  %v713_v5 = vunpack.c.h.bf16 %v752_v50 }
  0x31   : > { %v518_v6 = vmax.f32 %v502_v60, 0.0  ;;  %v412_v7 = vadd.f32 %v935_v10, %v390_v61  ;;  %v391_v8 = vmul.f32 %v712_v62, %v921_v0  ;;  %v467_v9 = vmul.f32 %v744_v63, %v926_v1 }
  0x32   : > { %533 = vst [vmem:[%s969_s7 + $0x50] sm:$0xff] %v517_v2  ;;  %v503_v11 = vadd.f32 %v952_v29, %v481_v3  ;;  %v392_v12 = vmul.f32 %v713_v5, %v921_v0  ;;  %v745_v13 = vunpack.c.h.bf16 %v759_v51 }
  0x33   : > { %534 = vst [vmem:[%s969_s7 + $0x58] sm:$0xff] %v518_v6  ;;  %v482_v14 = vadd.f32 %v466_v4, %v412_v7  ;;  %v413_v15 = vadd.f32 %v935_v10, %v391_v8 }
  0x34   : > { %v519_v16 = vmax.f32 %v503_v11, 0.0  ;;  %v414_v17 = vadd.f32 %v935_v10, %v392_v12  ;;  %v468_v18 = vmul.f32 %v745_v13, %v926_v1 }
  0x35   : > { %v504_v19 = vadd.f32 %v952_v29, %v482_v14  ;;  %v483_v20 = vadd.f32 %v467_v9, %v413_v15 }
  0x36   : > { %535 = vst [vmem:[%s969_s7 + $0x60] sm:$0xff] %v519_v16  ;;  %v484_v21 = vadd.f32 %v468_v18, %v414_v17 }
  0x37   : > { %v520_v22 = vmax.f32 %v504_v19, 0.0  ;;  %v505_v0 = vadd.f32 %v952_v29, %v483_v20 }
  0x38   : > { %v506_v23 = vadd.f32 %v952_v29, %v484_v21 }
  0x39   : > { %536 = vst [vmem:[%s969_s7 + $0x68] sm:$0xff] %v520_v22  ;;  %v521_v24 = vmax.f32 %v505_v0, 0.0 }
  0x3a   : > { %v522_v25 = vmax.f32 %v506_v23, 0.0 }
  0x3b   : > { %537 = vst [vmem:[%s969_s7 + $0x70] sm:$0xff] %v521_v24 }
  0x3c   : > { %538 = vst [vmem:[%s969_s7 + $0x78] sm:$0xff] %v522_v25 }
  0x3d PF: > { %s16_s25 = sadd.s32 1, %s838_s25   ;;  %s1062_s21 = smov %s830_s23 }
  0x3e   : > { %p13_p7 = scmp.ge.s32.totalorder %s16_s25, 6   ;;  %s1063_s22 = smov %s834_s24 }
  0x3f   : > { %s1064_s23 = smov %s1067_s26  ;;  %s1065_s24 = smov %s1071_s27 }
  0x40   :  { %15 = sbr.rel (!%p13_p7) target bundleno = 3 (0x3), region = 77 }

// kernel: basic_block_forward.4
= control target key start
LH: loop header
LB: loop body
LE: loop exit
PB: predicated region body
PF: predicated region fallthrough
CT: control target
= control target key end

     0   :  { %s3016_s24 = smov 0   ;;  %s3018_s25 = smov 0   ;;  %s3750_s0 = inlined_call_operand.vmem [shape: bf16[2,16,16,128], index: 0, kind: input, shape index: {}, may-alias: {0,1,2}]   ;;  %s3751_s1 = inlined_call_operand.vmem [shape: bf16[2,16,16,128], index: 1, kind: input, shape index: {}, may-alias: {0,1,2}]   ;;  %s3752_s2 = inlined_call_operand.vmem [shape: bf16[2,16,16,128], index: 2, kind: input, shape index: {}, may-alias: {0,1,2}]   ;;  %s3753_s3 = inlined_call_operand.vmem [shape: f32[1,128], index: 3, kind: input, shape index: {}]   ;;  %s3754_s4 = inlined_call_operand.vmem [shape: f32[1,128], index: 4, kind: input, shape index: {}]   ;;  %s3755_s5 = inlined_call_operand.vmem [shape: bf16[1152,128], index: 5, kind: input, shape index: {}]   ;;  %s3756_s6 = inlined_call_operand.vmem [shape: bf16[2,16,16,128], index: 6, kind: output, shape index: {0}]   ;;  %s3757_s7 = inlined_call_operand.vmem [shape: f32[2,2,2,128], index: 7, kind: output, shape index: {1}]  }
   0x1   :  { %s3020_s26 = smov 0   ;;  %s3022_s27 = smov 0  }
   0x2   :  { %s3024_s28 = smov 0  }
   0x3 LB: > { %s27_s29 = sadd.s32 1, %s2965_s26  ;;  %s30_s30 = sadd.s32 1, %s2969_s27  ;;  %s2973_s28 = sphi %s3024_s28, %s18_s28   ;;  %s2969_s27 = sphi %s3022_s27, %s3766_s27   ;;  %s2965_s26 = sphi %s3020_s26, %s3765_s26   ;;  %s2961_s25 = sphi %s3018_s25, %s3764_s25   ;;  %s2957_s24 = sphi %s3016_s24, %s3763_s24  }
   0x4   : > { %p28_p0 = scmp.ge.s32.totalorder %s27_s29, 2  ;;  %p2254_p1 = scmp.ge.s32.totalorder %s2973_s28, 1 }
   0x5   : > { %p328_p2 = scmp.lt.s32.totalorder %s2973_s28, 5 }
   0x6   : > { %s3768_s29 = smov (%p28_p0, %s27_s29), 0  ;;  %s3770_s30 = smov (!%p28_p0, %s30_s30), %s2969_s27 }
   0x7   : > { %p329_p3 = pnand %p2254_p1, %p328_p2  ;;  %p32_p4 = scmp.ge.s32.totalorder %s3770_s30, 2 }
   0x8   : > { %v2853_v0 = vld [vmem:[%s3755_s5 + $0x40] sm:$0xff] (!%p329_p3)   ;;  %v2857_v4 = vld [vmem:[%s3755_s5 + $0x48] sm:$0xff] (!%p329_p3)   ;;  %s3066_s18 = sshll.u32 (!%p329_p3), %s2957_s24, 3  ;;  %v2861_v8 = vld [vmem:[%s3755_s5 + $0x50] sm:$0xff] (!%p329_p3)   ;;  %p405_p6 = scmp.lt.s32.totalorder (!%p329_p3), %s2961_s25, 1  ;;  %v2975_v16 = vmov (!%p329_p3), 0.0  }
   0x9   : > { %s3772_s30 = smov (%p32_p4, %s3770_s30), 0  ;;  %332 = sbr.rel (%p329_p3) target bundleno = 437 (0x1b5), region = 44 }
   0xa   : > { %v2854_v1 = vld [vmem:[%s3755_s5 + $0xc0] sm:$0xff] (!%p329_p3)   ;;  %2492 = vmatprep.subr.bf16.mxu0 (!%p329_p3), %v2853_v0  ;;  %v2858_v5 = vld [vmem:[%s3755_s5 + $0xc8] sm:$0xff] (!%p329_p3)   ;;  %s3078_s9 = sadd.s32 (!%p329_p3), 4294967295, %s3066_s18  ;;  %v2862_v9 = vld [vmem:[%s3755_s5 + $0xd0] sm:$0xff] (!%p329_p3)   ;;  %p407_p8 = scmp.lt.s32.totalorder (!%p329_p3), %s3066_s18, 15  ;;  %vm1973_vm6 = vcmask (!%p329_p3), 1040384  }
   0xb   : > { %v2855_v2 = vld [vmem:[%s3755_s5] sm:$0xff] (!%p329_p3)   ;;  %2556 = vmatprep.subr.bf16.mxu1 (!%p329_p3), %v2854_v1  ;;  %v2859_v6 = vld [vmem:[%s3755_s5 + $0x8] sm:$0xff] (!%p329_p3)   ;;  %p417_p5 = scmp.gt.s32.totalorder (!%p329_p3), %s3078_s9, 0  ;;  %v2863_v10 = vld [vmem:[%s3755_s5 + $0x10] sm:$0xff] (!%p329_p3)   ;;  %p2261_p7 = scmp.lt.s32.totalorder (!%p329_p3), %s3078_s9, 15 }
   0xc   : > { %v2856_v3 = vld [vmem:[%s3755_s5 + $0x80] sm:$0xff] (!%p329_p3)   ;;  %2493 = vmatpush3.bf16.msra.mxu0 (!%p329_p3), %v2855_v2  ;;  %v2860_v7 = vld [vmem:[%s3755_s5 + $0x88] sm:$0xff] (!%p329_p3)   ;;  %v2864_v11 = vld [vmem:[%s3755_s5 + $0x90] sm:$0xff] (!%p329_p3)   ;;  %472 = vst [vmem:[#allocation2 + $0x18] sm:$0x1] (!%p329_p3), %v2975_v16  ;;  %p620_p9 = scmp.eq.s32.totalorder (!%p329_p3), %s2957_s24, 0 }
   0xd   : > { %2557 = vmatpush3.bf16.msra.mxu1 (!%p329_p3), %v2856_v3  ;;  %2494 = vmatprep.subr.bf16.mxu0 (!%p329_p3), %v2857_v4  ;;  %v2865_v12 = vld [vmem:[%s3755_s5 + $0x58] sm:$0xff] (!%p329_p3)   ;;  %471 = vst [vmem:[#allocation2] sm:$0x1] (!%p329_p3), %v2975_v16  ;;  %473 = vst [vmem:[#allocation2 + $0x30] sm:$0x1] (!%p329_p3), %v2975_v16  ;;  %v2869_v17 = vld [vmem:[%s3755_s5 + $0x60] sm:$0xff] (!%p329_p3)  }
   0xe   : > { %2558 = vmatprep.subr.bf16.mxu1 (!%p329_p3), %v2858_v5  ;;  %v2866_v13 = vld [vmem:[%s3755_s5 + $0xd8] sm:$0xff] (!%p329_p3)   ;;  %474 = vst [vmem:[#allocation2 + $0x48] sm:$0x1] (!%p329_p3), %v2975_v16  ;;  %475 = vst [vmem:[#allocation2 + $0x60] sm:$0x1] (!%p329_p3), %v2975_v16  ;;  %v2870_v18 = vld [vmem:[%s3755_s5 + $0xe0] sm:$0xff] (!%p329_p3)  }
   0xf   : > { %v2867_v14 = vld [vmem:[%s3755_s5 + $0x18] sm:$0xff] (!%p329_p3)   ;;  %476 = vst [vmem:[#allocation2 + $0x78] sm:$0x1] (!%p329_p3), %v2975_v16  ;;  %477 = vst [vmem:[#allocation2 + $0x90] sm:$0x1] (!%p329_p3), %v2975_v16  ;;  %v2871_v19 = vld [vmem:[%s3755_s5 + $0x20] sm:$0xff] (!%p329_p3)  }
  0x10   : > { %2495 = vmatpush3.bf16.msra.mxu0 %v2859_v6  ;;  %s3099_s21 = scalar_select %p417_p5, %s3078_s9, 0  ;;  %v2868_v15 = vld [vmem:[%s3755_s5 + $0x98] sm:$0xff]   ;;  %478 = vst [vmem:[#allocation2 + $0xa8] sm:$0x1] %v2975_v16  ;;  %479 = vst [vmem:[#allocation2 + $0xc0] sm:$0x1] %v2975_v16 }
  0x11   : > { %2559 = vmatpush3.bf16.msra.mxu1 %v2860_v7  ;;  %2496 = vmatprep.subr.bf16.mxu0 %v2861_v8  ;;  %s3774_s25 = smov (!%p405_p6, %s2961_s25), 1  ;;  %480 = vst [vmem:[#allocation2 + $0xd8] sm:$0x1] %v2975_v16  ;;  %481 = vst [vmem:[#allocation2 + $0x11] sm:$0x1] %v2975_v16  ;;  %v2872_v20 = vld [vmem:[%s3755_s5 + $0xa0] sm:$0xff]  }
  0x12   : > { %2560 = vmatprep.subr.bf16.mxu1 %v2862_v9  ;;  %482 = vst [vmem:[#allocation2 + $0x29] sm:$0x1] %v2975_v16  ;;  %483 = vst [vmem:[#allocation2 + $0x41] sm:$0x1] %v2975_v16  ;;  %s3776_s21 = smov (!%p2261_p7, %s3099_s21), 15  ;;  %s3135_s8 = sshll.u32 %s3774_s25, 5 }
  0x13   : > { %484 = vst [vmem:[#allocation2 + $0x59] sm:$0x1] %v2975_v16  ;;  %485 = vst [vmem:[#allocation2 + $0x71] sm:$0x1] %v2975_v16  ;;  %s408_s17 = scalar_select %p407_p8, %s3066_s18, 15  ;;  %v2873_v21 = vld [vmem:[%s3755_s5 + $0x68] sm:$0xff]  }
  0x14   : > { %2497 = vmatpush3.bf16.msra.mxu0 %v2863_v10  ;;  %486 = vst [vmem:[#allocation2 + $0x89] sm:$0x1] %v2975_v16  ;;  %487 = vst [vmem:[#allocation2 + $0xa1] sm:$0x1] %v2975_v16  ;;  %s2266_s11 = sshll.u32 %s3776_s21, 1  ;;  %v2874_v22 = vld [vmem:[%s3755_s5 + $0xe8] sm:$0xff]  }
  0x15   : > { %2561 = vmatpush3.bf16.msra.mxu1 %v2864_v11  ;;  %2498 = vmatprep.subr.bf16.mxu0 %v2865_v12  ;;  %488 = vst [vmem:[#allocation2 + $0xb9] sm:$0x1] %v2975_v16  ;;  %489 = vst [vmem:[#allocation2 + $0xd1] sm:$0x1] %v2975_v16  ;;  %s2256_s14 = sshll.u32 %s408_s17, 1  ;;  %v2875_v23 = vld [vmem:[%s3755_s5 + $0x28] sm:$0xff]   ;;  %s425_s22 = sadd.s32 %s2266_s11, %s3135_s8 }
  0x16   : > { %2562 = vmatprep.subr.bf16.mxu1 %v2866_v13  ;;  %490 = vst [vmem:[#allocation2 + $0xe9] sm:$0x1] %v2975_v16  ;;  %v2876_v24 = vld [vmem:[%s3755_s5 + $0xa8] sm:$0xff]   ;;  %v2877_v25 = vld [vmem:[%s3755_s5 + $0x70] sm:$0xff]   ;;  %s3154_s9 = sadd.s32 %s3135_s8, %s2256_s14  ;;  %s2268_s11 = sshll.u32 %s425_s22, 2  ;;  %v2881_v29 = vld [vmem:[%s3755_s5 + $0x78] sm:$0xff]  }
  0x17   : > { %v2878_v26 = vld [vmem:[%s3755_s5 + $0xf0] sm:$0xff]   ;;  %s2258_s14 = sshll.u32 %s3154_s9, 2  ;;  %v2882_v30 = vld [vmem:[%s3755_s5 + $0xf8] sm:$0xff]   ;;  %s427_s22 = scalar_lea.vmem %s3751_s1, %s2268_s11  ;;  %v3192_v33 = vld [vmem:[%s3753_s3] ss:$0 sm:$0xff] }
  0x18   : > { %2499 = vmatpush3.bf16.msra.mxu0 %v2867_v14  ;;  %v2879_v27 = vld [vmem:[%s3755_s5 + $0x30] sm:$0xff]   ;;  %v2883_v31 = vld [vmem:[%s3755_s5 + $0x38] sm:$0xff]   ;;  %s3184_s19 = scalar_lea.vmem %s3750_s0, %s2258_s14  ;;  %v3197_v34 = vld [vmem:[%s3754_s4] ss:$0 sm:$0xff]  ;;  %s2381_s11 = sadd.s32 8, %s3066_s18 }
  0x19   : > { %2563 = vmatpush3.bf16.msra.mxu1 %v2868_v15  ;;  %2500 = vmatprep.subr.bf16.mxu0 %v2869_v17  ;;  %v2880_v28 = vld [vmem:[%s3755_s5 + $0xb0] sm:$0xff]   ;;  %v2884_v32 = vld [vmem:[%s3755_s5 + $0xb8] sm:$0xff]   ;;  %v2431_v35 = vld [vmem:[%s427_s22] sm:$0xff]   ;;  %s621_s12 = scalar_select %p620_p9, 1, 0 }
  0x1a   : > { %2564 = vmatprep.subr.bf16.mxu1 %v2870_v18  ;;  %v2432_v36 = vunpack.c.l.bf16 %v2431_v35  ;;  %v2433_v37 = vunpack.c.h.bf16 %v2431_v35  ;;  %v2399_v38 = vld [vmem:[%s3184_s19] sm:$0xff]   ;;  %v2478_v45 = vld [vmem:[%s3184_s19 + $0x8] sm:$0xff]   ;;  %v2479_v53 = vld [vmem:[%s3184_s19 + $0x10] sm:$0xff]   ;;  %p3363_p10 = scmp.lt.s32.totalorder %s2381_s11, 15  ;;  %p628_p11 = scmp.eq.s32.totalorder %s2957_s24, 1 }
  0x1b   : > { %v2885_v39 = vld [vmem:[%s3755_s5 + $0x140] sm:$0xff]   ;;  %v2400_v40 = vunpack.c.l.bf16 %v2399_v38  ;;  %v2401_v41 = vunpack.c.h.bf16 %v2399_v38  ;;  %v622_v44 = vstv %s621_s12  ;;  %v2404_v48 = vunpack.c.l.bf16 %v2478_v45  ;;  %v2480_v9 = vld [vmem:[%s3184_s19 + $0x18] sm:$0xff]   ;;  %p462_p12 = scmp.lt.s32.totalorder %s2957_s24, 1  ;;  %s2280_s9 = sshll.u32 %s3774_s25, 1 }
  0x1c   : > { %2501 = vmatpush3.bf16.msra.mxu0 %v2871_v19  ;;  %v604_v42 = vmul.f32 %v2432_v36, %v3192_v33  ;;  %v605_v43 = vmul.f32 %v2433_v37, %v3192_v33  ;;  %vm3210_vm0 = vcmp.eq.s32.totalorder %v622_v44, 1  ;;  %v2405_v52 = vunpack.c.h.bf16 %v2478_v45  ;;  %v2890_v2 = vld [vmem:[%s3755_s5 + $0x1c0] sm:$0xff]   ;;  %v2888_v44 = vld [vmem:[%s3755_s5 + $0x108] sm:$0xff]   ;;  %s3778_s11 = smov (!%p3363_p10, %s2381_s11), 15 }
  0x1d   : > { %2565 = vmatpush3.bf16.msra.mxu1 %v2872_v20  ;;  %2502 = vmatprep.subr.bf16.mxu0 %v2873_v21  ;;  %v529_v46 = vmul.f32 %v2400_v40, %v3192_v33  ;;  %v530_v47 = vmul.f32 %v2401_v41, %v3192_v33  ;;  %v531_v56 = vmul.f32 %v2404_v48, %v3192_v33  ;;  %v2408_v57 = vunpack.c.l.bf16 %v2479_v53  ;;  %vm2925_vm1 = vmneg %vm3210_vm0  ;;  %v2481_v21 = vld [vmem:[%s3184_s19 + $0x20] sm:$0xff]   ;;  %s3780_s11 = smov (!%p3363_p10, %s3778_s11), 15  ;;  %s3782_s24 = smov (!%p462_p12, %s2957_s24), 1 }
  0x1e   : > { %2566 = vmatprep.subr.bf16.mxu1 %v2874_v22  ;;  %v606_v49 = vadd.f32 %v3197_v34, %v604_v42  ;;  %v607_v50 = vadd.f32 %v3197_v34, %v605_v43  ;;  %v532_v60 = vmul.f32 %v2405_v52, %v3192_v33  ;;  %v2409_v61 = vunpack.c.h.bf16 %v2479_v53  ;;  %vm2927_vm2 = vmpackc.low %vm2925_vm1, %vm2925_vm1  ;;  %v2886_v22 = vld [vmem:[%s3755_s5 + $0x100] sm:$0xff]   ;;  %v2887_v42 = vld [vmem:[%s3755_s5 + $0x148] sm:$0xff]   ;;  %s2273_s17 = sshll.u32 %s3780_s11, 1  ;;  %s3700_s11 = scalar_lea.vmem %s3756_s6, %s2258_s14 }
  0x1f   : > { %v551_v54 = vadd.f32 %v3197_v34, %v529_v46  ;;  %v552_v55 = vadd.f32 %v3197_v34, %v530_v47  ;;  %v3220_v0 = vadd.f32 %v3197_v34, %v531_v56  ;;  %v533_v1 = vmul.f32 %v2408_v57, %v3192_v33  ;;  %v2892_v45 = vld [vmem:[%s3755_s5 + $0x180] sm:$0xff]   ;;  %v2896_v57 = vld [vmem:[%s3755_s5 + $0x188] sm:$0xff]   ;;  %s442_s22 = sadd.s32 %s2273_s17, %s3135_s8  ;;  %s465_s14 = sadd.s32 %s2280_s9, %s3782_s24 }
  0x20   : > { %2503 = vmatpush3.bf16.msra.mxu0 %v2875_v23  ;;  %v608_v58 = vmax.f32 %v606_v49, 0.0  ;;  %v609_v59 = vmax.f32 %v607_v50, 0.0  ;;  %v3231_v5 = vadd.f32 %v3197_v34, %v532_v60  ;;  %v534_v6 = vmul.f32 %v2409_v61, %v3192_v33  ;;  %v2889_v49 = vld [vmem:[%s3755_s5 + $0x150] sm:$0xff]   ;;  %v2894_v50 = vld [vmem:[%s3755_s5 + $0x1c8] sm:$0xff]   ;;  %s2275_s16 = sshll.u32 %s442_s22, 2  ;;  %s2281_s10 = sshll.u32 %s465_s14, 1 }
  0x21   : > { %2567 = vmatpush3.bf16.msra.mxu1 %v2876_v24  ;;  %2504 = vmatprep.subr.bf16.mxu0 %v2877_v25  ;;  %v567_v62 = vmax.f32 %v551_v54, 0.0  ;;  %v568_v63 = vmax.f32 %v552_v55, 0.0  ;;  %v569_v7 = vmax.f32 %v3220_v0, 0.0  ;;  %v3236_v8 = vadd.f32 %v3197_v34, %v533_v1  ;;  %v2891_v1 = vld [vmem:[%s3755_s5 + $0x110] sm:$0xff]   ;;  %s444_s23 = scalar_lea.vmem %s3752_s2, %s2275_s16  ;;  %s467_s22 = scalar_lea.vmem %s3757_s7, %s2281_s10 }
  0x22   : > { %2568 = vmatprep.subr.bf16.mxu1 %v2878_v26  ;;  %v624_v3 = vsel %vm3210_vm0, 0.0, %v608_v58  ;;  %v625_v4 = vsel %vm3210_vm0, 0.0, %v609_v59  ;;  %v570_v10 = vmax.f32 %v3231_v5, 0.0  ;;  %v3241_v11 = vadd.f32 %v3197_v34, %v534_v6  ;;  %v2898_v0 = vld [vmem:[%s3755_s5 + $0x1d0] sm:$0xff]   ;;  %s629_s18 = scalar_select %p628_p11, 1, 0 }
  0x23   : > { %626 = vst [vmem:[#allocation2 + $0x1] sm:$0xff] %v624_v3  ;;  %627 = vst [vmem:[#allocation2 + $0x9] sm:$0xff] %v625_v4  ;;  %v2412_v12 = vunpack.c.l.bf16 %v2480_v9  ;;  %v2413_v13 = vunpack.c.h.bf16 %v2480_v9  ;;  %v2928_v14 = vpack.c.bf16 %v609_v59, %v608_v58  ;;  %v571_v15 = vmax.f32 %v3236_v8, 0.0  ;;  %v2482_v58 = vld [vmem:[%s3184_s19 + $0x28] sm:$0xff]   ;;  %v2900_v6 = vld [vmem:[%s3755_s5 + $0x190] sm:$0xff]  }
  0x24   : > { %2505 = vmatpush3.bf16.msra.mxu0 %v2879_v27  ;;  %584 = vst [vmem:[#allocation2 + $0x19] sm:$0xff] %v567_v62  ;;  %585 = vst [vmem:[#allocation2 + $0x21] sm:$0xff] %v568_v63  ;;  %v572_v16 = vmax.f32 %v3241_v11, 0.0  ;;  %v2416_v23 = vunpack.c.l.bf16 %v2481_v21  ;;  %v2417_v24 = vunpack.c.h.bf16 %v2481_v21  ;;  %v3269_v36 = vpack.c.bf16 %v568_v63, %v567_v62  ;;  %v2908_v11 = vld [vmem:[%s3755_s5 + $0x1a0] sm:$0xff]  }
  0x25   : > { %2569 = vmatpush3.bf16.msra.mxu1 %v2880_v28  ;;  %2506 = vmatprep.subr.bf16.mxu0 %v2881_v29  ;;  %586 = vst [vmem:[#allocation2 + $0x31] sm:$0xff] %v569_v7  ;;  %587 = vst [vmem:[#allocation2 + $0x39] sm:$0xff] %v570_v10  ;;  %v535_v17 = vmul.f32 %v2412_v12, %v3192_v33  ;;  %v536_v18 = vmul.f32 %v2413_v13, %v3192_v33  ;;  %v2420_v60 = vunpack.c.l.bf16 %v2482_v58  ;;  %v2483_v13 = vld [vmem:[%s3184_s19 + $0x30] sm:$0xff]  }
  0x26   : > { %2570 = vmatprep.subr.bf16.mxu1 %v2882_v30  ;;  %2929 = vmatprep.mubr.msk.bf16.mxu0 %vm2927_vm2, %v2928_v14  ;;  %588 = vst [vmem:[#allocation2 + $0x49] sm:$0xff] %v571_v15  ;;  %589 = vst [vmem:[#allocation2 + $0x51] sm:$0xff] %v572_v16  ;;  %v537_v37 = vmul.f32 %v2416_v23, %v3192_v33  ;;  %v538_v38 = vmul.f32 %v2417_v24, %v3192_v33  ;;  %v2421_v61 = vunpack.c.h.bf16 %v2482_v58  ;;  %v2907_v58 = vld [vmem:[%s3755_s5 + $0x130] sm:$0xff]  }
  0x27   : > { %v3258_v19 = vadd.f32 %v3197_v34, %v535_v17  ;;  %v3261_v20 = vadd.f32 %v3197_v34, %v536_v18  ;;  %v3318_v62 = vpack.c.bf16 %v570_v10, %v569_v7  ;;  %v539_v3 = vmul.f32 %v2420_v60, %v3192_v33  ;;  %v2902_v10 = vld [vmem:[%s3755_s5 + $0x1d8] sm:$0xff]  }
  0x28   : > { %2507 = vmatpush3.bf16.msra.mxu0 %v2883_v31  ;;  %v3287_v46 = vadd.f32 %v3197_v34, %v537_v37  ;;  %v3290_v47 = vadd.f32 %v3197_v34, %v538_v38  ;;  %v540_v4 = vmul.f32 %v2421_v61, %v3192_v33  ;;  %v2895_v18 = vld [vmem:[%s3755_s5 + $0x118] sm:$0xff]   ;;  %v2424_v23 = vunpack.c.l.bf16 %v2483_v13  ;;  %v2901_v38 = vld [vmem:[%s3755_s5 + $0x168] sm:$0xff]  }
  0x29   : > { %2571 = vmatpush3.bf16.msra.mxu1 %v2884_v32  ;;  %2620 = vmatprep.subr.bf16.mxu0 %v2885_v39  ;;  %v573_v28 = vmax.f32 %v3258_v19, 0.0  ;;  %v574_v29 = vmax.f32 %v3261_v20, 0.0  ;;  %v3338_v7 = vadd.f32 %v3197_v34, %v539_v3  ;;  %v2425_v24 = vunpack.c.h.bf16 %v2483_v13  ;;  %v2912_v3 = vld [vmem:[%s3755_s5 + $0x1f0] sm:$0xff]  }
  0x2a   : > { %2684 = vmatprep.subr.bf16.mxu1 %v2890_v2  ;;  %v637_v27 = vld [vmem:[#allocation2] sm:$0xff]  ;;  %v638_v31 = vld [vmem:[#allocation2 + $0x8] sm:$0xff]  ;;  %v575_v54 = vmax.f32 %v3287_v46, 0.0  ;;  %v576_v55 = vmax.f32 %v3290_v47, 0.0  ;;  %v2893_v2 = vld [vmem:[%s3755_s5 + $0x158] sm:$0xff]   ;;  %v3341_v9 = vadd.f32 %v3197_v34, %v540_v4 }
  0x2b   : > { %v709_v25 = vld [vmem:[#allocation2 + $0x18] sm:$0xff]  ;;  %v710_v26 = vld [vmem:[#allocation2 + $0x20] sm:$0xff]  ;;  %v686_v35 = vld [vmem:[#allocation2 + $0xa] sm:$0xff]  ;;  %v653_v39 = vpack.c.bf16 %v638_v31, %v637_v27  ;;  %590 = vst [vmem:[#allocation2 + $0x61] sm:$0xff] %v573_v28  ;;  %v577_v21 = vmax.f32 %v3338_v7, 0.0  ;;  %v541_v31 = vmul.f32 %v2424_v23, %v3192_v33 }
  0x2c   : > { %v725_v30 = vpack.c.bf16 %v710_v26, %v709_v25  ;;  %v685_v32 = vld [vmem:[#allocation2 + $0x2] sm:$0xff]  ;;  %v711_v41 = vld [vmem:[#allocation2 + $0x30] sm:$0xff]  ;;  %591 = vst [vmem:[#allocation2 + $0x69] sm:$0xff] %v574_v29  ;;  %v712_v43 = vld [vmem:[#allocation2 + $0x38] sm:$0xff] }
  0x2d   : > { %v701_v40 = vpack.c.bf16 %v686_v35, %v685_v32  ;;  %1463 = vmatmul.mubr.bf16.vlgmr.msra.gmra.mrb[0].mxu0 %v653_v39  ;;  %v3292_v48 = vpack.c.bf16 %v712_v43, %v711_v41  ;;  %v687_v51 = vld [vmem:[#allocation2 + $0x1a] sm:$0xff]  ;;  %v688_v52 = vld [vmem:[#allocation2 + $0x22] sm:$0xff]  ;;  %v714_v56 = vld [vmem:[#allocation2 + $0x50] sm:$0xff]  ;;  %592 = vst [vmem:[#allocation2 + $0x79] sm:$0xff] %v575_v54  ;;  %v542_v32 = vmul.f32 %v2425_v24, %v3192_v33 }
  0x2e   : > { %1559 = vmatprep.mubr.bf16.mxu1 %v725_v30  ;;  %2621 = vmatpush3.bf16.msra.mxu0 %v2886_v22  ;;  %v713_v53 = vld [vmem:[#allocation2 + $0x48] sm:$0xff]  ;;  %593 = vst [vmem:[#allocation2 + $0x81] sm:$0xff] %v576_v55  ;;  %v3312_v59 = vpack.c.bf16 %v688_v52, %v687_v51  ;;  %v689_v5 = vld [vmem:[#allocation2 + $0x32] sm:$0xff]  ;;  %v690_v12 = vld [vmem:[#allocation2 + $0x3a] sm:$0xff]  ;;  %v578_v22 = vmax.f32 %v3341_v9, 0.0  ;;  %v3382_v35 = vpack.c.bf16 %v572_v16, %v571_v15 }
  0x2f   : > { %1560 = vmatmul.mubr.bf16.vlgmr.msra.gmra.mrb[0].mxu1 %v701_v40  ;;  %1470 = vmatprep.mubr.bf16.mxu0 %v3269_v36  ;;  %v3320_v63 = vpack.c.bf16 %v714_v56, %v713_v53  ;;  %v2897_v25 = vld [vmem:[%s3755_s5 + $0x160] sm:$0xff]   ;;  %v2904_v26 = vld [vmem:[%s3755_s5 + $0x198] sm:$0xff]   ;;  %v3367_v27 = vpack.c.bf16 %v690_v12, %v689_v5  ;;  %594 = vst [vmem:[#allocation2 + $0x91] sm:$0xff] %v577_v21  ;;  %v691_v15 = vld [vmem:[#allocation2 + $0x4a] sm:$0xff] }
  0x30   : > { %1567 = vmatprep.mubr.bf16.mxu1 %v3292_v48  ;;  %2622 = vmatprep.subr.bf16.mxu0 %v2887_v42  ;;  %595 = vst [vmem:[#allocation2 + $0x99] sm:$0xff] %v578_v22  ;;  %v2906_v39 = vld [vmem:[%s3755_s5 + $0x1e0] sm:$0xff]   ;;  %v3393_v40 = vadd.f32 %v3197_v34, %v541_v31  ;;  %v3396_v8 = vadd.f32 %v3197_v34, %v542_v32  ;;  %v692_v16 = vld [vmem:[#allocation2 + $0x52] sm:$0xff]  ;;  %v2909_v41 = vld [vmem:[%s3755_s5 + $0x1e8] sm:$0xff]  }
  0x31   : > { %2685 = vmatpush3.bf16.msra.mxu1 %v2892_v45  ;;  %v2903_v42 = vld [vmem:[%s3755_s5 + $0x128] sm:$0xff]   ;;  %v2905_v53 = vld [vmem:[%s3755_s5 + $0x170] sm:$0xff]   ;;  %v3478_v23 = vld [vmem:[%s3755_s5 + $0x200] sm:$0xff]  }
  0x32   : > { %2686 = vmatprep.subr.bf16.mxu1 %v2894_v50  ;;  %2623 = vmatpush3.bf16.msra.mxu0 %v2888_v44  ;;  %v715_v14 = vld [vmem:[#allocation2 + $0x60] sm:$0xff]  ;;  %v579_v43 = vmax.f32 %v3393_v40, 0.0  ;;  %v580_v44 = vmax.f32 %v3396_v8, 0.0  ;;  %v2910_v56 = vld [vmem:[%s3755_s5 + $0x1a8] sm:$0xff]   ;;  %v2914_v19 = vld [vmem:[%s3755_s5 + $0x1b0] sm:$0xff]  }
  0x33   : > { %2624 = vmatprep.subr.bf16.mxu0 %v2889_v49  ;;  %v716_v17 = vld [vmem:[#allocation2 + $0x68] sm:$0xff]  ;;  %v2484_v49 = vld [vmem:[%s3184_s19 + $0x38] sm:$0xff]  }
  0x34   : > { %v3384_v37 = vpack.c.bf16 %v716_v17, %v715_v14  ;;  %v717_v45 = vld [vmem:[#allocation2 + $0x78] sm:$0xff]  ;;  %596 = vst [vmem:[#allocation2 + $0xa9] sm:$0xff] %v579_v43  ;;  %597 = vst [vmem:[#allocation2 + $0xb1] sm:$0xff] %v580_v44  ;;  %v2428_v51 = vunpack.c.l.bf16 %v2484_v49  ;;  %v2429_v52 = vunpack.c.h.bf16 %v2484_v49  ;;  %v693_v20 = vld [vmem:[#allocation2 + $0x62] sm:$0xff] }
  0x35   : > { %2687 = vmatpush3.bf16.msra.mxu1 %v2896_v57  ;;  %1471 = vmatmul.mubr.bf16.gmra.mrb[4].mxu0 %v725_v30  ;;  %v2899_v30 = vld [vmem:[%s3755_s5 + $0x120] sm:$0xff]   ;;  %v3433_v57 = vpack.c.bf16 %v692_v16, %v691_v15  ;;  %v2913_v14 = vld [vmem:[%s3755_s5 + $0x138] sm:$0xff]   ;;  %v2918_v40 = vld [vmem:[%s3755_s5 + $0x208] sm:$0xff]  }
  0x36   : > { %1478 = vmatprep.mubr.bf16.mxu0 %v3318_v62  ;;  %2625 = vmatpush3.bf16.msra.mxu0 %v2891_v1  ;;  %v718_v50 = vld [vmem:[#allocation2 + $0x80] sm:$0xff]  ;;  %v543_v60 = vmul.f32 %v2428_v51, %v3192_v33  ;;  %v544_v61 = vmul.f32 %v2429_v52, %v3192_v33  ;;  %v3444_v1 = vpack.c.bf16 %v574_v29, %v573_v28  ;;  %v2915_v28 = vld [vmem:[%s3755_s5 + $0x1f8] sm:$0xff]   ;;  %v719_v12 = vld [vmem:[#allocation2 + $0x90] sm:$0xff] }
  0x37   : > { %1568 = vmatmul.mubr.bf16.gmra.mrb[4].mxu1 %v3312_v59  ;;  %2688 = vmatprep.subr.bf16.mxu1 %v2898_v0  ;;  %v2911_v0 = vld [vmem:[%s3755_s5 + $0x178] sm:$0xff]   ;;  %v696_v47 = vld [vmem:[#allocation2 + $0x82] sm:$0xff] }
  0x38   : > { %1575 = vmatprep.mubr.bf16.mxu1 %v3320_v63  ;;  %2626 = vmatprep.subr.bf16.mxu0 %v2893_v2  ;;  %v3446_v2 = vpack.c.bf16 %v718_v50, %v717_v45  ;;  %v565_v4 = vadd.f32 %v3197_v34, %v543_v60  ;;  %v566_v5 = vadd.f32 %v3197_v34, %v544_v61  ;;  %v720_v13 = vld [vmem:[#allocation2 + $0x98] sm:$0xff] }
  0x39   : > { %2689 = vmatpush3.bf16.msra.mxu1 %v2900_v6  ;;  %v2916_v17 = vld [vmem:[%s3755_s5 + $0x1b8] sm:$0xff]  }
  0x3a   : > { %2690 = vmatprep.subr.bf16.mxu1 %v2902_v10  ;;  %2627 = vmatpush3.bf16.msra.mxu0 %v2895_v18  ;;  %v581_v29 = vmax.f32 %v565_v4, 0.0  ;;  %v582_v6 = vmax.f32 %v566_v5, 0.0  ;;  %v694_v10 = vld [vmem:[#allocation2 + $0x6a] sm:$0xff]  ;;  %v695_v46 = vld [vmem:[#allocation2 + $0x7a] sm:$0xff]  ;;  %v697_v9 = vld [vmem:[#allocation2 + $0x92] sm:$0xff] }
  0x3b   : > { %2628 = vmatprep.subr.bf16.mxu0 %v2897_v25  ;;  %v3480_v24 = vpack.c.bf16 %v694_v10, %v693_v20  ;;  %v3486_v25 = vpack.c.bf16 %v576_v55, %v575_v54  ;;  %v721_v54 = vld [vmem:[#allocation2 + $0xa8] sm:$0xff]  ;;  %v722_v55 = vld [vmem:[#allocation2 + $0xb0] sm:$0xff]  ;;  %v3500_v31 = vpack.c.bf16 %v696_v47, %v695_v46 }
  0x3c   : > { %598 = vst [vmem:[#allocation2 + $0xc1] sm:$0xff] %v581_v29  ;;  %599 = vst [vmem:[#allocation2 + $0xc9] sm:$0xff] %v582_v6  ;;  %v3472_v18 = vpack.c.bf16 %v582_v6, %v581_v29  ;;  %v700_v60 = vld [vmem:[#allocation2 + $0xb2] sm:$0xff] }
  0x3d   : > { %2691 = vmatpush3.bf16.msra.mxu1 %v2904_v26  ;;  %1479 = vmatmul.mubr.bf16.gmra.mrb[8].mxu0 %v3292_v48  ;;  %v3488_v26 = vpack.c.bf16 %v720_v13, %v719_v12 }
  0x3e   : > { %1486 = vmatprep.mubr.bf16.mxu0 %v3382_v35  ;;  %2629 = vmatpush3.bf16.msra.mxu0 %v2899_v30  ;;  %v2435_v30 = vld [vmem:[%s444_s23] sm:$0xff]  }
  0x3f   : > { %1576 = vmatmul.mubr.bf16.gmra.mrb[8].mxu1 %v3367_v27  ;;  %2692 = vmatprep.subr.bf16.mxu1 %v2906_v39  ;;  %v2436_v32 = vunpack.c.l.bf16 %v2435_v30  ;;  %v3506_v39 = vpack.c.bf16 %v578_v22, %v577_v21  ;;  %v698_v21 = vld [vmem:[#allocation2 + $0x9a] sm:$0xff] }
  0x40   : > { %1583 = vmatprep.mubr.bf16.mxu1 %v3384_v37  ;;  %2630 = vmatprep.subr.bf16.mxu0 %v2901_v38  ;;  %v2437_v38 = vunpack.c.h.bf16 %v2435_v30  ;;  %v3528_v51 = vpack.c.bf16 %v698_v21, %v697_v9 }
  0x41   : > { %2693 = vmatpush3.bf16.msra.mxu1 %v2908_v11  ;;  %v3508_v11 = vpack.c.bf16 %v722_v55, %v721_v54  ;;  %v614_v15 = vmul.f32 %v2436_v32, %v3192_v33 }
  0x42   : > { %2694 = vmatprep.subr.bf16.mxu1 %v2909_v41  ;;  %2631 = vmatpush3.bf16.msra.mxu0 %v2903_v42  ;;  %v615_v16 = vmul.f32 %v2437_v38, %v3192_v33  ;;  %v630_v41 = vstv %s629_s18 }
  0x43   : > { %2632 = vmatprep.subr.bf16.mxu0 %v2905_v53  ;;  %v3515_v42 = vadd.f32 %v3197_v34, %v614_v15  ;;  %vm3522_vm3 = vcmp.eq.s32.totalorder %v630_v41, 1  ;;  %v723_v33 = vld [vmem:[#allocation2 + $0xc0] sm:$0xff]  ;;  %v724_v45 = vld [vmem:[#allocation2 + $0xc8] sm:$0xff]  ;;  %v3542_v53 = vpack.c.bf16 %v580_v44, %v579_v43 }
  0x44   : > { %v3518_v7 = vadd.f32 %v3197_v34, %v615_v16  ;;  %v772_v8 = vld [vmem:[#allocation2 + $0xca] sm:$0xff]  ;;  %vm2930_vm4 = vmneg %vm3522_vm3 }
  0x45   : > { %2695 = vmatpush3.bf16.msra.mxu1 %v2910_v56  ;;  %1487 = vmatmul.mubr.bf16.gmra.mrb[12].mxu0 %v3320_v63  ;;  %v618_v49 = vmax.f32 %v3515_v42, 0.0  ;;  %v3544_v56 = vpack.c.bf16 %v724_v45, %v723_v33  ;;  %vm2932_vm5 = vmpackc.low %vm2930_vm4, %vm2930_vm4 }
  0x46   : > { %1494 = vmatprep.mubr.bf16.mxu0 %v3444_v1  ;;  %2633 = vmatpush3.bf16.msra.mxu0 %v2907_v58  ;;  %v619_v50 = vmax.f32 %v3518_v7, 0.0  ;;  %v699_v58 = vld [vmem:[#allocation2 + $0xaa] sm:$0xff] }
  0x47   : > { %1584 = vmatmul.mubr.bf16.gmra.mrb[12].mxu1 %v3433_v57  ;;  %2696 = vmatprep.subr.bf16.mxu1 %v2912_v3  ;;  %v632_v34 = vsel %vm3522_vm3, 0.0, %v618_v49  ;;  %v3550_v61 = vpack.c.bf16 %v700_v60, %v699_v58 }
  0x48   : > { %1591 = vmatprep.mubr.bf16.mxu1 %v3446_v2  ;;  %2634 = vmatprep.subr.bf16.mxu0 %v2911_v0  ;;  %v633_v52 = vsel %vm3522_vm3, 0.0, %v619_v50  ;;  %635 = vst [vmem:[#allocation2 + $0xd9] sm:$0xff] %v632_v34  ;;  %v2933_v44 = vpack.c.bf16 %v619_v50, %v618_v49 }
  0x49   : > { %2697 = vmatpush3.bf16.msra.mxu1 %v2914_v19  ;;  %636 = vst [vmem:[#allocation2 + $0xe1] sm:$0xff] %v633_v52 }
  0x4a   : > { %2698 = vmatprep.subr.bf16.mxu1 %v2915_v28  ;;  %2635 = vmatpush3.bf16.msra.mxu0 %v2913_v14 }
  0x4b   : > { %2764 = vmatprep.subr.bf16.mxu0 %v3478_v23 }
  0x4d   : > { %2699 = vmatpush3.bf16.msra.mxu1 %v2916_v17  ;;  %1495 = vmatmul.mubr.bf16.gmra.mrb[16].mxu0 %v3384_v37 }
  0x4e   : > { %1502 = vmatprep.mubr.bf16.mxu0 %v3486_v25  ;;  %2796 = vmatprep.subr.bf16.mxu1 %v3478_v23 }
  0x4f   : > { %1592 = vmatmul.mubr.bf16.gmra.mrb[16].mxu1 %v3480_v24 }
  0x50   : > { %1599 = vmatprep.mubr.bf16.mxu1 %v3488_v26  ;;  %v844_v3 = vld [vmem:[#allocation2 + $0xda] sm:$0xff]  ;;  %v845_v4 = vld [vmem:[#allocation2 + $0xe2] sm:$0xff] }
  0x51   : > { %v853_v5 = vpack.c.bf16 %v845_v4, %v844_v3 }
  0x55   : > { %1503 = vmatmul.mubr.bf16.gmra.mrb[20].mxu0 %v3446_v2 }
  0x56   : > { %1510 = vmatprep.mubr.bf16.mxu0 %v3506_v39 }
  0x57   : > { %1600 = vmatmul.mubr.bf16.gmra.mrb[20].mxu1 %v3500_v31 }
  0x58   : > { %1607 = vmatprep.mubr.bf16.mxu1 %v3508_v11 }
  0x5d   : > { %1511 = vmatmul.mubr.bf16.gmra.mrb[24].mxu0 %v3488_v26 }
  0x5e   : > { %1518 = vmatprep.mubr.bf16.mxu0 %v3542_v53 }
  0x5f   : > { %1608 = vmatmul.mubr.bf16.gmra.mrb[24].mxu1 %v3528_v51 }
  0x60   : > { %1615 = vmatprep.mubr.bf16.mxu1 %v3544_v56 }
  0x65   : > { %1519 = vmatmul.mubr.bf16.gmra.mrb[28].mxu0 %v3508_v11 }
  0x66   : > { %1656 = vmatprep.mubr.bf16.mxu0 %v3312_v59  ;;  %v2919_v59 = vld [vmem:[%s3755_s5 + $0x210] sm:$0xff]  }
  0x67   : > { %1616 = vmatmul.mubr.bf16.gmra.mrb[28].mxu1 %v3550_v61 }
  0x68   : > { %1753 = vmatprep.mubr.bf16.mxu1 %v3318_v62 }
  0x6d   : > { %1657 = vmatmul.mubr.bf16.vlgmr.msra.gmra.mrb[32].mxu0 %v3269_v36  ;;  %v2920_v36 = vld [vmem:[%s3755_s5 + $0x218] sm:$0xff]  }
  0x6e   : > { %2765 = vmatpush3.bf16.msra.mxu0 %v3478_v23  ;;  %1664 = vmatprep.mubr.bf16.mxu0 %v3367_v27 }
  0x6f   : > { %1754 = vmatmul.mubr.bf16.vlgmr.msra.gmra.mrb[32].mxu1 %v3292_v48  ;;  %2766 = vmatprep.subr.bf16.mxu0 %v2918_v40  ;;  %v2921_v48 = vld [vmem:[%s3755_s5 + $0x220] sm:$0xff]  }
  0x70   : > { %1761 = vmatprep.mubr.bf16.mxu1 %v3382_v35  ;;  %2804 = vmatpush3.bf16.msra.mxu1 %v3478_v23 }
  0x71   : > { %2797 = vmatprep.subr.bf16.mxu1 %v2918_v40 }
  0x72   : > { %2767 = vmatpush3.bf16.msra.mxu0 %v2918_v40 }
  0x73   : > { %2768 = vmatprep.subr.bf16.mxu0 %v2919_v59 }
  0x74   : > { %2805 = vmatpush3.bf16.msra.mxu1 %v2918_v40 }
  0x75   : > { %1665 = vmatmul.mubr.bf16.gmra.mrb[36].mxu0 %v3318_v62  ;;  %2798 = vmatprep.subr.bf16.mxu1 %v2919_v59  ;;  %v2922_v62 = vld [vmem:[%s3755_s5 + $0x228] sm:$0xff]  }
  0x76   : > { %1672 = vmatprep.mubr.bf16.mxu0 %v3433_v57  ;;  %2769 = vmatpush3.bf16.msra.mxu0 %v2919_v59 }
  0x77   : > { %1762 = vmatmul.mubr.bf16.gmra.mrb[36].mxu1 %v3320_v63  ;;  %2770 = vmatprep.subr.bf16.mxu0 %v2920_v36  ;;  %v2923_v63 = vld [vmem:[%s3755_s5 + $0x230] sm:$0xff]  }
  0x78   : > { %1769 = vmatprep.mubr.bf16.mxu1 %v3444_v1  ;;  %2806 = vmatpush3.bf16.msra.mxu1 %v2919_v59 }
  0x79   : > { %2799 = vmatprep.subr.bf16.mxu1 %v2920_v36 }
  0x7a   : > { %2771 = vmatpush3.bf16.msra.mxu0 %v2920_v36 }
  0x7b   : > { %2772 = vmatprep.subr.bf16.mxu0 %v2921_v48 }
  0x7c   : > { %2807 = vmatpush3.bf16.msra.mxu1 %v2920_v36 }
  0x7d   : > { %1673 = vmatmul.mubr.bf16.gmra.mrb[40].mxu0 %v3382_v35  ;;  %2800 = vmatprep.subr.bf16.mxu1 %v2921_v48  ;;  %v2924_v35 = vld [vmem:[%s3755_s5 + $0x238] sm:$0xff]  }
  0x7e   : > { %1680 = vmatprep.mubr.bf16.mxu0 %v3480_v24  ;;  %2773 = vmatpush3.bf16.msra.mxu0 %v2921_v48 }
  0x7f   : > { %1770 = vmatmul.mubr.bf16.gmra.mrb[40].mxu1 %v3384_v37  ;;  %2774 = vmatprep.subr.bf16.mxu0 %v2922_v62  ;;  %v771_v37 = vld [vmem:[#allocation2 + $0xc2] sm:$0xff] }
  0x80   : > { %1777 = vmatprep.mubr.bf16.mxu1 %v3486_v25  ;;  %2808 = vmatpush3.bf16.msra.mxu1 %v2921_v48  ;;  %v780_v43 = vpack.c.bf16 %v772_v8, %v771_v37 }
  0x81   : > { %2801 = vmatprep.subr.bf16.mxu1 %v2922_v62 }
  0x82   : > { %2775 = vmatpush3.bf16.msra.mxu0 %v2922_v62 }
  0x83   : > { %2776 = vmatprep.subr.bf16.mxu0 %v2923_v63 }
  0x84   : > { %2809 = vmatpush3.bf16.msra.mxu1 %v2922_v62 }
  0x85   : > { %1681 = vmatmul.mubr.bf16.gmra.mrb[44].mxu0 %v3444_v1  ;;  %2802 = vmatprep.subr.bf16.mxu1 %v2923_v63  ;;  %v796_v1 = vld [vmem:[#allocation2 + $0xd8] sm:$0xff] }
  0x86   : > { %1688 = vmatprep.mubr.bf16.mxu0 %v3500_v31  ;;  %2777 = vmatpush3.bf16.msra.mxu0 %v2923_v63 }
  0x87   : > { %1778 = vmatmul.mubr.bf16.gmra.mrb[44].mxu1 %v3446_v2  ;;  %2778 = vmatprep.subr.bf16.mxu0 %v2924_v35  ;;  %v797_v2 = vld [vmem:[#allocation2 + $0xe0] sm:$0xff] }
  0x88   : > { %1785 = vmatprep.mubr.bf16.mxu1 %v3506_v39  ;;  %2810 = vmatpush3.bf16.msra.mxu1 %v2923_v63  ;;  %v805_v0 = vpack.c.bf16 %v797_v2, %v796_v1 }
  0x89   : > { %2803 = vmatprep.subr.bf16.mxu1 %v2924_v35 }
  0x8a   : > { %2779 = vmatpush3.bf16.msra.mxu0 %v2924_v35 }
  0x8c   : > { %2811 = vmatpush3.bf16.msra.mxu1 %v2924_v35 }
  0x8d   : > { %1689 = vmatmul.mubr.bf16.gmra.mrb[48].mxu0 %v3486_v25 }
  0x8e   : > { %1696 = vmatprep.mubr.bf16.mxu0 %v3528_v51 }
  0x8f   : > { %1786 = vmatmul.mubr.bf16.gmra.mrb[48].mxu1 %v3488_v26 }
  0x90   : > { %1793 = vmatprep.mubr.bf16.mxu1 %v3542_v53 }
  0x95   : > { %1697 = vmatmul.mubr.bf16.gmra.mrb[52].mxu0 %v3506_v39 }
  0x96   : > { %1704 = vmatprep.mubr.bf16.mxu0 %v3550_v61 }
  0x97   : > { %1794 = vmatmul.mubr.bf16.gmra.mrb[52].mxu1 %v3508_v11 }
  0x98   : > { %1801 = vmatprep.mubr.bf16.mxu1 %v3472_v18 }
  0x9d   : > { %1705 = vmatmul.mubr.bf16.gmra.mrb[56].mxu0 %v3542_v53 }
  0x9e   : > { %1712 = vmatprep.mubr.bf16.mxu0 %v780_v43 }
  0x9f   : > { %1802 = vmatmul.mubr.bf16.gmra.mrb[56].mxu1 %v3544_v56 }
  0xa0   : > { %2934 = vmatprep.mubr.msk.bf16.mxu1 %vm2932_vm5, %v2933_v44 }
  0xa5   : > { %1713 = vmatmul.mubr.bf16.gmra.mrb[60].mxu0 %v3472_v18 }
  0xa6   : > { %2780 = vmatprep.mubr.bf16.mxu0 %v3367_v27 }
  0xa7   : > { %1810 = vmatmul.mubr.bf16.gmra.mrb[60].mxu1 %v805_v0 }
  0xa8   : > { %2788 = vmatprep.mubr.bf16.mxu1 %v3528_v51 }
  0xad   : > { %2781 = vmatmul.mubr.bf16.vlgmr.msra.gmra.mrb[64].mxu0 %v3433_v57 }
  0xae   : > { %2784 = vmatprep.mubr.bf16.mxu0 %v3480_v24 }
  0xaf   : > { %2789 = vmatmul.mubr.bf16.vlgmr.msra.gmra.mrb[64].mxu1 %v3550_v61 }
  0xb0   : > { %2792 = vmatprep.mubr.bf16.mxu1 %v780_v43 }
  0xb5   : > { %2785 = vmatmul.mubr.bf16.gmra.mrb[68].mxu0 %v3500_v31 }
  0xb7   : > { %2793 = vmatmul.mubr.bf16.gmra.mrb[68].mxu1 %v853_v5 }
 0x100   : > { %v2508_v19 = vpop.f32.mrb[0].mxu0 }
 0x101   : > { %v2509_v28 = vpop.f32.mrb[1].mxu0 }
 0x102   : > { %v2572_v20 = vpop.f32.mrb[0].mxu1  ;;  %v2510_v27 = vadd.f32 %v2509_v28, %v2508_v19  ;;  %v2511_v10 = vpop.f32.mrb[2].mxu0 }
 0x103   : > { %v2573_v29 = vpop.f32.mrb[1].mxu1  ;;  %v2512_v57 = vpop.f32.mrb[3].mxu0 }
 0x104   : > { %v2574_v6 = vadd.f32 %v2573_v29, %v2572_v20  ;;  %v2575_v12 = vpop.f32.mrb[2].mxu1  ;;  %v2513_v17 = vadd.f32 %v2512_v57, %v2511_v10 }
 0x105   : > { %v2576_v13 = vpop.f32.mrb[3].mxu1 }
 0x106   : > { %v3618_v14 = vadd.f32 %v2574_v6, %v2510_v27  ;;  %v2577_v18 = vadd.f32 %v2576_v13, %v2575_v12 }
 0x108   : > { %v3620_v23 = vadd.f32 %v2577_v18, %v2513_v17  ;;  %v2514_v24 = vpop.f32.mrb[4].mxu0 }
 0x109   : > { %v2515_v26 = vpop.f32.mrb[5].mxu0 }
 0x10a   : > { %v2578_v25 = vpop.f32.mrb[4].mxu1  ;;  %v2516_v47 = vadd.f32 %v2515_v26, %v2514_v24  ;;  %v2517_v55 = vpop.f32.mrb[6].mxu0 }
 0x10b   : > { %v2579_v46 = vpop.f32.mrb[5].mxu1  ;;  %v2518_v31 = vpop.f32.mrb[7].mxu0 }
 0x10c   : > { %v2580_v54 = vadd.f32 %v2579_v46, %v2578_v25  ;;  %v2581_v30 = vpop.f32.mrb[6].mxu1  ;;  %v2519_v39 = vadd.f32 %v2518_v31, %v2517_v55 }
 0x10d   : > { %v2582_v32 = vpop.f32.mrb[7].mxu1 }
 0x10e   : > { %v3622_v38 = vadd.f32 %v2580_v54, %v2516_v47  ;;  %v2583_v11 = vadd.f32 %v2582_v32, %v2581_v30 }
 0x110   : > { %v3624_v15 = vadd.f32 %v2583_v11, %v2519_v39  ;;  %v2520_v16 = vpop.f32.mrb[8].mxu0 }
 0x111   : > { %v2521_v42 = vpop.f32.mrb[9].mxu0 }
 0x112   : > { %v2584_v41 = vpop.f32.mrb[8].mxu1  ;;  %v2522_v9 = vadd.f32 %v2521_v42, %v2520_v16  ;;  %v2523_v22 = vpop.f32.mrb[10].mxu0 }
 0x113   : > { %v2585_v7 = vpop.f32.mrb[9].mxu1  ;;  %v2524_v45 = vpop.f32.mrb[11].mxu0 }
 0x114   : > { %v2586_v21 = vadd.f32 %v2585_v7, %v2584_v41  ;;  %v2587_v33 = vpop.f32.mrb[10].mxu1  ;;  %v2525_v51 = vadd.f32 %v2524_v45, %v2523_v22 }
 0x115   : > { %v2588_v49 = vpop.f32.mrb[11].mxu1 }
 0x116   : > { %v3626_v50 = vadd.f32 %v2586_v21, %v2522_v9  ;;  %v2589_v34 = vadd.f32 %v2588_v49, %v2587_v33 }
 0x118   : > { %v3628_v52 = vadd.f32 %v2589_v34, %v2525_v51  ;;  %v2526_v53 = vpop.f32.mrb[12].mxu0 }
 0x119   : > { %v2527_v58 = vpop.f32.mrb[13].mxu0 }
 0x11a   : > { %v2590_v56 = vpop.f32.mrb[12].mxu1  ;;  %v2528_v61 = vadd.f32 %v2527_v58, %v2526_v53  ;;  %v2529_v59 = vpop.f32.mrb[14].mxu0 }
 0x11b   : > { %v2591_v60 = vpop.f32.mrb[13].mxu1  ;;  %v2530_v48 = vpop.f32.mrb[15].mxu0 }
 0x11c   : > { %v2592_v40 = vadd.f32 %v2591_v60, %v2590_v56  ;;  %v2593_v36 = vpop.f32.mrb[14].mxu1  ;;  %v2531_v35 = vadd.f32 %v2530_v48, %v2529_v59 }
 0x11d   : > { %v2594_v62 = vpop.f32.mrb[15].mxu1 }
 0x11e   : > { %v3630_v63 = vadd.f32 %v2592_v40, %v2528_v61  ;;  %v2595_v37 = vadd.f32 %v2594_v62, %v2593_v36 }
 0x120   : > { %v3632_v8 = vadd.f32 %v2595_v37, %v2531_v35  ;;  %v2532_v43 = vpop.f32.mrb[16].mxu0 }
 0x121   : > { %v2533_v1 = vpop.f32.mrb[17].mxu0 }
 0x122   : > { %v2596_v44 = vpop.f32.mrb[16].mxu1  ;;  %v2534_v0 = vadd.f32 %v2533_v1, %v2532_v43  ;;  %v2535_v4 = vpop.f32.mrb[18].mxu0 }
 0x123   : > { %v2597_v2 = vpop.f32.mrb[17].mxu1  ;;  %v2536_v19 = vpop.f32.mrb[19].mxu0 }
 0x124   : > { %v2598_v3 = vadd.f32 %v2597_v2, %v2596_v44  ;;  %v2599_v5 = vpop.f32.mrb[18].mxu1  ;;  %v2537_v29 = vadd.f32 %v2536_v19, %v2535_v4 }
 0x125   : > { %v2600_v20 = vpop.f32.mrb[19].mxu1 }
 0x126   : > { %v3634_v28 = vadd.f32 %v2598_v3, %v2534_v0  ;;  %v2601_v27 = vadd.f32 %v2600_v20, %v2599_v5 }
 0x128   : > { %v3636_v6 = vadd.f32 %v2601_v27, %v2537_v29  ;;  %v2538_v10 = vpop.f32.mrb[20].mxu0 }
 0x129   : > { %v2539_v57 = vpop.f32.mrb[21].mxu0 }
 0x12a   : > { %v2602_v12 = vpop.f32.mrb[20].mxu1  ;;  %v2540_v17 = vadd.f32 %v2539_v57, %v2538_v10  ;;  %v2541_v24 = vpop.f32.mrb[22].mxu0 }
 0x12b   : > { %v2603_v13 = vpop.f32.mrb[21].mxu1  ;;  %v2542_v26 = vpop.f32.mrb[23].mxu0 }
 0x12c   : > { %v2604_v18 = vadd.f32 %v2603_v13, %v2602_v12  ;;  %v2605_v25 = vpop.f32.mrb[22].mxu1  ;;  %v2543_v54 = vadd.f32 %v2542_v26, %v2541_v24 }
 0x12d   : > { %v2606_v46 = vpop.f32.mrb[23].mxu1 }
 0x12e   : > { %v3638_v47 = vadd.f32 %v2604_v18, %v2540_v17  ;;  %v2607_v55 = vadd.f32 %v2606_v46, %v2605_v25 }
 0x130   : > { %v3640_v30 = vadd.f32 %v2607_v55, %v2543_v54  ;;  %v2544_v31 = vpop.f32.mrb[24].mxu0 }
 0x131   : > { %v2545_v39 = vpop.f32.mrb[25].mxu0 }
 0x132   : > { %v2608_v32 = vpop.f32.mrb[24].mxu1  ;;  %v2546_v16 = vadd.f32 %v2545_v39, %v2544_v31  ;;  %v2547_v42 = vpop.f32.mrb[26].mxu0 }
 0x133   : > { %v2609_v11 = vpop.f32.mrb[25].mxu1  ;;  %v2548_v9 = vpop.f32.mrb[27].mxu0 }
 0x134   : > { %v2610_v41 = vadd.f32 %v2609_v11, %v2608_v32  ;;  %v2611_v7 = vpop.f32.mrb[26].mxu1  ;;  %v2549_v33 = vadd.f32 %v2548_v9, %v2547_v42 }
 0x135   : > { %v2612_v21 = vpop.f32.mrb[27].mxu1 }
 0x136   : > { %v3642_v22 = vadd.f32 %v2610_v41, %v2546_v16  ;;  %v2613_v45 = vadd.f32 %v2612_v21, %v2611_v7 }
 0x138   : > { %v3644_v49 = vadd.f32 %v2613_v45, %v2549_v33  ;;  %v2550_v51 = vpop.f32.mrb[28].mxu0 }
 0x139   : > { %v2551_v53 = vpop.f32.mrb[29].mxu0 }
 0x13a   : > { %v2614_v34 = vpop.f32.mrb[28].mxu1  ;;  %v2552_v58 = vadd.f32 %v2551_v53, %v2550_v51  ;;  %v2553_v61 = vpop.f32.mrb[30].mxu0 }
 0x13b   : > { %v2615_v56 = vpop.f32.mrb[29].mxu1  ;;  %v2554_v59 = vpop.f32.mrb[31].mxu0 }
 0x13c   : > { %v2616_v60 = vadd.f32 %v2615_v56, %v2614_v34  ;;  %v2617_v40 = vpop.f32.mrb[30].mxu1  ;;  %v2555_v62 = vadd.f32 %v2554_v59, %v2553_v61 }
 0x13d   : > { %v2618_v36 = vpop.f32.mrb[31].mxu1 }
 0x13e   : > { %v3646_v48 = vadd.f32 %v2616_v60, %v2552_v58  ;;  %v2619_v35 = vadd.f32 %v2618_v36, %v2617_v40 }
 0x140   : > { %v3648_v37 = vadd.f32 %v2619_v35, %v2555_v62  ;;  %v2636_v43 = vpop.f32.mrb[32].mxu0 }
 0x141   : > { %v2637_v1 = vpop.f32.mrb[33].mxu0 }
 0x142   : > { %v2700_v44 = vpop.f32.mrb[32].mxu1  ;;  %v2638_v0 = vadd.f32 %v2637_v1, %v2636_v43  ;;  %v2639_v3 = vpop.f32.mrb[34].mxu0 }
 0x143   : > { %v2701_v2 = vpop.f32.mrb[33].mxu1  ;;  %v2640_v19 = vpop.f32.mrb[35].mxu0 }
 0x144   : > { %v2702_v4 = vadd.f32 %v2701_v2, %v2700_v44  ;;  %v2703_v5 = vpop.f32.mrb[34].mxu1  ;;  %v1659_v29 = vadd.f32 %v2638_v0, %v3618_v14  ;;  %v2641_v27 = vadd.f32 %v2640_v19, %v2639_v3 }
 0x145   : > { %v2704_v20 = vpop.f32.mrb[35].mxu1 }
 0x146   : > { %v2705_v10 = vadd.f32 %v2704_v20, %v2703_v5  ;;  %v1662_v12 = vadd.f32 %v2641_v27, %v3620_v23  ;;  %v3652_v57 = vadd.f32 %v2702_v4, %v1659_v29 }
 0x148   : > { %v2642_v13 = vpop.f32.mrb[36].mxu0  ;;  %v3654_v18 = vadd.f32 %v2705_v10, %v1662_v12 }
 0x149   : > { %v2643_v24 = vpop.f32.mrb[37].mxu0 }
 0x14a   : > { %v2706_v17 = vpop.f32.mrb[36].mxu1  ;;  %v2644_v26 = vadd.f32 %v2643_v24, %v2642_v13  ;;  %v2645_v46 = vpop.f32.mrb[38].mxu0 }
 0x14b   : > { %v2707_v25 = vpop.f32.mrb[37].mxu1  ;;  %v2646_v31 = vpop.f32.mrb[39].mxu0 }
 0x14c   : > { %v2708_v54 = vadd.f32 %v2707_v25, %v2706_v17  ;;  %v2709_v55 = vpop.f32.mrb[38].mxu1  ;;  %v1667_v14 = vadd.f32 %v2644_v26, %v3622_v38  ;;  %v2647_v39 = vadd.f32 %v2646_v31, %v2645_v46 }
 0x14d   : > { %v2710_v32 = vpop.f32.mrb[39].mxu1 }
 0x14e   : > { %v2711_v11 = vadd.f32 %v2710_v32, %v2709_v55  ;;  %v1670_v23 = vadd.f32 %v2647_v39, %v3624_v15  ;;  %v3658_v16 = vadd.f32 %v2708_v54, %v1667_v14 }
 0x150   : > { %v2648_v41 = vpop.f32.mrb[40].mxu0  ;;  %v3660_v7 = vadd.f32 %v2711_v11, %v1670_v23 }
 0x151   : > { %v2649_v9 = vpop.f32.mrb[41].mxu0 }
 0x152   : > { %v2712_v42 = vpop.f32.mrb[40].mxu1  ;;  %v2650_v33 = vadd.f32 %v2649_v9, %v2648_v41  ;;  %v2651_v45 = vpop.f32.mrb[42].mxu0 }
 0x153   : > { %v2713_v21 = vpop.f32.mrb[41].mxu1  ;;  %v2652_v53 = vpop.f32.mrb[43].mxu0 }
 0x154   : > { %v2714_v51 = vadd.f32 %v2713_v21, %v2712_v42  ;;  %v2715_v34 = vpop.f32.mrb[42].mxu1  ;;  %v1675_v38 = vadd.f32 %v2650_v33, %v3626_v50  ;;  %v2653_v58 = vadd.f32 %v2652_v53, %v2651_v45 }
 0x155   : > { %v2716_v56 = vpop.f32.mrb[43].mxu1 }
 0x156   : > { %v2717_v60 = vadd.f32 %v2716_v56, %v2715_v34  ;;  %v1678_v15 = vadd.f32 %v2653_v58, %v3628_v52  ;;  %v3664_v61 = vadd.f32 %v2714_v51, %v1675_v38 }
 0x158   : > { %v2654_v40 = vpop.f32.mrb[44].mxu0  ;;  %v3666_v36 = vadd.f32 %v2717_v60, %v1678_v15 }
 0x159   : > { %v2655_v62 = vpop.f32.mrb[45].mxu0 }
 0x15a   : > { %v2718_v59 = vpop.f32.mrb[44].mxu1  ;;  %v2656_v43 = vadd.f32 %v2655_v62, %v2654_v40  ;;  %v2657_v44 = vpop.f32.mrb[46].mxu0 }
 0x15b   : > { %v2719_v35 = vpop.f32.mrb[45].mxu1  ;;  %v2658_v0 = vpop.f32.mrb[47].mxu0 }
 0x15c   : > { %v2720_v1 = vadd.f32 %v2719_v35, %v2718_v59  ;;  %v2721_v2 = vpop.f32.mrb[46].mxu1  ;;  %v1683_v50 = vadd.f32 %v2656_v43, %v3630_v63  ;;  %v2659_v4 = vadd.f32 %v2658_v0, %v2657_v44 }
 0x15d   : > { %v2722_v3 = vpop.f32.mrb[47].mxu1 }
 0x15e   : > { %v2723_v5 = vadd.f32 %v2722_v3, %v2721_v2  ;;  %v1686_v52 = vadd.f32 %v2659_v4, %v3632_v8  ;;  %v3670_v19 = vadd.f32 %v2720_v1, %v1683_v50 }
 0x160   : > { %v2660_v20 = vpop.f32.mrb[48].mxu0  ;;  %v3672_v27 = vadd.f32 %v2723_v5, %v1686_v52 }
 0x161   : > { %v2661_v10 = vpop.f32.mrb[49].mxu0 }
 0x162   : > { %v2724_v29 = vpop.f32.mrb[48].mxu1  ;;  %v2662_v13 = vadd.f32 %v2661_v10, %v2660_v20  ;;  %v2663_v17 = vpop.f32.mrb[50].mxu0 }
 0x163   : > { %v2725_v12 = vpop.f32.mrb[49].mxu1  ;;  %v2664_v26 = vpop.f32.mrb[51].mxu0 }
 0x164   : > { %v2726_v24 = vadd.f32 %v2725_v12, %v2724_v29  ;;  %v2727_v25 = vpop.f32.mrb[50].mxu1  ;;  %v1691_v63 = vadd.f32 %v2662_v13, %v3634_v28  ;;  %v2665_v54 = vadd.f32 %v2664_v26, %v2663_v17 }
 0x165   : > { %v2728_v46 = vpop.f32.mrb[51].mxu1 }
 0x166   : > { %v2729_v55 = vadd.f32 %v2728_v46, %v2727_v25  ;;  %v1694_v8 = vadd.f32 %v2665_v54, %v3636_v6  ;;  %v1788_v31 = vadd.f32 %v2726_v24, %v1691_v63 }
 0x168   : > { %v2666_v32 = vpop.f32.mrb[52].mxu0  ;;  %v3676_v39 = vadd.f32 %v2729_v55, %v1694_v8 }
 0x169   : > { %v2667_v11 = vpop.f32.mrb[53].mxu0 }
 0x16a   : > { %v2730_v14 = vpop.f32.mrb[52].mxu1  ;;  %v2668_v41 = vadd.f32 %v2667_v11, %v2666_v32  ;;  %v2669_v42 = vpop.f32.mrb[54].mxu0 }
 0x16b   : > { %v2731_v23 = vpop.f32.mrb[53].mxu1  ;;  %v2670_v33 = vpop.f32.mrb[55].mxu0 }
 0x16c   : > { %v2732_v9 = vadd.f32 %v2731_v23, %v2730_v14  ;;  %v2733_v21 = vpop.f32.mrb[54].mxu1  ;;  %v1699_v51 = vadd.f32 %v2668_v41, %v3638_v47  ;;  %v2671_v28 = vadd.f32 %v2670_v33, %v2669_v42 }
 0x16d   : > { %v2734_v45 = vpop.f32.mrb[55].mxu1 }
 0x16e   : > { %v2735_v34 = vadd.f32 %v2734_v45, %v2733_v21  ;;  %v1702_v53 = vadd.f32 %v2671_v28, %v3640_v30  ;;  %v1796_v6 = vadd.f32 %v2732_v9, %v1699_v51 }
 0x170   : > { %v2672_v56 = vpop.f32.mrb[56].mxu0  ;;  %v1799_v58 = vadd.f32 %v2735_v34, %v1702_v53 }
 0x171   : > { %v2673_v60 = vpop.f32.mrb[57].mxu0 }
 0x172   : > { %v2736_v38 = vpop.f32.mrb[56].mxu1  ;;  %v2674_v40 = vadd.f32 %v2673_v60, %v2672_v56  ;;  %v2675_v59 = vpop.f32.mrb[58].mxu0 }
 0x173   : > { %v2737_v15 = vpop.f32.mrb[57].mxu1  ;;  %v2676_v43 = vpop.f32.mrb[59].mxu0 }
 0x174   : > { %v2738_v62 = vadd.f32 %v2737_v15, %v2736_v38  ;;  %v2739_v35 = vpop.f32.mrb[58].mxu1  ;;  %v1707_v1 = vadd.f32 %v2674_v40, %v3642_v22  ;;  %v2677_v2 = vadd.f32 %v2676_v43, %v2675_v59 }
 0x175   : > { %v2740_v44 = vpop.f32.mrb[59].mxu1 }
 0x176   : > { %v2741_v47 = vadd.f32 %v2740_v44, %v2739_v35  ;;  %v1710_v0 = vadd.f32 %v2677_v2, %v3644_v49  ;;  %v1804_v3 = vadd.f32 %v2738_v62, %v1707_v1 }
 0x178   : > { %v2678_v30 = vpop.f32.mrb[60].mxu0  ;;  %v3682_v4 = vadd.f32 %v2741_v47, %v1710_v0 }
 0x179   : > { %v2679_v5 = vpop.f32.mrb[61].mxu0 }
 0x17a   : > { %v2742_v50 = vpop.f32.mrb[60].mxu1  ;;  %v2680_v20 = vadd.f32 %v2679_v5, %v2678_v30  ;;  %v2681_v29 = vpop.f32.mrb[62].mxu0 }
 0x17b   : > { %v2743_v52 = vpop.f32.mrb[61].mxu1  ;;  %v2682_v13 = vpop.f32.mrb[63].mxu0 }
 0x17c   : > { %v2744_v10 = vadd.f32 %v2743_v52, %v2742_v50  ;;  %v2745_v12 = vpop.f32.mrb[62].mxu1  ;;  %v1715_v24 = vadd.f32 %v2680_v20, %v3646_v48  ;;  %v2683_v22 = vadd.f32 %v2682_v13, %v2681_v29 }
 0x17d   : > { %v2746_v17 = vpop.f32.mrb[63].mxu1 }
 0x17e   : > { %v2747_v25 = vadd.f32 %v2746_v17, %v2745_v12  ;;  %v1718_v26 = vadd.f32 %v2683_v22, %v3648_v37  ;;  %v1812_v49 = vadd.f32 %v2744_v10, %v1715_v24 }
 0x180   : > { %v2782_v46 = vpop.f32.mrb[64].mxu0  ;;  %v1815_v54 = vadd.f32 %v2747_v25, %v1718_v26 }
 0x181   : > { %v1861_v55 = vadd.f32 %v2782_v46, %v3658_v16  ;;  %v1852_v32 = vpop.f32.mrb[65].mxu0 }
 0x182   : > { %v2790_v63 = vpop.f32.mrb[64].mxu1  ;;  %v1853_v11 = vadd.f32 %v1852_v32, %v3652_v57  ;;  %v2783_v48 = vpop.f32.mrb[66].mxu0 }
 0x183   : > { %v3687_v8 = vadd.f32 %v2790_v63, %v1796_v6  ;;  %v1884_v14 = vpop.f32.mrb[65].mxu1  ;;  %v1864_v42 = vadd.f32 %v2783_v48, %v3660_v7  ;;  %v1855_v9 = vpop.f32.mrb[67].mxu0  ;;  %v1938_v53 = vmul.f32 %v1861_v55, %v1861_v55 }
 0x184   : > { %v3690_v23 = vadd.f32 %v1884_v14, %v1788_v31  ;;  %v2791_v41 = vpop.f32.mrb[66].mxu1  ;;  %v1856_v57 = vadd.f32 %v1855_v9, %v3654_v18  ;;  %v1936_v33 = vmul.f32 %v1853_v11, %v1853_v11 }
 0x185   : > { %v3693_v37 = vadd.f32 %v2791_v41, %v1799_v58  ;;  %v1887_v21 = vpop.f32.mrb[67].mxu1  ;;  %v2446_v31 = vpack.c.bf16 %v1864_v42, %v1861_v55  ;;  %v1946_v32 = vmul.f32 %v3687_v8, %v3687_v8 }
 0x186   : > { %v1888_v16 = vadd.f32 %v1887_v21, %v3676_v39  ;;  %v1915_v45 = vadd.f32 %v1856_v57, %v1853_v11  ;;  %v1937_v51 = vmul.f32 %v1856_v57, %v1856_v57  ;;  %v2441_v28 = vpack.c.bf16 %v1856_v57, %v1853_v11 }
 0x187   : > { %v2466_v7 = vpack.c.bf16 %v3693_v37, %v3687_v8  ;;  %2485 = vst [vmem:[%s3700_s11 + $0x8] sm:$0xff] %v2446_v31   ;;  %v1939_v39 = vmul.f32 %v1864_v42, %v1864_v42  ;;  %v1944_v46 = vmul.f32 %v3690_v23, %v3690_v23  ;;  %v1947_v48 = vmul.f32 %v3693_v37, %v3693_v37 }
 0x188   : > { %v2461_v34 = vpack.c.bf16 %v1888_v16, %v3690_v23  ;;  %v1916_v6 = vadd.f32 %v1915_v45, %v1861_v55  ;;  %v1952_v56 = vadd.f32 %v1937_v51, %v1936_v33  ;;  %2442 = vst [vmem:[%s3700_s11] sm:$0xff] %v2441_v28   ;;  %v2786_v18 = vpop.f32.mrb[68].mxu0  ;;  %v1945_v63 = vmul.f32 %v1888_v16, %v1888_v16 }
 0x189   : > { %2489 = vst [vmem:[%s3700_s11 + $0x28] sm:$0xff] %v2466_v7   ;;  %v1877_v58 = vadd.f32 %v2786_v18, %v3670_v19  ;;  %v1868_v15 = vpop.f32.mrb[69].mxu0 }
 0x18a   : > { %v2794_v38 = vpop.f32.mrb[68].mxu1  ;;  %2488 = vst [vmem:[%s3700_s11 + $0x20] sm:$0xff] %v2461_v34   ;;  %v1953_v59 = vadd.f32 %v1952_v56, %v1938_v53  ;;  %v1869_v62 = vadd.f32 %v1868_v15, %v3664_v61  ;;  %v1917_v35 = vadd.f32 %v1916_v6, %v1864_v42  ;;  %v2787_v44 = vpop.f32.mrb[70].mxu0 }
 0x18b   : > { %v1909_v60 = vadd.f32 %v2794_v38, %v1812_v49  ;;  %v1900_v40 = vpop.f32.mrb[69].mxu1  ;;  %v1880_v2 = vadd.f32 %v2787_v44, %v3672_v27  ;;  %v1871_v0 = vpop.f32.mrb[71].mxu0  ;;  %v1942_v17 = vmul.f32 %v1877_v58, %v1877_v58 }
 0x18c   : > { %v1901_v43 = vadd.f32 %v1900_v40, %v1804_v3  ;;  %v2795_v1 = vpop.f32.mrb[70].mxu1  ;;  %v1918_v50 = vadd.f32 %v1917_v35, %v1869_v62  ;;  %v1940_v5 = vmul.f32 %v1869_v62, %v1869_v62  ;;  %v1954_v19 = vadd.f32 %v1953_v59, %v1939_v39 }
 0x18d   : > { %v1912_v47 = vadd.f32 %v2795_v1, %v1815_v54  ;;  %v1903_v30 = vpop.f32.mrb[71].mxu1  ;;  %v2456_v52 = vpack.c.bf16 %v1880_v2, %v1877_v58  ;;  %v1872_v61 = vadd.f32 %v1871_v0, %v3666_v36  ;;  %v1943_v25 = vmul.f32 %v1880_v2, %v1880_v2 }
 0x18e   : > { %v1955_v29 = vadd.f32 %v1954_v19, %v1940_v5  ;;  %v1904_v3 = vadd.f32 %v1903_v30, %v3682_v4  ;;  %v1948_v9 = vmul.f32 %v1901_v43, %v1901_v43  ;;  %v1950_v7 = vmul.f32 %v1909_v60, %v1909_v60 }
 0x18f   : > { %v2476_v20 = vpack.c.bf16 %v1912_v47, %v1909_v60  ;;  %2487 = vst [vmem:[%s3700_s11 + $0x18] sm:$0xff] %v2456_v52   ;;  %v1919_v10 = vadd.f32 %v1918_v50, %v1872_v61  ;;  %v1941_v12 = vmul.f32 %v1872_v61, %v1872_v61  ;;  %v2451_v27 = vpack.c.bf16 %v1872_v61, %v1869_v62 }
 0x190   : > { %v2471_v13 = vpack.c.bf16 %v1904_v3, %v1901_v43  ;;  %v1951_v51 = vmul.f32 %v1912_v47, %v1912_v47 }
 0x191   : > { %2491 = vst [vmem:[%s3700_s11 + $0x38] sm:$0xff] %v2476_v20   ;;  %v1920_v24 = vadd.f32 %v1919_v10, %v1877_v58  ;;  %v1956_v22 = vadd.f32 %v1955_v29, %v1941_v12  ;;  %2486 = vst [vmem:[%s3700_s11 + $0x10] sm:$0xff] %v2451_v27  }
 0x192   : > { %2490 = vst [vmem:[%s3700_s11 + $0x30] sm:$0xff] %v2471_v13  }
 0x193   : > { %v1921_v26 = vadd.f32 %v1920_v24, %v1880_v2  ;;  %v1957_v49 = vadd.f32 %v1956_v22, %v1942_v17 }
 0x195   : > { %v1922_v36 = vadd.f32 %v1921_v26, %v3690_v23  ;;  %v1958_v4 = vadd.f32 %v1957_v49, %v1943_v25 }
 0x197   : > { %v1959_v54 = vadd.f32 %v1958_v4, %v1944_v46  ;;  %v1923_v55 = vadd.f32 %v1922_v36, %v1888_v16  ;;  %v1949_v16 = vmul.f32 %v1904_v3, %v1904_v3 }
 0x199   : > { %v1924_v14 = vadd.f32 %v1923_v55, %v3687_v8  ;;  %v1960_v11 = vadd.f32 %v1959_v54, %v1945_v63 }
 0x19b   : > { %v1925_v41 = vadd.f32 %v1924_v14, %v3693_v37  ;;  %v1961_v42 = vadd.f32 %v1960_v11, %v1946_v32 }
 0x19d   : > { %v1926_v23 = vadd.f32 %v1925_v41, %v1901_v43  ;;  %v1962_v21 = vadd.f32 %v1961_v42, %v1947_v48 }
 0x19f   : > { %v1927_v57 = vadd.f32 %v1926_v23, %v1904_v3  ;;  %v1963_v31 = vadd.f32 %v1962_v21, %v1948_v9 }
 0x1a1   : > { %v1928_v33 = vadd.f32 %v1927_v57, %v1909_v60  ;;  %v1964_v45 = vadd.f32 %v1963_v31, %v1949_v16 }
 0x1a3   : > { %v1929_v8 = vadd.f32 %v1928_v33, %v1912_v47  ;;  %v1965_v28 = vadd.f32 %v1964_v45, %v1950_v7 }
 0x1a5   : > { %v1930_v34 = vrot.slane %v1929_v8, 4  ;;  %v1966_v53 = vadd.f32 %v1965_v28, %v1951_v51 }
 0x1a7   : > { %v1931_v37 = vadd.f32 %v1930_v34, %v1929_v8  ;;  %v1967_v6 = vrot.slane %v1966_v53, 4 }
 0x1a9   : > { %v1932_v56 = vrot.slane %v1931_v37, 2  ;;  %v1968_v18 = vadd.f32 %v1967_v6, %v1966_v53 }
 0x1ab   : > { %v1933_v38 = vadd.f32 %v1932_v56, %v1931_v37  ;;  %v1969_v39 = vrot.slane %v1968_v18, 2 }
 0x1ad   : > { %v1934_v58 = vrot.slane %v1933_v38, 1  ;;  %v1970_v15 = vadd.f32 %v1969_v39, %v1968_v18 }
 0x1af   : > { %v1971_v60 = vrot.slane %v1970_v15, 1  ;;  %v1935_v40 = vadd.f32 %v1934_v58, %v1933_v38 }
 0x1b1   : > { %v1972_v59 = vadd.f32 %v1971_v60, %v1970_v15 }
 0x1b3   : > { %v1974_v62 = vsel %vm1973_vm6, %v1935_v40, %v1972_v59 }
 0x1b4   : > { %1975 = vst [vmem:[%s467_s22] sm:$0x3] %v1974_v62 }
 0x1b5 PF: > { %s18_s28 = sadd.s32 1, %s2973_s28   ;;  %s3763_s24 = smov %s2965_s26 }
 0x1b6   : > { %p15_p13 = scmp.ge.s32.totalorder %s18_s28, 6   ;;  %s3764_s25 = smov %s2969_s27 }
 0x1b7   : > { %s3765_s26 = smov %s3768_s29  ;;  %s3766_s27 = smov %s3772_s30 }
 0x1b8   :  { %17 = sbr.rel (!%p15_p13) target bundleno = 3 (0x3), region = 95 }

// kernel: basic_block_forward.3
= control target key start
LH: loop header
LB: loop body
LE: loop exit
PB: predicated region body
PF: predicated region fallthrough
CT: control target
= control target key end

     0   :  { %13 = vsyncpa [#allocation4], 0  ;;  %s3762_s24 = smov 0   ;;  %s3764_s25 = smov 0   ;;  %s4316_s0 = inlined_call_operand.vmem [shape: f32[2,16,16,4], index: 0, kind: input, shape index: {}, may-alias: {0,1,2}]   ;;  %s4317_s1 = inlined_call_operand.vmem [shape: f32[2,16,16,4], index: 1, kind: input, shape index: {}, may-alias: {0,1,2}]   ;;  %s4318_s2 = inlined_call_operand.vmem [shape: f32[2,16,16,4], index: 2, kind: input, shape index: {}, may-alias: {0,1,2}]   ;;  %s4319_s3 = inlined_call_operand.hbm [shape: bf16[1152,256], index: 3, kind: input, shape index: {}]   ;;  %s4320_s4 = inlined_call_operand.vmem [shape: bf16[2,16,16,128], index: 4, kind: output, shape index: {0}]   ;;  %s4321_s5 = inlined_call_operand.vmem [shape: bf16[2,16,16,128], index: 5, kind: output, shape index: {1}]   ;;  %s4322_s6 = inlined_call_operand.vmem [shape: f32[2,2,2,128], index: 6, kind: output, shape index: {2}]   ;;  %s4323_s7 = inlined_call_operand.vmem [shape: f32[2,2,2,128], index: 7, kind: output, shape index: {3}]  }
   0x1   :  { %s3766_s26 = smov 0   ;;  %s3768_s27 = smov 0  }
   0x2   :  { %s3770_s28 = smov 0  }
   0x3 LB: > { %s2844_s29 = sadd.s32 4294967295, %s3715_s28   ;;  %s28_s30 = sadd.s32 1, %s3707_s26  ;;  %s3715_s28 = sphi %s3770_s28, %s19_s28   ;;  %s3711_s27 = sphi %s3768_s27, %s4336_s27   ;;  %s3707_s26 = sphi %s3766_s26, %s4335_s26   ;;  %s3703_s25 = sphi %s3764_s25, %s4334_s25   ;;  %s3699_s24 = sphi %s3762_s24, %s4333_s24  }
   0x4   : > { %p29_p0 = scmp.ge.s32.totalorder %s28_s30, 2  ;;  %s31_s8 = sadd.s32 1, %s3711_s27 }
   0x5   : > { %p2852_p1 = scmp.ge.s32.totalorder %s3715_s28, 1  ;;  %p269_p2 = scmp.lt.s32.totalorder %s3715_s28, 5 }
   0x6   : > { %s4338_s30 = smov (%p29_p0, %s28_s30), 0  ;;  %s4340_s8 = smov (!%p29_p0, %s31_s8), %s3711_s27 }
   0x7   : > { %p3795_p3 = pnand %p2852_p1, %p269_p2  ;;  %p33_p4 = scmp.ge.s32.totalorder %s4340_s8, 2 }
   0x8   : > { %p3799_p5 = scmp.eq.s32.totalorder %s2844_s29, 0  ;;  %s3717_s11 = smov [#allocation3]  }
   0x9   : > { %s4327_s9 = scalar_select %p3795_p3, 1, 0 }
   0xa   : > { %s4328_s10 = scalar_select %p3799_p5, 1, 0 }
   0xb   : > { %p3366_p6 = pneg %p3795_p3  ;;  %s4342_s8 = smov (%p33_p4, %s4340_s8), 0 }
   0xc   : > { %s281_s12 = sshll.u32 %s3717_s11, 4  ;;  %s3645_s16 = scalar_lea.hbm %s4319_s3, 18432  ;;  %s282_s12 = int_to_ptr.vmem [resolvable:$true] %s281_s12 }
   0xd   : > { %p3809_p7 = pnand %p3799_p5, %p3366_p6  ;;  %p3646_p8 = scmp.ne.s32.totalorder %s4319_s3, %s3645_s16 }
   0xe   : > { %p3652_p12 = scmp.lt.u32.totalorder %s3645_s16, %s4319_s3 }
   0xf   : > { %p3647_p9 = pneg %p3809_p7 }
  0x11   : > { %p3648_p10 = pnand %p3647_p9, %p3646_p8 }
  0x13   : > { %p3649_p11 = pneg %p3648_p10 }
  0x15   : > { %p3654_p13 = pnand %p3652_p12, %p3649_p11 }
  0x17   : > { %3657 = shalt.err (!%p3654_p13)
}
  0x18   : > { %s3658_s21 = scalar_lea.vmem %s282_s12, 18432  ;;  %p3666_p4 = scmp.lt.s32.totalorder %s282_s12, %s282_s12 }
  0x19   : > { %p3659_p0 = scmp.ne.s32.totalorder %s282_s12, %s3658_s21  ;;  %p3667_p6 = scmp.lt.s32.totalorder %s3658_s21, %s3658_s21 }
  0x1b   : > { %p3661_p1 = pnand %p3659_p0, %p3647_p9  ;;  %p3668_p5 = por %p3667_p6, %p3666_p4 }
  0x1d   : > { %p3662_p2 = pneg %p3661_p1 }
  0x1f   : > { %p3669_p3 = pnand %p3668_p5, %p3662_p2 }
  0x21   : > { %3672 = shalt.err (!%p3669_p3)
}
  0x22   : > { %s3718_s22 = smov 128   ;;  %s3719_s23 = smov 8  }
  0x23   : > { %3369 = dma.hbm_to_vmem [thread:$0]  (!%p3809_p7), %s4319_s3, 18432, %s282_s12, [#allocation4], %s3718_s22, %s3718_s22, %s3719_s23  }
  0x24   : > { %p4330_p8 = scmp.ne.s32.totalorder %s4327_s9, 0 }
  0x25   : > { %p4331_p10 = scmp.ne.s32.totalorder (!%p4330_p8), %s4328_s10, 0 }
  0x26   : > { %351 = sbr.rel (%p4330_p8) target bundleno = 500 (0x1f4), region = 36 }
  0x2d   : > { %3694 = dma.done.wait (%p4331_p10), [#allocation4], 18432  }
  0x2e   : > { %3696 = vsyncadd (%p4331_p10), [#allocation4], 4294948864  ;;  %v3720_v0 = vmov 0.0   ;;  %p597_p3 = scmp.eq.s32.totalorder %s3699_s24, 0  ;;  %v3417_v1 = vld [vmem:[#allocation3 + $0x4] ss:$8 sps:$4 sm:$0xff]  }
  0x2f   : > { %529 = vst [vmem:[#allocation2] sm:$0xff] %v3720_v0  ;;  %530 = vst [vmem:[#allocation2 + $0x8] sm:$0xff] %v3720_v0  ;;  %v3419_v2 = vld [vmem:[#allocation3 + $0x204] ss:$8 sps:$4 sm:$0xff]   ;;  %1695 = vmatprep.subr.bf16.mxu1 %v3417_v1  ;;  %v3421_v3 = vld [vmem:[#allocation3] ss:$8 sps:$4 sm:$0xff]  }
  0x30   : > { %531 = vst [vmem:[#allocation2 + $0x10] sm:$0x3] %v3720_v0  ;;  %532 = vst [vmem:[#allocation2 + $0x18] sm:$0xff] %v3720_v0  ;;  %v3422_v4 = vld [vmem:[#allocation3 + $0x200] ss:$8 sps:$4 sm:$0xff]   ;;  %1921 = vmatprep.subr.bf16.mxu0 %v3419_v2  ;;  %1696 = vmatpush1.bf16.msra.mxu1 %v3421_v3  ;;  %s3837_s9 = sshll.u32 %s3699_s24, 3 }
  0x31   : > { %533 = vst [vmem:[#allocation2 + $0x20] sm:$0xff] %v3720_v0  ;;  %534 = vst [vmem:[#allocation2 + $0x28] sm:$0x3] %v3720_v0  ;;  %v3423_v5 = vld [vmem:[#allocation3 + $0x14] ss:$8 sps:$4 sm:$0xff]   ;;  %1922 = vmatpush1.bf16.msra.mxu0 %v3422_v4  ;;  %s2862_s10 = sadd.s32 4294967295, %s3837_s9 }
  0x32   : > { %535 = vst [vmem:[#allocation2 + $0x30] sm:$0xff] %v3720_v0  ;;  %536 = vst [vmem:[#allocation2 + $0x38] sm:$0xff] %v3720_v0  ;;  %v3425_v6 = vld [vmem:[#allocation3 + $0x214] ss:$8 sps:$4 sm:$0xff]   ;;  %v3427_v7 = vld [vmem:[#allocation3 + $0x10] ss:$8 sps:$4 sm:$0xff]   ;;  %1697 = vmatprep.subr.bf16.mxu1 %v3423_v5 }
  0x33   : > { %537 = vst [vmem:[#allocation2 + $0x40] sm:$0x3] %v3720_v0  ;;  %538 = vst [vmem:[#allocation2 + $0x48] sm:$0xff] %v3720_v0  ;;  %v3428_v8 = vld [vmem:[#allocation3 + $0x210] ss:$8 sps:$4 sm:$0xff]   ;;  %1923 = vmatprep.subr.bf16.mxu0 %v3425_v6  ;;  %p458_p5 = scmp.gt.s32.totalorder %s2862_s10, 0 }
  0x34   : > { %539 = vst [vmem:[#allocation2 + $0x50] sm:$0xff] %v3720_v0  ;;  %540 = vst [vmem:[#allocation2 + $0x58] sm:$0x3] %v3720_v0  ;;  %v3429_v9 = vld [vmem:[#allocation3 + $0x24] ss:$8 sps:$4 sm:$0xff]   ;;  %1698 = vmatpush1.bf16.msra.mxu1 %v3427_v7  ;;  %p446_p7 = scmp.lt.s32.totalorder %s3703_s25, 1 }
  0x35   : > { %541 = vst [vmem:[#allocation2 + $0x60] sm:$0xff] %v3720_v0  ;;  %542 = vst [vmem:[#allocation2 + $0x68] sm:$0xff] %v3720_v0  ;;  %v3431_v10 = vld [vmem:[#allocation3 + $0x224] ss:$8 sps:$4 sm:$0xff]   ;;  %v3433_v11 = vld [vmem:[#allocation3 + $0x20] ss:$8 sps:$4 sm:$0xff]   ;;  %1924 = vmatpush1.bf16.msra.mxu0 %v3428_v8  ;;  %1699 = vmatprep.subr.bf16.mxu1 %v3429_v9 }
  0x36   : > { %543 = vst [vmem:[#allocation2 + $0x70] sm:$0x3] %v3720_v0  ;;  %544 = vst [vmem:[#allocation2 + $0x78] sm:$0xff] %v3720_v0  ;;  %v3434_v12 = vld [vmem:[#allocation3 + $0x220] ss:$8 sps:$4 sm:$0xff]   ;;  %1925 = vmatprep.subr.bf16.mxu0 %v3431_v10  ;;  %p2863_p9 = scmp.lt.s32.totalorder %s2862_s10, 15 }
  0x37   : > { %545 = vst [vmem:[#allocation2 + $0x80] sm:$0xff] %v3720_v0  ;;  %546 = vst [vmem:[#allocation2 + $0x88] sm:$0x3] %v3720_v0  ;;  %v3435_v13 = vld [vmem:[#allocation3 + $0x34] ss:$8 sps:$4 sm:$0xff]   ;;  %s459_s12 = scalar_select %p458_p5, %s2862_s10, 0 }
  0x38   : > { %547 = vst [vmem:[#allocation2 + $0x90] sm:$0xff] %v3720_v0  ;;  %548 = vst [vmem:[#allocation2 + $0x98] sm:$0xff] %v3720_v0  ;;  %v3437_v14 = vld [vmem:[#allocation3 + $0x234] ss:$8 sps:$4 sm:$0xff]   ;;  %v3439_v15 = vld [vmem:[#allocation3 + $0x30] ss:$8 sps:$4 sm:$0xff]   ;;  %1700 = vmatpush1.bf16.msra.mxu1 %v3433_v11 }
  0x39   : > { %549 = vst [vmem:[#allocation2 + $0xa0] sm:$0x3] %v3720_v0  ;;  %550 = vst [vmem:[#allocation2 + $0xa8] sm:$0xff] %v3720_v0  ;;  %1926 = vmatpush1.bf16.msra.mxu0 %v3434_v12  ;;  %v3440_v16 = vld [vmem:[#allocation3 + $0x230] ss:$8 sps:$4 sm:$0xff]   ;;  %1701 = vmatprep.subr.bf16.mxu1 %v3435_v13  ;;  %p448_p11 = scmp.lt.s32.totalorder %s3837_s9, 15 }
  0x3a   : > { %551 = vst [vmem:[#allocation2 + $0xb0] sm:$0xff] %v3720_v0  ;;  %552 = vst [vmem:[#allocation2 + $0xb8] sm:$0x3] %v3720_v0  ;;  %v3441_v17 = vld [vmem:[#allocation3 + $0x44] ss:$8 sps:$4 sm:$0xff]   ;;  %1927 = vmatprep.subr.bf16.mxu0 %v3437_v14  ;;  %s4344_s25 = smov (!%p446_p7, %s3703_s25), 1 }
  0x3b   : > { %553 = vst [vmem:[#allocation2 + $0xc0] sm:$0xff] %v3720_v0  ;;  %554 = vst [vmem:[#allocation2 + $0xc8] sm:$0xff] %v3720_v0  ;;  %v3443_v18 = vld [vmem:[#allocation3 + $0x244] ss:$8 sps:$4 sm:$0xff]   ;;  %v3445_v19 = vld [vmem:[#allocation3 + $0x40] ss:$8 sps:$4 sm:$0xff]  }
  0x3c   : > { %555 = vst [vmem:[#allocation2 + $0xd0] sm:$0x3] %v3720_v0  ;;  %556 = vst [vmem:[#allocation2 + $0xd8] sm:$0xff] %v3720_v0  ;;  %v3446_v20 = vld [vmem:[#allocation3 + $0x240] ss:$8 sps:$4 sm:$0xff]   ;;  %1702 = vmatpush1.bf16.msra.mxu1 %v3439_v15  ;;  %s4346_s12 = smov (!%p2863_p9, %s459_s12), 15 }
  0x3d   : > { %557 = vst [vmem:[#allocation2 + $0xe0] sm:$0xff] %v3720_v0  ;;  %558 = vst [vmem:[#allocation2 + $0xe8] sm:$0x3] %v3720_v0  ;;  %1928 = vmatpush1.bf16.msra.mxu0 %v3440_v16  ;;  %v3447_v21 = vld [vmem:[#allocation3 + $0x54] ss:$8 sps:$4 sm:$0xff]   ;;  %1703 = vmatprep.subr.bf16.mxu1 %v3441_v17  ;;  %s449_s13 = scalar_select %p448_p11, %s3837_s9, 15 }
  0x3e   : > { %1929 = vmatprep.subr.bf16.mxu0 %v3443_v18  ;;  %v3449_v22 = vld [vmem:[#allocation3 + $0x254] ss:$8 sps:$4 sm:$0xff]   ;;  %v3451_v23 = vld [vmem:[#allocation3 + $0x50] ss:$8 sps:$4 sm:$0xff]   ;;  %v3453_v25 = vld [vmem:[#allocation3 + $0x64] ss:$8 sps:$4 sm:$0xff]  }
  0x3f   : > { %v3452_v24 = vld [vmem:[#allocation3 + $0x250] ss:$8 sps:$4 sm:$0xff]   ;;  %v3455_v26 = vld [vmem:[#allocation3 + $0x264] ss:$8 sps:$4 sm:$0xff]   ;;  %v3457_v27 = vld [vmem:[#allocation3 + $0x60] ss:$8 sps:$4 sm:$0xff]  }
  0x40   : > { %1704 = vmatpush1.bf16.msra.mxu1 %v3445_v19  ;;  %v3458_v28 = vld [vmem:[#allocation3 + $0x260] ss:$8 sps:$4 sm:$0xff]   ;;  %v3459_v29 = vld [vmem:[#allocation3 + $0x74] ss:$8 sps:$4 sm:$0xff]   ;;  %v3463_v31 = vld [vmem:[#allocation3 + $0x70] ss:$8 sps:$4 sm:$0xff]  }
  0x41   : > { %1930 = vmatpush1.bf16.msra.mxu0 %v3446_v20  ;;  %1705 = vmatprep.subr.bf16.mxu1 %v3447_v21  ;;  %v3461_v30 = vld [vmem:[#allocation3 + $0x274] ss:$8 sps:$4 sm:$0xff]   ;;  %s3848_s14 = sshll.u32 %s4344_s25, 5  ;;  %v3464_v32 = vld [vmem:[#allocation3 + $0x270] ss:$8 sps:$4 sm:$0xff]   ;;  %s2868_s15 = sshll.u32 %s4346_s12, 1 }
  0x42   : > { %1931 = vmatprep.subr.bf16.mxu0 %v3449_v22  ;;  %v3465_v33 = vld [vmem:[#allocation3 + $0x84] ss:$8 sps:$4 sm:$0xff]   ;;  %s2858_s16 = sshll.u32 %s449_s13, 1  ;;  %v3469_v35 = vld [vmem:[#allocation3 + $0x80] ss:$8 sps:$4 sm:$0xff]   ;;  %s466_s17 = sadd.s32 %s2868_s15, %s3848_s14  ;;  %vm576_vm0 = vcmask 31744  }
  0x43   : > { %v3467_v34 = vld [vmem:[#allocation3 + $0x284] ss:$8 sps:$4 sm:$0xff]   ;;  %v3470_v36 = vld [vmem:[#allocation3 + $0x280] ss:$8 sps:$4 sm:$0xff]   ;;  %v3471_v37 = vld [vmem:[#allocation3 + $0x94] ss:$8 sps:$4 sm:$0xff]   ;;  %s3852_s18 = sadd.s32 %s3848_s14, %s2858_s16 }
  0x44   : > { %1706 = vmatpush1.bf16.msra.mxu1 %v3451_v23  ;;  %v3473_v38 = vld [vmem:[#allocation3 + $0x294] ss:$8 sps:$4 sm:$0xff]   ;;  %s2870_s19 = sshll.u32 %s466_s17, 3  ;;  %v3475_v39 = vld [vmem:[#allocation3 + $0x90] ss:$8 sps:$4 sm:$0xff]   ;;  %s2860_s20 = sshll.u32 %s3852_s18, 3 }
  0x45   : > { %1932 = vmatpush1.bf16.msra.mxu0 %v3452_v24  ;;  %1707 = vmatprep.subr.bf16.mxu1 %v3453_v25  ;;  %v3476_v40 = vld [vmem:[#allocation3 + $0x290] ss:$8 sps:$4 sm:$0xff]   ;;  %v3477_v41 = vld [vmem:[#allocation3 + $0xa4] ss:$8 sps:$4 sm:$0xff]   ;;  %s468_s23 = scalar_lea.vmem %s4317_s1, %s2870_s19  ;;  %v3481_v43 = vld [vmem:[#allocation3 + $0xa0] ss:$8 sps:$4 sm:$0xff]   ;;  %s3863_s12 = scalar_lea.vmem %s4316_s0, %s2860_s20 }
  0x46   : > { %1933 = vmatprep.subr.bf16.mxu0 %v3455_v26  ;;  %v3479_v42 = vld [vmem:[#allocation3 + $0x2a4] ss:$8 sps:$4 sm:$0xff]   ;;  %s3514_s29 = scalar_select %p597_p3, 0, 255  ;;  %v3482_v44 = vld [vmem:[#allocation3 + $0x2a0] ss:$8 sps:$4 sm:$0xff]  }
  0x47   : > { %v3483_v45 = vld [vmem:[#allocation3 + $0xb4] ss:$8 sps:$4 sm:$0xff]   ;;  %v3487_v47 = vld [vmem:[#allocation3 + $0xb0] ss:$8 sps:$4 sm:$0xff]   ;;  %v3489_v53 = vld [vmem:[#allocation3 + $0xc4] ss:$8 sps:$4 sm:$0xff]  }
  0x48   : > { %1708 = vmatpush1.bf16.msra.mxu1 %v3457_v27  ;;  %v3485_v46 = vld [vmem:[#allocation3 + $0x2b4] ss:$8 sps:$4 sm:$0xff]   ;;  %v3488_v48 = vld [vmem:[#allocation3 + $0x2b0] ss:$8 sps:$4 sm:$0xff]   ;;  %v3491_v54 = vld [vmem:[#allocation3 + $0x2c4] ss:$8 sps:$4 sm:$0xff]  }
  0x49   : > { %1934 = vmatpush1.bf16.msra.mxu0 %v3458_v28  ;;  %1709 = vmatprep.subr.bf16.mxu1 %v3459_v29  ;;  %v3515_v49 = vld [vmem:[%s468_s23] sm:%s3514_s29]  ;;  %v3518_v50 = vld [vmem:[%s468_s23 + $0x8] sm:%s3514_s29]  ;;  %v3493_v55 = vld [vmem:[#allocation3 + $0xc0] ss:$8 sps:$4 sm:$0xff]   ;;  %p605_p12 = scmp.eq.s32.totalorder %s3699_s24, 1  ;;  %s3075_s13 = sadd.s32 8, %s3837_s9 }
  0x4a   : > { %1935 = vmatprep.subr.bf16.mxu0 %v3461_v30  ;;  %603 = vst.msk [vmem:[#allocation2 + $0x1] sm:$0xff] %vm576_vm0, %v3515_v49  ;;  %v559_v51 = vld [vmem:[%s3863_s12] sm:$0xff]  ;;  %v560_v52 = vld [vmem:[%s3863_s12 + $0x8] sm:$0xff]  ;;  %604 = vst.msk [vmem:[#allocation2 + $0x9] sm:$0xff] %vm576_vm0, %v3518_v50  ;;  %p3991_p13 = scmp.lt.s32.totalorder %s3075_s13, 15  ;;  %s2881_s22 = sshll.u32 %s3852_s18, 2 }
  0x4b   : > { %577 = vst.msk [vmem:[#allocation2 + $0x19] sm:$0xff] %vm576_vm0, %v559_v51  ;;  %578 = vst.msk [vmem:[#allocation2 + $0x21] sm:$0xff] %vm576_vm0, %v560_v52  ;;  %v3494_v56 = vld [vmem:[#allocation3 + $0x2c0] ss:$8 sps:$4 sm:$0xff]   ;;  %v3495_v57 = vld [vmem:[#allocation3 + $0xd4] ss:$8 sps:$4 sm:$0xff]   ;;  %s4206_s11 = scalar_lea.vmem %s4320_s4, %s2881_s22 }
  0x4c   : > { %1710 = vmatpush1.bf16.msra.mxu1 %v3463_v31  ;;  %v3497_v58 = vld [vmem:[#allocation3 + $0x2d4] ss:$8 sps:$4 sm:$0xff]   ;;  %v561_v59 = vld [vmem:[%s3863_s12 + $0x10] sm:$0xff]  ;;  %v562_v60 = vld [vmem:[%s3863_s12 + $0x18] sm:$0xff]  ;;  %s4348_s13 = smov (!%p3991_p13, %s3075_s13), 15  ;;  %p514_p0 = scmp.lt.s32.totalorder %s3699_s24, 1 }
  0x4d   : > { %1936 = vmatpush1.bf16.msra.mxu0 %v3464_v32  ;;  %1711 = vmatprep.subr.bf16.mxu1 %v3465_v33  ;;  %579 = vst.msk [vmem:[#allocation2 + $0x31] sm:$0xff] %vm576_vm0, %v561_v59  ;;  %580 = vst.msk [vmem:[#allocation2 + $0x39] sm:$0xff] %vm576_vm0, %v562_v60  ;;  %v3499_v1 = vld [vmem:[#allocation3 + $0xd0] ss:$8 sps:$4 sm:$0xff]   ;;  %v3501_v5 = vld [vmem:[#allocation3 + $0xe4] ss:$8 sps:$4 sm:$0xff]  }
  0x4e   : > { %1937 = vmatprep.subr.bf16.mxu0 %v3467_v34  ;;  %v3500_v2 = vld [vmem:[#allocation3 + $0x2d0] ss:$8 sps:$4 sm:$0xff]   ;;  %v3503_v6 = vld [vmem:[#allocation3 + $0x2e4] ss:$8 sps:$4 sm:$0xff]   ;;  %v3505_v7 = vld [vmem:[#allocation3 + $0xe0] ss:$8 sps:$4 sm:$0xff]  }
  0x4f   : > { %v3506_v8 = vld [vmem:[#allocation3 + $0x2e0] ss:$8 sps:$4 sm:$0xff]   ;;  %v3507_v9 = vld [vmem:[#allocation3 + $0xf4] ss:$8 sps:$4 sm:$0xff]   ;;  %v3511_v11 = vld [vmem:[#allocation3 + $0xf0] ss:$8 sps:$4 sm:$0xff]  }
  0x50   : > { %1712 = vmatpush1.bf16.msra.mxu1 %v3469_v35  ;;  %v3509_v10 = vld [vmem:[#allocation3 + $0x2f4] ss:$8 sps:$4 sm:$0xff]   ;;  %v3512_v12 = vld [vmem:[#allocation3 + $0x2f0] ss:$8 sps:$4 sm:$0xff]   ;;  %v3521_v15 = vld [vmem:[#allocation3 + $0x104] ss:$8 sps:$4 sm:$0xff]  }
  0x51   : > { %1938 = vmatpush1.bf16.msra.mxu0 %v3470_v36  ;;  %1713 = vmatprep.subr.bf16.mxu1 %v3471_v37  ;;  %v638_v61 = vld [vmem:[#allocation2 + $0x1] sm:$0xff]  ;;  %v639_v62 = vld [vmem:[#allocation2 + $0x9] sm:$0xff]  ;;  %v3880_v20 = vld [vmem:[#allocation3 + $0x304] ss:$8 sps:$4 sm:$0xff]   ;;  %s4350_s13 = smov (!%p3991_p13, %s4348_s13), 15  ;;  %s4352_s24 = smov (!%p514_p0, %s3699_s24), 1 }
  0x52   : > { %1939 = vmatprep.subr.bf16.mxu0 %v3473_v38  ;;  %v734_v63 = vld [vmem:[#allocation2 + $0x1a] sm:$0xff]  ;;  %v735_v0 = vld [vmem:[#allocation2 + $0x22] sm:$0xff]  ;;  %v654_v3 = vpack.c.bf16 %v639_v62, %v638_v61  ;;  %v565_v33 = vld [vmem:[%s3863_s12 + $0x30] sm:$0xff]  ;;  %s2875_s9 = sshll.u32 %s4350_s13, 1  ;;  %s2886_s13 = sshll.u32 %s4344_s25, 1  ;;  %vm2318_vm1 = vcmask 1040384  }
  0x53   : > { %v3875_v4 = vpack.c.bf16 %v735_v0, %v734_v63  ;;  %v614_v13 = vld [vmem:[#allocation2] sm:$0xff]  ;;  %v615_v14 = vld [vmem:[#allocation2 + $0x8] sm:$0xff]  ;;  %v3519_v21 = vld [vmem:[#allocation3 + $0x100] ss:$8 sps:$4 sm:$0xff]   ;;  %583 = vst.msk [vmem:[#allocation2 + $0x61] sm:$0xff] %vm576_vm0, %v565_v33  ;;  %s483_s16 = sadd.s32 %s2875_s9, %s3848_s14  ;;  %s517_s15 = sadd.s32 %s2886_s13, %s4352_s24 }
  0x54   : > { %1714 = vmatpush1.bf16.msra.mxu1 %v3475_v39  ;;  %1727 = vmatprep.mubr.bf16.mxu1 %v654_v3  ;;  %v710_v16 = vld [vmem:[#allocation2 + $0x19] sm:$0xff]  ;;  %v711_v17 = vld [vmem:[#allocation2 + $0x21] sm:$0xff]  ;;  %v630_v23 = vpack.c.bf16 %v615_v14, %v614_v13  ;;  %v712_v36 = vld [vmem:[#allocation2 + $0x31] sm:$0xff]  ;;  %s2877_s14 = sshll.u32 %s483_s16, 3  ;;  %s2887_s9 = sshll.u32 %s517_s15, 1 }
  0x55   : > { %1940 = vmatpush1.bf16.msra.mxu0 %v3476_v40  ;;  %1715 = vmatprep.subr.bf16.mxu1 %v3477_v41  ;;  %v563_v18 = vld [vmem:[%s3863_s12 + $0x20] sm:$0xff]  ;;  %v564_v19 = vld [vmem:[%s3863_s12 + $0x28] sm:$0xff]  ;;  %v3884_v22 = vld [vmem:[#allocation3 + $0x300] ss:$8 sps:$4 sm:$0xff]   ;;  %v726_v24 = vpack.c.bf16 %v711_v17, %v710_v16  ;;  %s3640_s17 = scalar_select %p605_p12, 0, 255 }
  0x56   : > { %1941 = vmatprep.subr.bf16.mxu0 %v3479_v42  ;;  %1953 = vmatprep.mubr.bf16.mxu0 %v3875_v4  ;;  %581 = vst.msk [vmem:[#allocation2 + $0x49] sm:$0xff] %vm576_vm0, %v563_v18  ;;  %582 = vst.msk [vmem:[#allocation2 + $0x51] sm:$0xff] %vm576_vm0, %v564_v19  ;;  %v736_v25 = vld [vmem:[#allocation2 + $0x32] sm:$0xff]  ;;  %v737_v26 = vld [vmem:[#allocation2 + $0x3a] sm:$0xff]  ;;  %s485_s21 = scalar_lea.vmem %s4318_s2, %s2877_s14  ;;  %s519_s14 = scalar_lea.vmem %s4322_s6, %s2887_s9 }
  0x57   : > { %v3527_v27 = vld [vmem:[#allocation3 + $0x114] ss:$8 sps:$4 sm:$0xff]   ;;  %v3525_v29 = vld [vmem:[#allocation3 + $0x110] ss:$8 sps:$4 sm:$0xff]   ;;  %v3891_v31 = vpack.c.bf16 %v737_v26, %v736_v25  ;;  %v616_v32 = vld [vmem:[#allocation2 + $0x18] sm:$0xff]  ;;  %s527_s19 = scalar_lea.vmem %s4323_s7, %s2887_s9 }
  0x58   : > { %1716 = vmatpush1.bf16.msra.mxu1 %v3481_v43  ;;  %v3887_v28 = vld [vmem:[#allocation3 + $0x314] ss:$8 sps:$4 sm:$0xff]   ;;  %v3889_v30 = vld [vmem:[#allocation3 + $0x310] ss:$8 sps:$4 sm:$0xff]   ;;  %v566_v34 = vld [vmem:[%s3863_s12 + $0x38] sm:$0xff] }
  0x59   : > { %1942 = vmatpush1.bf16.msra.mxu0 %v3482_v44  ;;  %1717 = vmatprep.subr.bf16.mxu1 %v3483_v45  ;;  %v617_v35 = vld [vmem:[#allocation2 + $0x20] sm:$0xff]  ;;  %584 = vst.msk [vmem:[#allocation2 + $0x69] sm:$0xff] %vm576_vm0, %v566_v34  ;;  %v3533_v38 = vld [vmem:[#allocation3 + $0x124] ss:$8 sps:$4 sm:$0xff]   ;;  %v3531_v40 = vld [vmem:[#allocation3 + $0x120] ss:$8 sps:$4 sm:$0xff]  }
  0x5a   : > { %1943 = vmatprep.subr.bf16.mxu0 %v3485_v46  ;;  %v713_v37 = vld [vmem:[#allocation2 + $0x39] sm:$0xff]  ;;  %v3904_v42 = vpack.c.bf16 %v617_v35, %v616_v32  ;;  %v3539_v46 = vld [vmem:[#allocation3 + $0x134] ss:$8 sps:$4 sm:$0xff]   ;;  %v618_v51 = vld [vmem:[#allocation2 + $0x30] sm:$0xff] }
  0x5b   : > { %v3899_v39 = vld [vmem:[#allocation3 + $0x324] ss:$8 sps:$4 sm:$0xff]   ;;  %v3902_v41 = vld [vmem:[#allocation3 + $0x320] ss:$8 sps:$4 sm:$0xff]   ;;  %v3906_v43 = vpack.c.bf16 %v713_v37, %v712_v36  ;;  %v3912_v49 = vld [vmem:[#allocation3 + $0x330] ss:$8 sps:$4 sm:$0xff]  }
  0x5c   : > { %1718 = vmatpush1.bf16.msra.mxu1 %v3487_v47  ;;  %v3910_v47 = vld [vmem:[#allocation3 + $0x334] ss:$8 sps:$4 sm:$0xff]   ;;  %v619_v52 = vld [vmem:[#allocation2 + $0x38] sm:$0xff]  ;;  %v3549_v3 = vld [vmem:[#allocation3 + $0x150] ss:$8 sps:$4 sm:$0xff]  }
  0x5d   : > { %1944 = vmatpush1.bf16.msra.mxu0 %v3488_v48  ;;  %1719 = vmatprep.subr.bf16.mxu1 %v3489_v53  ;;  %v738_v44 = vld [vmem:[#allocation2 + $0x4a] sm:$0xff]  ;;  %v739_v45 = vld [vmem:[#allocation2 + $0x52] sm:$0xff]  ;;  %v3931_v61 = vpack.c.bf16 %v619_v52, %v618_v51  ;;  %v571_v36 = vld [vmem:[%s3863_s12 + $0x60] sm:$0xff] }
  0x5e   : > { %1945 = vmatprep.subr.bf16.mxu0 %v3491_v54  ;;  %v3537_v48 = vld [vmem:[#allocation3 + $0x130] ss:$8 sps:$4 sm:$0xff]   ;;  %v3914_v50 = vpack.c.bf16 %v739_v45, %v738_v44  ;;  %v3545_v53 = vld [vmem:[#allocation3 + $0x144] ss:$8 sps:$4 sm:$0xff]   ;;  %v3543_v59 = vld [vmem:[#allocation3 + $0x140] ss:$8 sps:$4 sm:$0xff]  }
  0x5f   : > { %v714_v54 = vld [vmem:[#allocation2 + $0x49] sm:$0xff]  ;;  %v3557_v13 = vld [vmem:[#allocation3 + $0x164] ss:$8 sps:$4 sm:$0xff]   ;;  %589 = vst.msk [vmem:[#allocation2 + $0xa9] sm:$0xff] %vm576_vm0, %v571_v36 }
  0x60   : > { %1720 = vmatpush1.bf16.msra.mxu1 %v3493_v55  ;;  %v715_v55 = vld [vmem:[#allocation2 + $0x51] sm:$0xff]  ;;  %v740_v63 = vld [vmem:[#allocation2 + $0x62] sm:$0xff] }
  0x61   : > { %1946 = vmatpush1.bf16.msra.mxu0 %v3494_v56  ;;  %1721 = vmatprep.subr.bf16.mxu1 %v3495_v57  ;;  %v567_v56 = vld [vmem:[%s3863_s12 + $0x40] sm:$0xff]  ;;  %v568_v57 = vld [vmem:[%s3863_s12 + $0x48] sm:$0xff]  ;;  %v3929_v60 = vld [vmem:[#allocation3 + $0x340] ss:$8 sps:$4 sm:$0xff]   ;;  %v3933_v62 = vpack.c.bf16 %v715_v55, %v714_v54 }
  0x62   : > { %1947 = vmatprep.subr.bf16.mxu0 %v3497_v58  ;;  %v3922_v58 = vld [vmem:[#allocation3 + $0x344] ss:$8 sps:$4 sm:$0xff]   ;;  %585 = vst.msk [vmem:[#allocation2 + $0x79] sm:$0xff] %vm576_vm0, %v567_v56  ;;  %586 = vst.msk [vmem:[#allocation2 + $0x81] sm:$0xff] %vm576_vm0, %v568_v57  ;;  %v741_v0 = vld [vmem:[#allocation2 + $0x6a] sm:$0xff] }
  0x63   : > { %v3951_v14 = vld [vmem:[#allocation3 + $0x364] ss:$8 sps:$4 sm:$0xff]   ;;  %v3955_v16 = vld [vmem:[#allocation3 + $0x360] ss:$8 sps:$4 sm:$0xff]   ;;  %v3561_v25 = vld [vmem:[#allocation3 + $0x170] ss:$8 sps:$4 sm:$0xff]  }
  0x64   : > { %1722 = vmatpush1.bf16.msra.mxu1 %v3499_v1  ;;  %v3551_v1 = vld [vmem:[#allocation3 + $0x154] ss:$8 sps:$4 sm:$0xff]   ;;  %v3965_v26 = vld [vmem:[#allocation3 + $0x370] ss:$8 sps:$4 sm:$0xff]   ;;  %v3569_v33 = vld [vmem:[#allocation3 + $0x184] ss:$8 sps:$4 sm:$0xff]  }
  0x65   : > { %1948 = vmatpush1.bf16.msra.mxu0 %v3500_v2  ;;  %1723 = vmatprep.subr.bf16.mxu1 %v3501_v5  ;;  %v3937_v2 = vld [vmem:[#allocation3 + $0x354] ss:$8 sps:$4 sm:$0xff]   ;;  %v3939_v5 = vld [vmem:[#allocation3 + $0x350] ss:$8 sps:$4 sm:$0xff]   ;;  %v3982_v44 = vld [vmem:[#allocation3 + $0x380] ss:$8 sps:$4 sm:$0xff]  }
  0x66   : > { %1949 = vmatprep.subr.bf16.mxu0 %v3503_v6  ;;  %v3941_v6 = vpack.c.bf16 %v741_v0, %v740_v63  ;;  %v623_v32 = vld [vmem:[#allocation2 + $0x68] sm:$0xff]  ;;  %v574_v63 = vld [vmem:[%s3863_s12 + $0x78] sm:$0xff] }
  0x67   : > { %v572_v37 = vld [vmem:[%s3863_s12 + $0x68] sm:$0xff]  ;;  %592 = vst.msk [vmem:[#allocation2 + $0xc9] sm:$0xff] %vm576_vm0, %v574_v63  ;;  %v3593_v36 = vld [vmem:[#allocation3 + $0x1c4] ss:$8 sps:$4 sm:$0xff]  }
  0x68   : > { %1724 = vmatpush1.bf16.msra.mxu1 %v3505_v7  ;;  %v620_v7 = vld [vmem:[#allocation2 + $0x48] sm:$0xff]  ;;  %590 = vst.msk [vmem:[#allocation2 + $0xb1] sm:$0xff] %vm576_vm0, %v572_v37  ;;  %v4041_v37 = vld [vmem:[#allocation3 + $0x3c4] ss:$8 sps:$4 sm:$0xff]  }
  0x69   : > { %1950 = vmatpush1.bf16.msra.mxu0 %v3506_v8  ;;  %1725 = vmatprep.subr.bf16.mxu1 %v3507_v9  ;;  %v569_v8 = vld [vmem:[%s3863_s12 + $0x50] sm:$0xff]  ;;  %v570_v9 = vld [vmem:[%s3863_s12 + $0x58] sm:$0xff]  ;;  %v719_v35 = vld [vmem:[#allocation2 + $0x81] sm:$0xff] }
  0x6a   : > { %1951 = vmatprep.subr.bf16.mxu0 %v3509_v10  ;;  %587 = vst.msk [vmem:[#allocation2 + $0x91] sm:$0xff] %vm576_vm0, %v569_v8  ;;  %v621_v10 = vld [vmem:[#allocation2 + $0x50] sm:$0xff]  ;;  %588 = vst.msk [vmem:[#allocation2 + $0x99] sm:$0xff] %vm576_vm0, %v570_v9  ;;  %v742_v19 = vld [vmem:[#allocation2 + $0x7a] sm:$0xff] }
  0x6b   : > { %v3957_v17 = vpack.c.bf16 %v621_v10, %v620_v7  ;;  %v718_v34 = vld [vmem:[#allocation2 + $0x79] sm:$0xff]  ;;  %v3575_v52 = vld [vmem:[#allocation3 + $0x194] ss:$8 sps:$4 sm:$0xff]  }
  0x6c   : > { %1726 = vmatpush1.bf16.msra.mxu1 %v3511_v11  ;;  %v716_v11 = vld [vmem:[#allocation2 + $0x61] sm:$0xff]  ;;  %v624_v57 = vld [vmem:[#allocation2 + $0x78] sm:$0xff] }
  0x6d   : > { %1952 = vmatpush1.bf16.msra.mxu0 %v3512_v12  ;;  %1808 = vmatprep.subr.bf16.mxu1 %v3521_v15  ;;  %v717_v12 = vld [vmem:[#allocation2 + $0x69] sm:$0xff]  ;;  %v625_v0 = vld [vmem:[#allocation2 + $0x80] sm:$0xff]  ;;  %v3581_v7 = vld [vmem:[#allocation3 + $0x1a4] ss:$8 sps:$4 sm:$0xff]  }
  0x6e   : > { %2034 = vmatprep.subr.bf16.mxu0 %v3880_v20  ;;  %v3555_v15 = vld [vmem:[#allocation3 + $0x160] ss:$8 sps:$4 sm:$0xff]   ;;  %v3959_v18 = vpack.c.bf16 %v717_v12, %v716_v11  ;;  %v3573_v54 = vld [vmem:[#allocation3 + $0x190] ss:$8 sps:$4 sm:$0xff]   ;;  %v4016_v8 = vld [vmem:[#allocation3 + $0x3a4] ss:$8 sps:$4 sm:$0xff]   ;;  %v4022_v11 = vpack.c.bf16 %v625_v0, %v624_v57 }
  0x6f   : > { %1728 = vmatmul.mubr.bf16.vlgmr.msra.gmra.mrb[0].mxu1 %v630_v23  ;;  %v3563_v23 = vld [vmem:[#allocation3 + $0x174] ss:$8 sps:$4 sm:$0xff]   ;;  %v3998_v55 = vld [vmem:[#allocation3 + $0x390] ss:$8 sps:$4 sm:$0xff]   ;;  %v3579_v9 = vld [vmem:[#allocation3 + $0x1a0] ss:$8 sps:$4 sm:$0xff]  }
  0x70   : > { %1954 = vmatmul.mubr.bf16.vlgmr.msra.gmra.mrb[0].mxu0 %v726_v24  ;;  %1809 = vmatpush1.bf16.msra.mxu1 %v3519_v21  ;;  %v743_v21 = vld [vmem:[#allocation2 + $0x82] sm:$0xff]  ;;  %v4020_v10 = vld [vmem:[#allocation3 + $0x3a0] ss:$8 sps:$4 sm:$0xff]  }
  0x71   : > { %2035 = vmatpush1.bf16.msra.mxu0 %v3884_v22  ;;  %1810 = vmatprep.subr.bf16.mxu1 %v3527_v27  ;;  %v3967_v27 = vpack.c.bf16 %v743_v21, %v742_v19  ;;  %v745_v51 = vld [vmem:[#allocation2 + $0x9a] sm:$0xff]  ;;  %v3587_v19 = vld [vmem:[#allocation3 + $0x1b4] ss:$8 sps:$4 sm:$0xff]  }
  0x72   : > { %2036 = vmatprep.subr.bf16.mxu0 %v3887_v28  ;;  %1737 = vmatprep.mubr.bf16.mxu1 %v726_v24  ;;  %v3963_v24 = vld [vmem:[#allocation3 + $0x374] ss:$8 sps:$4 sm:$0xff]   ;;  %v4051_v57 = vld [vmem:[#allocation3 + $0x3c0] ss:$8 sps:$4 sm:$0xff]   ;;  %v3597_v0 = vld [vmem:[#allocation3 + $0x1d0] ss:$8 sps:$4 sm:$0xff]  }
  0x73   : > { %1963 = vmatprep.mubr.bf16.mxu0 %v3891_v31  ;;  %v4031_v21 = vld [vmem:[#allocation3 + $0x3b4] ss:$8 sps:$4 sm:$0xff]  }
  0x74   : > { %1811 = vmatpush1.bf16.msra.mxu1 %v3525_v29  ;;  %v622_v29 = vld [vmem:[#allocation2 + $0x60] sm:$0xff] }
  0x75   : > { %2037 = vmatpush1.bf16.msra.mxu0 %v3889_v30  ;;  %1812 = vmatprep.subr.bf16.mxu1 %v3533_v38  ;;  %v3975_v38 = vld [vmem:[#allocation3 + $0x384] ss:$8 sps:$4 sm:$0xff]   ;;  %v3984_v45 = vpack.c.bf16 %v623_v32, %v622_v29  ;;  %v4037_v29 = vld [vmem:[#allocation3 + $0x3b0] ss:$8 sps:$4 sm:$0xff]   ;;  %v4054_v63 = vld [vmem:[#allocation3 + $0x3d4] ss:$8 sps:$4 sm:$0xff]  }
  0x76   : > { %2038 = vmatprep.subr.bf16.mxu0 %v3899_v39  ;;  %v626_v32 = vld [vmem:[#allocation2 + $0x90] sm:$0xff] }
  0x77   : > { %1738 = vmatmul.mubr.bf16.gmra.mrb[4].mxu1 %v3904_v42 }
  0x78   : > { %1964 = vmatmul.mubr.bf16.gmra.mrb[4].mxu0 %v3906_v43  ;;  %1813 = vmatpush1.bf16.msra.mxu1 %v3531_v40  ;;  %v3567_v40 = vld [vmem:[#allocation3 + $0x180] ss:$8 sps:$4 sm:$0xff]  }
  0x79   : > { %2039 = vmatpush1.bf16.msra.mxu0 %v3902_v41  ;;  %1814 = vmatprep.subr.bf16.mxu1 %v3539_v46  ;;  %v3986_v46 = vpack.c.bf16 %v719_v35, %v718_v34  ;;  %v722_v34 = vld [vmem:[#allocation2 + $0xa9] sm:$0xff]  ;;  %v723_v35 = vld [vmem:[#allocation2 + $0xb1] sm:$0xff] }
  0x7a   : > { %2040 = vmatprep.subr.bf16.mxu0 %v3910_v47  ;;  %1747 = vmatprep.mubr.bf16.mxu1 %v3906_v43 }
  0x7b   : > { %1973 = vmatprep.mubr.bf16.mxu0 %v3914_v50 }
  0x7c   : > { %1815 = vmatpush1.bf16.msra.mxu1 %v3537_v48  ;;  %v744_v48 = vld [vmem:[#allocation2 + $0x92] sm:$0xff] }
  0x7d   : > { %2041 = vmatpush1.bf16.msra.mxu0 %v3912_v49  ;;  %1816 = vmatprep.subr.bf16.mxu1 %v3545_v53  ;;  %v3996_v53 = vld [vmem:[#allocation3 + $0x394] ss:$8 sps:$4 sm:$0xff]   ;;  %v4000_v56 = vpack.c.bf16 %v745_v51, %v744_v48  ;;  %v4047_v51 = vpack.c.bf16 %v723_v35, %v722_v34  ;;  %v4078_v35 = vld [vmem:[#allocation3 + $0x3e0] ss:$8 sps:$4 sm:$0xff]  }
  0x7e   : > { %2042 = vmatprep.subr.bf16.mxu0 %v3922_v58 }
  0x7f   : > { %1748 = vmatmul.mubr.bf16.gmra.mrb[8].mxu1 %v3931_v61 }
  0x80   : > { %1974 = vmatmul.mubr.bf16.gmra.mrb[8].mxu0 %v3933_v62  ;;  %1817 = vmatpush1.bf16.msra.mxu1 %v3543_v59  ;;  %v573_v59 = vld [vmem:[%s3863_s12 + $0x70] sm:$0xff]  ;;  %s4213_s12 = scalar_lea.vmem %s4321_s5, %s2881_s22 }
  0x81   : > { %2043 = vmatpush1.bf16.msra.mxu0 %v3929_v60  ;;  %1818 = vmatprep.subr.bf16.mxu1 %v3551_v1  ;;  %591 = vst.msk [vmem:[#allocation2 + $0xc1] sm:$0xff] %vm576_vm0, %v573_v59  ;;  %v720_v1 = vld [vmem:[#allocation2 + $0x91] sm:$0xff]  ;;  %v3599_v59 = vld [vmem:[#allocation3 + $0x1d4] ss:$8 sps:$4 sm:$0xff]  }
  0x82   : > { %2044 = vmatprep.subr.bf16.mxu0 %v3937_v2  ;;  %1757 = vmatprep.mubr.bf16.mxu1 %v3933_v62 }
  0x83   : > { %1983 = vmatprep.mubr.bf16.mxu0 %v3941_v6 }
  0x84   : > { %1819 = vmatpush1.bf16.msra.mxu1 %v3549_v3  ;;  %v721_v3 = vld [vmem:[#allocation2 + $0x99] sm:$0xff] }
  0x85   : > { %2045 = vmatpush1.bf16.msra.mxu0 %v3939_v5  ;;  %1820 = vmatprep.subr.bf16.mxu1 %v3557_v13  ;;  %v4024_v12 = vpack.c.bf16 %v721_v3, %v720_v1  ;;  %v746_v13 = vld [vmem:[#allocation2 + $0xaa] sm:$0xff] }
  0x86   : > { %2046 = vmatprep.subr.bf16.mxu0 %v3951_v14  ;;  %v4056_v1 = vld [vmem:[#allocation3 + $0x3d0] ss:$8 sps:$4 sm:$0xff]  }
  0x87   : > { %1758 = vmatmul.mubr.bf16.gmra.mrb[12].mxu1 %v3957_v17 }
  0x88   : > { %1984 = vmatmul.mubr.bf16.gmra.mrb[12].mxu0 %v3959_v18  ;;  %1821 = vmatpush1.bf16.msra.mxu1 %v3555_v15  ;;  %v747_v15 = vld [vmem:[#allocation2 + $0xb2] sm:$0xff] }
  0x89   : > { %2047 = vmatpush1.bf16.msra.mxu0 %v3955_v16  ;;  %1822 = vmatprep.subr.bf16.mxu1 %v3563_v23  ;;  %v3585_v23 = vld [vmem:[#allocation3 + $0x1b0] ss:$8 sps:$4 sm:$0xff]  }
  0x8a   : > { %2048 = vmatprep.subr.bf16.mxu0 %v3963_v24  ;;  %1767 = vmatprep.mubr.bf16.mxu1 %v3959_v18 }
  0x8b   : > { %1993 = vmatprep.mubr.bf16.mxu0 %v3967_v27 }
  0x8c   : > { %1823 = vmatpush1.bf16.msra.mxu1 %v3561_v25  ;;  %v4033_v25 = vpack.c.bf16 %v747_v15, %v746_v13  ;;  %v724_v13 = vld [vmem:[#allocation2 + $0xc1] sm:$0xff]  ;;  %v725_v15 = vld [vmem:[#allocation2 + $0xc9] sm:$0xff] }
  0x8d   : > { %2049 = vmatpush1.bf16.msra.mxu0 %v3965_v26  ;;  %1824 = vmatprep.subr.bf16.mxu1 %v3569_v33  ;;  %v627_v33 = vld [vmem:[#allocation2 + $0x98] sm:$0xff]  ;;  %v4075_v34 = vpack.c.bf16 %v725_v15, %v724_v13 }
  0x8e   : > { %2050 = vmatprep.subr.bf16.mxu0 %v3975_v38  ;;  %v4045_v48 = vpack.c.bf16 %v627_v33, %v626_v32  ;;  %v3603_v33 = vld [vmem:[#allocation3 + $0x1e0] ss:$8 sps:$4 sm:$0xff]   ;;  %v3617_v13 = vld [vmem:[#allocation3 + $0x404] ss:$8 sps:$4 sm:$0xff]  }
  0x8f   : > { %1768 = vmatmul.mubr.bf16.gmra.mrb[16].mxu1 %v3984_v45 }
  0x90   : > { %1994 = vmatmul.mubr.bf16.gmra.mrb[16].mxu0 %v3986_v46  ;;  %1825 = vmatpush1.bf16.msra.mxu1 %v3567_v40  ;;  %v748_v40 = vld [vmem:[#allocation2 + $0xc2] sm:$0xff] }
  0x91   : > { %2051 = vmatpush1.bf16.msra.mxu0 %v3982_v44  ;;  %1826 = vmatprep.subr.bf16.mxu1 %v3575_v52  ;;  %v749_v52 = vld [vmem:[#allocation2 + $0xca] sm:$0xff] }
  0x92   : > { %2052 = vmatprep.subr.bf16.mxu0 %v3996_v53  ;;  %1777 = vmatprep.mubr.bf16.mxu1 %v3986_v46  ;;  %v4058_v3 = vpack.c.bf16 %v749_v52, %v748_v40  ;;  %v3644_v40 = vld [vmem:[%s485_s21 + $0x8] sm:%s3640_s17] }
  0x93   : > { %2003 = vmatprep.mubr.bf16.mxu0 %v4000_v56  ;;  %v3611_v52 = vld [vmem:[#allocation3 + $0x1f4] ss:$8 sps:$4 sm:$0xff]   ;;  %613 = vst.msk [vmem:[#allocation2 + $0xe1] sm:$0xff] %vm576_vm0, %v3644_v40 }
  0x94   : > { %1827 = vmatpush1.bf16.msra.mxu1 %v3573_v54  ;;  %v3591_v54 = vld [vmem:[#allocation3 + $0x1c0] ss:$8 sps:$4 sm:$0xff]  }
  0x95   : > { %2053 = vmatpush1.bf16.msra.mxu0 %v3998_v55  ;;  %1828 = vmatprep.subr.bf16.mxu1 %v3581_v7  ;;  %v628_v7 = vld [vmem:[#allocation2 + $0xa8] sm:$0xff] }
  0x96   : > { %2054 = vmatprep.subr.bf16.mxu0 %v4016_v8 }
  0x97   : > { %1778 = vmatmul.mubr.bf16.gmra.mrb[20].mxu1 %v4022_v11 }
  0x98   : > { %2004 = vmatmul.mubr.bf16.gmra.mrb[20].mxu0 %v4024_v12  ;;  %1829 = vmatpush1.bf16.msra.mxu1 %v3579_v9  ;;  %v629_v9 = vld [vmem:[#allocation2 + $0xb0] sm:$0xff] }
  0x99   : > { %2055 = vmatpush1.bf16.msra.mxu0 %v4020_v10  ;;  %1830 = vmatprep.subr.bf16.mxu1 %v3587_v19  ;;  %v3605_v19 = vld [vmem:[#allocation3 + $0x1e4] ss:$8 sps:$4 sm:$0xff]   ;;  %v4073_v32 = vpack.c.bf16 %v629_v9, %v628_v7  ;;  %v662_v7 = vld [vmem:[#allocation2 + $0x2] sm:$0xff]  ;;  %v663_v9 = vld [vmem:[#allocation2 + $0xa] sm:$0xff] }
  0x9a   : > { %2056 = vmatprep.subr.bf16.mxu0 %v4031_v21  ;;  %1787 = vmatprep.mubr.bf16.mxu1 %v4024_v12  ;;  %v678_v15 = vpack.c.bf16 %v663_v9, %v662_v7 }
  0x9b   : > { %2013 = vmatprep.mubr.bf16.mxu0 %v4033_v25 }
  0x9c   : > { %1831 = vmatpush1.bf16.msra.mxu1 %v3585_v23  ;;  %v4066_v23 = vld [vmem:[#allocation3 + $0x3e4] ss:$8 sps:$4 sm:$0xff]  }
  0x9d   : > { %2057 = vmatpush1.bf16.msra.mxu0 %v4037_v29  ;;  %1832 = vmatprep.subr.bf16.mxu1 %v3593_v36  ;;  %v3641_v36 = vld [vmem:[%s485_s21] sm:%s3640_s17] }
  0x9e   : > { %2058 = vmatprep.subr.bf16.mxu0 %v4041_v37  ;;  %612 = vst.msk [vmem:[#allocation2 + $0xd9] sm:$0xff] %vm576_vm0, %v3641_v36  ;;  %v3618_v36 = vld [vmem:[#allocation3 + $0x410] ss:$8 sps:$4 sm:$0xff]  }
  0x9f   : > { %1788 = vmatmul.mubr.bf16.gmra.mrb[24].mxu1 %v4045_v48 }
  0xa0   : > { %2014 = vmatmul.mubr.bf16.gmra.mrb[24].mxu0 %v4047_v51  ;;  %1833 = vmatpush1.bf16.msra.mxu1 %v3591_v54  ;;  %v4081_v54 = vld [vmem:[#allocation3 + $0x3f4] ss:$8 sps:$4 sm:$0xff]  }
  0xa1   : > { %2059 = vmatpush1.bf16.msra.mxu0 %v4051_v57  ;;  %1834 = vmatprep.subr.bf16.mxu1 %v3599_v59  ;;  %v3609_v59 = vld [vmem:[#allocation3 + $0x1f0] ss:$8 sps:$4 sm:$0xff]  }
  0xa2   : > { %2060 = vmatprep.subr.bf16.mxu0 %v4054_v63  ;;  %1797 = vmatprep.mubr.bf16.mxu1 %v4047_v51 }
  0xa3   : > { %2023 = vmatprep.mubr.bf16.mxu0 %v4058_v3 }
  0xa4   : > { %1835 = vmatpush1.bf16.msra.mxu1 %v3597_v0  ;;  %v4088_v0 = vld [vmem:[#allocation3 + $0x3f0] ss:$8 sps:$4 sm:$0xff]  }
  0xa5   : > { %2061 = vmatpush1.bf16.msra.mxu0 %v4056_v1  ;;  %1836 = vmatprep.subr.bf16.mxu1 %v3605_v19  ;;  %v3615_v19 = vld [vmem:[#allocation3 + $0x400] ss:$8 sps:$4 sm:$0xff]  }
  0xa6   : > { %2062 = vmatprep.subr.bf16.mxu0 %v4066_v23 }
  0xa7   : > { %1798 = vmatmul.mubr.bf16.gmra.mrb[28].mxu1 %v4073_v32 }
  0xa8   : > { %2024 = vmatmul.mubr.bf16.gmra.mrb[28].mxu0 %v4075_v34  ;;  %1837 = vmatpush1.bf16.msra.mxu1 %v3603_v33  ;;  %v3620_v33 = vld [vmem:[#allocation3 + $0x414] ss:$8 sps:$4 sm:$0xff]  }
  0xa9   : > { %2063 = vmatpush1.bf16.msra.mxu0 %v4078_v35  ;;  %1838 = vmatprep.subr.bf16.mxu1 %v3611_v52 }
  0xaa   : > { %2064 = vmatprep.subr.bf16.mxu0 %v4081_v54  ;;  %1840 = vmatprep.mubr.bf16.mxu1 %v3904_v42  ;;  %v3623_v42 = vld [vmem:[#allocation3 + $0x424] ss:$8 sps:$4 sm:$0xff]  }
  0xab   : > { %2066 = vmatprep.mubr.bf16.mxu0 %v3906_v43  ;;  %v3626_v43 = vld [vmem:[#allocation3 + $0x434] ss:$8 sps:$4 sm:$0xff]  }
  0xac   : > { %1839 = vmatpush1.bf16.msra.mxu1 %v3609_v59 }
  0xad   : > { %2065 = vmatpush1.bf16.msra.mxu0 %v4088_v0  ;;  %3202 = vmatprep.subr.bf16.mxu1 %v3880_v20  ;;  %v3621_v20 = vld [vmem:[#allocation3 + $0x420] ss:$8 sps:$4 sm:$0xff]  }
  0xae   : > { %2147 = vmatprep.subr.bf16.mxu0 %v3617_v13 }
  0xaf   : > { %1841 = vmatmul.mubr.bf16.vlgmr.msra.gmra.mrb[0].mxu1 %v678_v15 }
  0xb0   : > { %2067 = vmatmul.mubr.bf16.vlgmr.msra.gmra.mrb[0].mxu0 %v3931_v61  ;;  %3218 = vmatpush1.bf16.msra.mxu1 %v3884_v22  ;;  %v3624_v22 = vld [vmem:[#allocation3 + $0x430] ss:$8 sps:$4 sm:$0xff]  }
  0xb1   : > { %2148 = vmatpush1.bf16.msra.mxu0 %v3615_v19  ;;  %3203 = vmatprep.subr.bf16.mxu1 %v3887_v28  ;;  %v3629_v28 = vld [vmem:[#allocation3 + $0x444] ss:$8 sps:$4 sm:$0xff]  }
  0xb2   : > { %2149 = vmatprep.subr.bf16.mxu0 %v3620_v33  ;;  %1850 = vmatprep.mubr.bf16.mxu1 %v3931_v61  ;;  %v701_v61 = vld [vmem:[#allocation2 + $0xc8] sm:$0xff] }
  0xb3   : > { %2076 = vmatprep.mubr.bf16.mxu0 %v3933_v62 }
  0xb4   : > { %3219 = vmatpush1.bf16.msra.mxu1 %v3889_v30  ;;  %v3627_v30 = vld [vmem:[#allocation3 + $0x440] ss:$8 sps:$4 sm:$0xff]  }
  0xb5   : > { %2150 = vmatpush1.bf16.msra.mxu0 %v3618_v36  ;;  %3204 = vmatprep.subr.bf16.mxu1 %v3899_v39  ;;  %v3630_v39 = vld [vmem:[#allocation3 + $0x450] ss:$8 sps:$4 sm:$0xff]  }
  0xb6   : > { %2151 = vmatprep.subr.bf16.mxu0 %v3623_v42 }
  0xb7   : > { %1851 = vmatmul.mubr.bf16.gmra.mrb[4].mxu1 %v3875_v4  ;;  %v3632_v4 = vld [vmem:[#allocation3 + $0x454] ss:$8 sps:$4 sm:$0xff]  }
  0xb8   : > { %2077 = vmatmul.mubr.bf16.gmra.mrb[4].mxu0 %v3957_v17  ;;  %3220 = vmatpush1.bf16.msra.mxu1 %v3902_v41  ;;  %v3635_v41 = vld [vmem:[#allocation3 + $0x464] ss:$8 sps:$4 sm:$0xff]  }
  0xb9   : > { %2152 = vmatpush1.bf16.msra.mxu0 %v3621_v20  ;;  %3205 = vmatprep.subr.bf16.mxu1 %v3910_v47  ;;  %v3633_v47 = vld [vmem:[#allocation3 + $0x460] ss:$8 sps:$4 sm:$0xff]  }
  0xba   : > { %2153 = vmatprep.subr.bf16.mxu0 %v3626_v43  ;;  %1860 = vmatprep.mubr.bf16.mxu1 %v3957_v17  ;;  %v822_v17 = vld [vmem:[#allocation2 + $0xe2] sm:$0xff] }
  0xbb   : > { %2086 = vmatprep.mubr.bf16.mxu0 %v3959_v18 }
  0xbc   : > { %3221 = vmatpush1.bf16.msra.mxu1 %v3912_v49  ;;  %v3638_v49 = vld [vmem:[#allocation3 + $0x474] ss:$8 sps:$4 sm:$0xff]  }
  0xbd   : > { %2154 = vmatpush1.bf16.msra.mxu0 %v3624_v22  ;;  %3206 = vmatprep.subr.bf16.mxu1 %v3922_v58  ;;  %v3636_v58 = vld [vmem:[#allocation3 + $0x470] ss:$8 sps:$4 sm:$0xff]  }
  0xbe   : > { %2155 = vmatprep.subr.bf16.mxu0 %v3629_v28 }
  0xbf   : > { %1861 = vmatmul.mubr.bf16.gmra.mrb[8].mxu1 %v3891_v31 }
  0xc0   : > { %2087 = vmatmul.mubr.bf16.gmra.mrb[8].mxu0 %v3984_v45  ;;  %3222 = vmatpush1.bf16.msra.mxu1 %v3929_v60  ;;  %v3721_v60 = vmov 0  }
  0xc1   : > { %2156 = vmatpush1.bf16.msra.mxu0 %v3627_v30  ;;  %3207 = vmatprep.subr.bf16.mxu1 %v3937_v2  ;;  %v798_v2 = vld [vmem:[#allocation2 + $0xe1] sm:$0xff] }
  0xc2   : > { %2157 = vmatprep.subr.bf16.mxu0 %v3632_v4  ;;  %1870 = vmatprep.mubr.bf16.mxu1 %v3984_v45 }
  0xc3   : > { %2096 = vmatprep.mubr.bf16.mxu0 %v3986_v46 }
  0xc4   : > { %3223 = vmatpush1.bf16.msra.mxu1 %v3939_v5 }
  0xc5   : > { %2158 = vmatpush1.bf16.msra.mxu0 %v3630_v39  ;;  %3208 = vmatprep.subr.bf16.mxu1 %v3951_v14  ;;  %v774_v14 = vld [vmem:[#allocation2 + $0xe0] sm:$0xff] }
  0xc6   : > { %2159 = vmatprep.subr.bf16.mxu0 %v3635_v41 }
  0xc7   : > { %1871 = vmatmul.mubr.bf16.gmra.mrb[12].mxu1 %v3914_v50 }
  0xc8   : > { %2097 = vmatmul.mubr.bf16.gmra.mrb[12].mxu0 %v4022_v11  ;;  %3224 = vmatpush1.bf16.msra.mxu1 %v3955_v16  ;;  %v821_v16 = vld [vmem:[#allocation2 + $0xda] sm:$0xff] }
  0xc9   : > { %2160 = vmatpush1.bf16.msra.mxu0 %v3633_v47  ;;  %3209 = vmatprep.subr.bf16.mxu1 %v3963_v24  ;;  %v830_v24 = vpack.c.bf16 %v822_v17, %v821_v16 }
  0xca   : > { %2161 = vmatprep.subr.bf16.mxu0 %v3638_v49  ;;  %1880 = vmatprep.mubr.bf16.mxu1 %v4022_v11 }
  0xcb   : > { %2179 = vmatprep.mubr.bf16.mxu0 %v3721_v60 }
  0xcc   : > { %3225 = vmatpush1.bf16.msra.mxu1 %v3965_v26 }
  0xcd   : > { %2162 = vmatpush1.bf16.msra.mxu0 %v3636_v58  ;;  %3210 = vmatprep.subr.bf16.mxu1 %v3975_v38 }
  0xcf   : > { %1881 = vmatmul.mubr.bf16.gmra.mrb[16].mxu1 %v3941_v6 }
  0xd0   : > { %2180 = vmatmul.mubr.bf16.vlgmr.msra.gmra.mrb[0].mxu0 %v3891_v31  ;;  %3226 = vmatpush1.bf16.msra.mxu1 %v3982_v44  ;;  %v700_v31 = vld [vmem:[#allocation2 + $0xc0] sm:$0xff] }
  0xd1   : > { %1890 = vmatprep.mubr.bf16.mxu1 %v4045_v48  ;;  %3211 = vmatprep.subr.bf16.mxu1 %v3996_v53  ;;  %v709_v62 = vpack.c.bf16 %v701_v61, %v700_v31 }
  0xd2   : > { %2189 = vmatprep.mubr.bf16.mxu0 %v3721_v60 }
  0xd4   : > { %3227 = vmatpush1.bf16.msra.mxu1 %v3998_v55 }
  0xd5   : > { %3212 = vmatprep.subr.bf16.mxu1 %v4016_v8 }
  0xd7   : > { %1891 = vmatmul.mubr.bf16.gmra.mrb[20].mxu1 %v3967_v27 }
  0xd8   : > { %2190 = vmatmul.mubr.bf16.gmra.mrb[4].mxu0 %v3914_v50  ;;  %3228 = vmatpush1.bf16.msra.mxu1 %v4020_v10  ;;  %v797_v50 = vld [vmem:[#allocation2 + $0xd9] sm:$0xff] }
  0xd9   : > { %1900 = vmatprep.mubr.bf16.mxu1 %v4073_v32  ;;  %3213 = vmatprep.subr.bf16.mxu1 %v4031_v21  ;;  %v806_v5 = vpack.c.bf16 %v798_v2, %v797_v50 }
  0xda   : > { %2199 = vmatprep.mubr.bf16.mxu0 %v3721_v60 }
  0xdc   : > { %3229 = vmatpush1.bf16.msra.mxu1 %v4037_v29 }
  0xdd   : > { %3214 = vmatprep.subr.bf16.mxu1 %v4041_v37 }
  0xdf   : > { %1901 = vmatmul.mubr.bf16.gmra.mrb[24].mxu1 %v4000_v56 }
  0xe0   : > { %2200 = vmatmul.mubr.bf16.gmra.mrb[8].mxu0 %v3941_v6  ;;  %3230 = vmatpush1.bf16.msra.mxu1 %v4051_v57  ;;  %v773_v6 = vld [vmem:[#allocation2 + $0xd8] sm:$0xff] }
  0xe1   : > { %1910 = vmatprep.mubr.bf16.mxu1 %v709_v62  ;;  %3215 = vmatprep.subr.bf16.mxu1 %v4054_v63  ;;  %v782_v18 = vpack.c.bf16 %v774_v14, %v773_v6 }
  0xe2   : > { %2209 = vmatprep.mubr.bf16.mxu0 %v3721_v60 }
  0xe4   : > { %3231 = vmatpush1.bf16.msra.mxu1 %v4056_v1 }
  0xe5   : > { %3216 = vmatprep.subr.bf16.mxu1 %v4066_v23 }
  0xe7   : > { %1911 = vmatmul.mubr.bf16.gmra.mrb[28].mxu1 %v4033_v25 }
  0xe8   : > { %2210 = vmatmul.mubr.bf16.gmra.mrb[12].mxu0 %v3967_v27  ;;  %3232 = vmatpush1.bf16.msra.mxu1 %v4078_v35 }
  0xe9   : > { %2106 = vmatprep.mubr.bf16.mxu1 %v4024_v12  ;;  %3217 = vmatprep.subr.bf16.mxu1 %v4081_v54 }
  0xea   : > { %2219 = vmatprep.mubr.bf16.mxu0 %v3721_v60 }
  0xec   : > { %3233 = vmatpush1.bf16.msra.mxu1 %v4088_v0 }
  0xef   : > { %2107 = vmatmul.mubr.bf16.vlgmr.msra.gmra.mrb[32].mxu1 %v4045_v48 }
  0xf0   : > { %2220 = vmatmul.mubr.bf16.gmra.mrb[32].mxu0 %v4000_v56  ;;  %2116 = vmatprep.mubr.bf16.mxu1 %v4047_v51 }
  0xf1   : > { %2229 = vmatprep.mubr.bf16.mxu0 %v3721_v60 }
  0xf7   : > { %2117 = vmatmul.mubr.bf16.gmra.mrb[36].mxu1 %v4073_v32 }
  0xf8   : > { %2230 = vmatmul.mubr.bf16.gmra.mrb[36].mxu0 %v4033_v25  ;;  %2126 = vmatprep.mubr.bf16.mxu1 %v4075_v34 }
  0xf9   : > { %2239 = vmatprep.mubr.bf16.mxu0 %v3721_v60 }
  0xff   : > { %2127 = vmatmul.mubr.bf16.gmra.mrb[40].mxu1 %v709_v62 }
 0x100   : > { %2240 = vmatmul.mubr.bf16.gmra.mrb[40].mxu0 %v4058_v3  ;;  %2136 = vmatprep.mubr.bf16.mxu1 %v806_v5 }
 0x101   : > { %2249 = vmatprep.mubr.bf16.mxu0 %v3721_v60 }
 0x107   : > { %2137 = vmatmul.mubr.bf16.gmra.mrb[44].mxu1 %v782_v18 }
 0x108   : > { %2250 = vmatmul.mubr.bf16.gmra.mrb[44].mxu0 %v830_v24 }
 0x163   : > { %v1995_v26 = vpop.f32.mrb[16].mxu0 }
 0x164   : > { %v1997_v27 = vpop.f32.mrb[17].mxu0 }
 0x165   : > { %v1999_v38 = vpop.f32.mrb[18].mxu0 }
 0x166   : > { %v2001_v44 = vpop.f32.mrb[19].mxu0 }
 0x16b   : > { %v2005_v45 = vpop.f32.mrb[20].mxu0 }
 0x16c   : > { %v4158_v46 = vpop.f32.mrb[21].mxu0 }
 0x16d   : > { %v4160_v53 = vpop.f32.mrb[22].mxu0 }
 0x16e   : > { %v4162_v55 = vpop.f32.mrb[23].mxu0 }
 0x173   : > { %v4164_v56 = vpop.f32.mrb[24].mxu0 }
 0x174   : > { %v4166_v8 = vpop.f32.mrb[25].mxu0 }
 0x175   : > { %v4168_v10 = vpop.f32.mrb[26].mxu0 }
 0x176   : > { %v4170_v11 = vpop.f32.mrb[27].mxu0 }
 0x17b   : > { %v4172_v12 = vpop.f32.mrb[28].mxu0 }
 0x17c   : > { %v4174_v21 = vpop.f32.mrb[29].mxu0 }
 0x17d   : > { %v4176_v25 = vpop.f32.mrb[30].mxu0 }
 0x17e   : > { %v4178_v29 = vpop.f32.mrb[31].mxu0 }
 0x182   : > { %v1842_v37 = vpop.f32.mrb[0].mxu1 }
 0x183   : > { %v1844_v48 = vpop.f32.mrb[1].mxu1 }
 0x184   : > { %v1846_v51 = vpop.f32.mrb[2].mxu1 }
 0x185   : > { %v1848_v57 = vpop.f32.mrb[3].mxu1 }
 0x18a   : > { %v1852_v63 = vpop.f32.mrb[4].mxu1 }
 0x18b   : > { %v1854_v1 = vpop.f32.mrb[5].mxu1 }
 0x18c   : > { %v1856_v3 = vpop.f32.mrb[6].mxu1 }
 0x18d   : > { %v1858_v23 = vpop.f32.mrb[7].mxu1 }
 0x192   : > { %v4180_v32 = vpop.f32.mrb[8].mxu1 }
 0x193   : > { %v4182_v34 = vpop.f32.mrb[9].mxu1 }
 0x194   : > { %v4184_v35 = vpop.f32.mrb[10].mxu1 }
 0x195   : > { %v4186_v40 = vpop.f32.mrb[11].mxu1 }
 0x19a   : > { %v4188_v52 = vpop.f32.mrb[12].mxu1 }
 0x19b   : > { %v4190_v54 = vpop.f32.mrb[13].mxu1 }
 0x19c   : > { %v4192_v59 = vpop.f32.mrb[14].mxu1 }
 0x19d   : > { %v4194_v0 = vpop.f32.mrb[15].mxu1 }
 0x1a2   : > { %v1882_v7 = vpop.f32.mrb[16].mxu1 }
 0x1a3   : > { %v2181_v9 = vpop.f32.mrb[0].mxu0  ;;  %v4196_v13 = vadd.f32 %v1995_v26, %v1882_v7  ;;  %v1884_v19 = vpop.f32.mrb[17].mxu1 }
 0x1a4   : > { %v3234_v15 = vadd.f32 %v2181_v9, %v1842_v37  ;;  %v2183_v33 = vpop.f32.mrb[1].mxu0  ;;  %v4199_v36 = vadd.f32 %v1997_v27, %v1884_v19  ;;  %v1886_v20 = vpop.f32.mrb[18].mxu1 }
 0x1a5   : > { %v3235_v42 = vadd.f32 %v2183_v33, %v1844_v48  ;;  %v2185_v43 = vpop.f32.mrb[2].mxu0  ;;  %v4201_v22 = vadd.f32 %v1999_v38, %v1886_v20  ;;  %v1888_v30 = vpop.f32.mrb[19].mxu1 }
 0x1a6   : > { %v3236_v28 = vadd.f32 %v2185_v43, %v1846_v51  ;;  %v2187_v4 = vpop.f32.mrb[3].mxu0  ;;  %v4208_v39 = vadd.f32 %v2001_v44, %v1888_v30  ;;  %v2281_v47 = vmul.f32 %v3234_v15, %v3234_v15 }
 0x1a7   : > { %v3237_v41 = vadd.f32 %v2187_v4, %v1848_v57  ;;  %v2342_v31 = vmul.f32 %v3235_v42, %v3235_v42 }
 0x1a8   : > { %v2260_v49 = vadd.f32 %v3236_v28, %v3234_v15  ;;  %v2282_v58 = vmul.f32 %v3236_v28, %v3236_v28  ;;  %v3111_v60 = vpack.c.bf16 %v3236_v28, %v3234_v15 }
 0x1a9   : > { %v2321_v61 = vadd.f32 %v3237_v41, %v3235_v42  ;;  %v2343_v62 = vmul.f32 %v3237_v41, %v3237_v41  ;;  %v3151_v50 = vpack.c.bf16 %v3237_v41, %v3235_v42 }
 0x1aa   : > { %v2297_v2 = vadd.f32 %v2282_v58, %v2281_v47  ;;  %3112 = vst [vmem:[%s4206_s11] sm:$0xff] %v3111_v60   ;;  %v1892_v6 = vpop.f32.mrb[20].mxu1 }
 0x1ab   : > { %v2358_v5 = vadd.f32 %v2343_v62, %v2342_v31  ;;  %3152 = vst [vmem:[%s4213_s12] sm:$0xff] %v3151_v50   ;;  %v2191_v14 = vpop.f32.mrb[4].mxu0  ;;  %v4217_v16 = vadd.f32 %v2005_v45, %v1892_v6  ;;  %v1894_v18 = vpop.f32.mrb[21].mxu1 }
 0x1ac   : > { %v3238_v17 = vadd.f32 %v2191_v14, %v1852_v63  ;;  %v2193_v24 = vpop.f32.mrb[5].mxu0  ;;  %v4220_v26 = vadd.f32 %v4158_v46, %v1894_v18  ;;  %v1896_v38 = vpop.f32.mrb[22].mxu1 }
 0x1ad   : > { %v3239_v27 = vadd.f32 %v2193_v24, %v1854_v1  ;;  %v2195_v44 = vpop.f32.mrb[6].mxu0  ;;  %v4223_v51 = vadd.f32 %v4160_v53, %v1896_v38  ;;  %v1898_v7 = vpop.f32.mrb[23].mxu1 }
 0x1ae   : > { %v2261_v37 = vadd.f32 %v3238_v17, %v2260_v49  ;;  %v2283_v48 = vmul.f32 %v3238_v17, %v3238_v17  ;;  %v3240_v57 = vadd.f32 %v2195_v44, %v1856_v3  ;;  %v2197_v9 = vpop.f32.mrb[7].mxu0  ;;  %v4226_v15 = vadd.f32 %v4162_v55, %v1898_v7 }
 0x1af   : > { %v2322_v45 = vadd.f32 %v3239_v27, %v2321_v61  ;;  %v2344_v63 = vmul.f32 %v3239_v27, %v3239_v27  ;;  %v3241_v46 = vadd.f32 %v2197_v9, %v1858_v23 }
 0x1b0   : > { %v2298_v19 = vadd.f32 %v2297_v2, %v2283_v48  ;;  %v2262_v1 = vadd.f32 %v3240_v57, %v2261_v37  ;;  %v2284_v33 = vmul.f32 %v3240_v57, %v3240_v57  ;;  %v3116_v42 = vpack.c.bf16 %v3240_v57, %v3238_v17 }
 0x1b1   : > { %v2359_v20 = vadd.f32 %v2358_v5, %v2344_v63  ;;  %v2323_v43 = vadd.f32 %v3241_v46, %v2322_v45  ;;  %v2345_v28 = vmul.f32 %v3241_v46, %v3241_v46  ;;  %v3156_v53 = vpack.c.bf16 %v3241_v46, %v3239_v27 }
 0x1b2   : > { %v2299_v30 = vadd.f32 %v2298_v19, %v2284_v33  ;;  %3188 = vst [vmem:[%s4206_s11 + $0x8] sm:$0xff] %v3116_v42   ;;  %v1902_v4 = vpop.f32.mrb[24].mxu1 }
 0x1b3   : > { %v2360_v3 = vadd.f32 %v2359_v20, %v2345_v28  ;;  %3195 = vst [vmem:[%s4213_s12 + $0x8] sm:$0xff] %v3156_v53   ;;  %v2201_v41 = vpop.f32.mrb[8].mxu0  ;;  %v4231_v47 = vadd.f32 %v4164_v56, %v1902_v4  ;;  %v1904_v23 = vpop.f32.mrb[25].mxu1 }
 0x1b4   : > { %v3242_v55 = vadd.f32 %v2201_v41, %v4180_v32  ;;  %v2203_v49 = vpop.f32.mrb[9].mxu0  ;;  %v4235_v58 = vadd.f32 %v4166_v8, %v1904_v23  ;;  %v1906_v31 = vpop.f32.mrb[26].mxu1 }
 0x1b5   : > { %v3243_v60 = vadd.f32 %v2203_v49, %v4182_v34  ;;  %v2205_v61 = vpop.f32.mrb[10].mxu0  ;;  %v4239_v2 = vadd.f32 %v4168_v10, %v1906_v31  ;;  %v1908_v56 = vpop.f32.mrb[27].mxu1 }
 0x1b6   : > { %v2263_v62 = vadd.f32 %v3242_v55, %v2262_v1  ;;  %v2285_v50 = vmul.f32 %v3242_v55, %v3242_v55  ;;  %v3244_v5 = vadd.f32 %v2205_v61, %v4184_v35  ;;  %v2207_v6 = vpop.f32.mrb[11].mxu0  ;;  %v4243_v8 = vadd.f32 %v4170_v11, %v1908_v56 }
 0x1b7   : > { %v2324_v32 = vadd.f32 %v3243_v60, %v2323_v43  ;;  %v2346_v14 = vmul.f32 %v3243_v60, %v3243_v60  ;;  %v3245_v34 = vadd.f32 %v2207_v6, %v4186_v40 }
 0x1b8   : > { %v2300_v17 = vadd.f32 %v2299_v30, %v2285_v50  ;;  %v2264_v18 = vadd.f32 %v3244_v5, %v2263_v62  ;;  %v2286_v24 = vmul.f32 %v3244_v5, %v3244_v5  ;;  %v3121_v27 = vpack.c.bf16 %v3244_v5, %v3242_v55 }
 0x1b9   : > { %v2361_v38 = vadd.f32 %v2360_v3, %v2346_v14  ;;  %v2325_v10 = vadd.f32 %v3245_v34, %v2324_v32  ;;  %v2347_v44 = vmul.f32 %v3245_v34, %v3245_v34  ;;  %v3161_v37 = vpack.c.bf16 %v3245_v34, %v3243_v60 }
 0x1ba   : > { %v2301_v35 = vadd.f32 %v2300_v17, %v2286_v24  ;;  %3189 = vst [vmem:[%s4206_s11 + $0x10] sm:$0xff] %v3121_v27   ;;  %v1912_v57 = vpop.f32.mrb[28].mxu1 }
 0x1bb   : > { %v2362_v48 = vadd.f32 %v2361_v38, %v2347_v44  ;;  %3196 = vst [vmem:[%s4213_s12 + $0x10] sm:$0xff] %v3161_v37   ;;  %v2211_v7 = vpop.f32.mrb[12].mxu0  ;;  %v4249_v9 = vadd.f32 %v4172_v12, %v1912_v57  ;;  %v1914_v40 = vpop.f32.mrb[29].mxu1 }
 0x1bc   : > { %v3246_v11 = vadd.f32 %v2211_v7, %v4188_v52  ;;  %v2213_v45 = vpop.f32.mrb[13].mxu0  ;;  %v4253_v63 = vadd.f32 %v4174_v21, %v1914_v40  ;;  %v1916_v19 = vpop.f32.mrb[30].mxu1 }
 0x1bd   : > { %v3247_v46 = vadd.f32 %v2213_v45, %v4190_v54  ;;  %v2215_v1 = vpop.f32.mrb[14].mxu0  ;;  %v4257_v20 = vadd.f32 %v4176_v25, %v1916_v19  ;;  %v1918_v12 = vpop.f32.mrb[31].mxu1 }
 0x1be   : > { %v2265_v33 = vadd.f32 %v3246_v11, %v2264_v18  ;;  %v2287_v42 = vmul.f32 %v3246_v11, %v3246_v11  ;;  %v3248_v43 = vadd.f32 %v2215_v1, %v4192_v59  ;;  %v2217_v28 = vpop.f32.mrb[15].mxu0  ;;  %v4261_v21 = vadd.f32 %v4178_v29, %v1918_v12 }
 0x1bf   : > { %v2326_v52 = vadd.f32 %v3247_v46, %v2325_v10  ;;  %v2348_v53 = vmul.f32 %v3247_v46, %v3247_v46  ;;  %v3249_v54 = vadd.f32 %v2217_v28, %v4194_v0 }
 0x1c0   : > { %v2302_v30 = vadd.f32 %v2301_v35, %v2287_v42  ;;  %v2266_v3 = vadd.f32 %v3248_v43, %v2265_v33  ;;  %v2288_v4 = vmul.f32 %v3248_v43, %v3248_v43  ;;  %v3126_v41 = vpack.c.bf16 %v3248_v43, %v3246_v11 }
 0x1c1   : > { %v2363_v55 = vadd.f32 %v2362_v48, %v2348_v53  ;;  %v2327_v25 = vadd.f32 %v3249_v54, %v2326_v52  ;;  %v2349_v23 = vmul.f32 %v3249_v54, %v3249_v54  ;;  %v3166_v49 = vpack.c.bf16 %v3249_v54, %v3247_v46 }
 0x1c2   : > { %v2303_v59 = vadd.f32 %v2302_v30, %v2288_v4  ;;  %3190 = vst [vmem:[%s4206_s11 + $0x18] sm:$0xff] %v3126_v41   ;;  %v2108_v31 = vpop.f32.mrb[32].mxu1 }
 0x1c3   : > { %v2364_v60 = vadd.f32 %v2363_v55, %v2349_v23  ;;  %3197 = vst [vmem:[%s4213_s12 + $0x18] sm:$0xff] %v3166_v49   ;;  %v2221_v61 = vpop.f32.mrb[32].mxu0  ;;  %v3251_v62 = vadd.f32 %v4196_v13, %v2108_v31  ;;  %v2110_v29 = vpop.f32.mrb[33].mxu1 }
 0x1c4   : > { %v2223_v50 = vpop.f32.mrb[33].mxu0  ;;  %v3254_v0 = vadd.f32 %v4199_v36, %v2110_v29  ;;  %v2112_v5 = vpop.f32.mrb[34].mxu1 }
 0x1c5   : > { %v2225_v56 = vpop.f32.mrb[34].mxu0  ;;  %v3252_v6 = vadd.f32 %v3251_v62, %v2221_v61  ;;  %v3257_v32 = vadd.f32 %v4201_v22, %v2112_v5  ;;  %v2114_v14 = vpop.f32.mrb[35].mxu1 }
 0x1c6   : > { %v2227_v34 = vpop.f32.mrb[35].mxu0  ;;  %v3255_v17 = vadd.f32 %v3254_v0, %v2223_v50  ;;  %v3260_v18 = vadd.f32 %v4208_v39, %v2114_v14 }
 0x1c7   : > { %v2267_v24 = vadd.f32 %v3252_v6, %v2266_v3  ;;  %v2289_v27 = vmul.f32 %v3252_v6, %v3252_v6  ;;  %v3258_v38 = vadd.f32 %v3257_v32, %v2225_v56 }
 0x1c8   : > { %v2328_v10 = vadd.f32 %v3255_v17, %v2327_v25  ;;  %v2350_v13 = vmul.f32 %v3255_v17, %v3255_v17  ;;  %v3261_v44 = vadd.f32 %v3260_v18, %v2227_v34 }
 0x1c9   : > { %v2304_v37 = vadd.f32 %v2303_v59, %v2289_v27  ;;  %v2268_v36 = vadd.f32 %v3258_v38, %v2267_v24  ;;  %v2290_v35 = vmul.f32 %v3258_v38, %v3258_v38  ;;  %v3131_v48 = vpack.c.bf16 %v3258_v38, %v3252_v6 }
 0x1ca   : > { %v2365_v57 = vadd.f32 %v2364_v60, %v2350_v13  ;;  %v2329_v7 = vadd.f32 %v3261_v44, %v2328_v10  ;;  %v2351_v22 = vmul.f32 %v3261_v44, %v3261_v44  ;;  %v3171_v11 = vpack.c.bf16 %v3261_v44, %v3255_v17  ;;  %v2118_v40 = vpop.f32.mrb[36].mxu1 }
 0x1cb   : > { %v2231_v45 = vpop.f32.mrb[36].mxu0  ;;  %v2305_v46 = vadd.f32 %v2304_v37, %v2290_v35  ;;  %3191 = vst [vmem:[%s4206_s11 + $0x20] sm:$0xff] %v3131_v48   ;;  %v3263_v39 = vadd.f32 %v4217_v16, %v2118_v40  ;;  %v2120_v19 = vpop.f32.mrb[37].mxu1 }
 0x1cc   : > { %v2233_v1 = vpop.f32.mrb[37].mxu0  ;;  %v2366_v33 = vadd.f32 %v2365_v57, %v2351_v22  ;;  %3198 = vst [vmem:[%s4213_s12 + $0x20] sm:$0xff] %v3171_v11   ;;  %v3266_v42 = vadd.f32 %v4220_v26, %v2120_v19  ;;  %v2122_v43 = vpop.f32.mrb[38].mxu1 }
 0x1cd   : > { %v2235_v12 = vpop.f32.mrb[38].mxu0  ;;  %v3264_v28 = vadd.f32 %v3263_v39, %v2231_v45  ;;  %v3269_v52 = vadd.f32 %v4223_v51, %v2122_v43  ;;  %v2124_v53 = vpop.f32.mrb[39].mxu1 }
 0x1ce   : > { %v2237_v54 = vpop.f32.mrb[39].mxu0  ;;  %v3267_v30 = vadd.f32 %v3266_v42, %v2233_v1  ;;  %v3272_v3 = vadd.f32 %v4226_v15, %v2124_v53 }
 0x1cf   : > { %v2269_v4 = vadd.f32 %v3264_v28, %v2268_v36  ;;  %v2291_v41 = vmul.f32 %v3264_v28, %v3264_v28  ;;  %v3270_v16 = vadd.f32 %v3269_v52, %v2235_v12 }
 0x1d0   : > { %v2330_v55 = vadd.f32 %v3267_v30, %v2329_v7  ;;  %v2352_v25 = vmul.f32 %v3267_v30, %v3267_v30  ;;  %v3273_v23 = vadd.f32 %v3272_v3, %v2237_v54 }
 0x1d1   : > { %v2306_v49 = vadd.f32 %v2305_v46, %v2291_v41  ;;  %v2270_v26 = vadd.f32 %v3270_v16, %v2269_v4  ;;  %v2292_v59 = vmul.f32 %v3270_v16, %v3270_v16  ;;  %v3136_v60 = vpack.c.bf16 %v3270_v16, %v3264_v28 }
 0x1d2   : > { %v2367_v31 = vadd.f32 %v2366_v33, %v2352_v25  ;;  %v2331_v61 = vadd.f32 %v3273_v23, %v2330_v55  ;;  %v2353_v51 = vmul.f32 %v3273_v23, %v3273_v23  ;;  %v3176_v62 = vpack.c.bf16 %v3273_v23, %v3267_v30  ;;  %v2128_v29 = vpop.f32.mrb[40].mxu1 }
 0x1d3   : > { %v2241_v50 = vpop.f32.mrb[40].mxu0  ;;  %v2307_v0 = vadd.f32 %v2306_v49, %v2292_v59  ;;  %3192 = vst [vmem:[%s4206_s11 + $0x28] sm:$0xff] %v3136_v60   ;;  %v3275_v15 = vadd.f32 %v4231_v47, %v2128_v29  ;;  %v2130_v5 = vpop.f32.mrb[41].mxu1 }
 0x1d4   : > { %v2243_v56 = vpop.f32.mrb[41].mxu0  ;;  %v2368_v6 = vadd.f32 %v2367_v31, %v2353_v51  ;;  %3199 = vst [vmem:[%s4213_s12 + $0x28] sm:$0xff] %v3176_v62   ;;  %v3278_v32 = vadd.f32 %v4235_v58, %v2130_v5  ;;  %v2132_v14 = vpop.f32.mrb[42].mxu1 }
 0x1d5   : > { %v2245_v34 = vpop.f32.mrb[42].mxu0  ;;  %v3276_v17 = vadd.f32 %v3275_v15, %v2241_v50  ;;  %v3281_v18 = vadd.f32 %v4239_v2, %v2132_v14  ;;  %v2134_v24 = vpop.f32.mrb[43].mxu1 }
 0x1d6   : > { %v2247_v27 = vpop.f32.mrb[43].mxu0  ;;  %v3279_v38 = vadd.f32 %v3278_v32, %v2243_v56  ;;  %v3284_v10 = vadd.f32 %v4243_v8, %v2134_v24 }
 0x1d7   : > { %v2271_v13 = vadd.f32 %v3276_v17, %v2270_v26  ;;  %v2293_v44 = vmul.f32 %v3276_v17, %v3276_v17  ;;  %v3282_v47 = vadd.f32 %v3281_v18, %v2245_v34 }
 0x1d8   : > { %v2332_v37 = vadd.f32 %v3279_v38, %v2331_v61  ;;  %v2354_v36 = vmul.f32 %v3279_v38, %v3279_v38  ;;  %v3285_v35 = vadd.f32 %v3284_v10, %v2247_v27 }
 0x1d9   : > { %v2308_v48 = vadd.f32 %v2307_v0, %v2293_v44  ;;  %v2272_v58 = vadd.f32 %v3282_v47, %v2271_v13  ;;  %v2294_v57 = vmul.f32 %v3282_v47, %v3282_v47  ;;  %v3141_v7 = vpack.c.bf16 %v3282_v47, %v3276_v17 }
 0x1da   : > { %v2369_v22 = vadd.f32 %v2368_v6, %v2354_v36  ;;  %v2333_v11 = vadd.f32 %v3285_v35, %v2332_v37  ;;  %v2355_v2 = vmul.f32 %v3285_v35, %v3285_v35  ;;  %v3181_v40 = vpack.c.bf16 %v3285_v35, %v3279_v38  ;;  %v2138_v45 = vpop.f32.mrb[44].mxu1 }
 0x1db   : > { %v2251_v46 = vpop.f32.mrb[44].mxu0  ;;  %v2309_v39 = vadd.f32 %v2308_v48, %v2294_v57  ;;  %3193 = vst [vmem:[%s4206_s11 + $0x30] sm:$0xff] %v3141_v7   ;;  %v3287_v8 = vadd.f32 %v4249_v9, %v2138_v45  ;;  %v2140_v19 = vpop.f32.mrb[45].mxu1 }
 0x1dc   : > { %v2253_v1 = vpop.f32.mrb[45].mxu0  ;;  %v2370_v33 = vadd.f32 %v2369_v22, %v2355_v2  ;;  %3200 = vst [vmem:[%s4213_s12 + $0x30] sm:$0xff] %v3181_v40   ;;  %v3290_v42 = vadd.f32 %v4253_v63, %v2140_v19  ;;  %v2142_v43 = vpop.f32.mrb[46].mxu1 }
 0x1dd   : > { %v2255_v12 = vpop.f32.mrb[46].mxu0  ;;  %v3288_v28 = vadd.f32 %v3287_v8, %v2251_v46  ;;  %v3293_v52 = vadd.f32 %v4257_v20, %v2142_v43  ;;  %v2144_v53 = vpop.f32.mrb[47].mxu1 }
 0x1de   : > { %v2257_v54 = vpop.f32.mrb[47].mxu0  ;;  %v3291_v30 = vadd.f32 %v3290_v42, %v2253_v1  ;;  %v3296_v3 = vadd.f32 %v4261_v21, %v2144_v53 }
 0x1df   : > { %v2273_v4 = vadd.f32 %v3288_v28, %v2272_v58  ;;  %v2295_v41 = vmul.f32 %v3288_v28, %v3288_v28  ;;  %v3294_v9 = vadd.f32 %v3293_v52, %v2255_v12 }
 0x1e0   : > { %v2334_v16 = vadd.f32 %v3291_v30, %v2333_v11  ;;  %v2356_v55 = vmul.f32 %v3291_v30, %v3291_v30  ;;  %v3297_v25 = vadd.f32 %v3296_v3, %v2257_v54 }
 0x1e1   : > { %v2310_v63 = vadd.f32 %v2309_v39, %v2295_v41  ;;  %v2274_v23 = vadd.f32 %v3294_v9, %v2273_v4  ;;  %v2296_v20 = vmul.f32 %v3294_v9, %v3294_v9  ;;  %v3146_v49 = vpack.c.bf16 %v3294_v9, %v3288_v28 }
 0x1e2   : > { %v2371_v26 = vadd.f32 %v2370_v33, %v2356_v55  ;;  %v2335_v59 = vadd.f32 %v3297_v25, %v2334_v16  ;;  %v2357_v60 = vmul.f32 %v3297_v25, %v3297_v25  ;;  %v3186_v21 = vpack.c.bf16 %v3297_v25, %v3291_v30 }
 0x1e3   : > { %v2275_v31 = vrot.slane %v2274_v23, 4  ;;  %v2311_v61 = vadd.f32 %v2310_v63, %v2296_v20  ;;  %3194 = vst [vmem:[%s4206_s11 + $0x38] sm:$0xff] %v3146_v49  }
 0x1e4   : > { %v2336_v51 = vrot.slane %v2335_v59, 4  ;;  %v2372_v62 = vadd.f32 %v2371_v26, %v2357_v60  ;;  %3201 = vst [vmem:[%s4213_s12 + $0x38] sm:$0xff] %v3186_v21  }
 0x1e5   : > { %v2276_v29 = vadd.f32 %v2275_v31, %v2274_v23  ;;  %v2312_v50 = vrot.slane %v2311_v61, 4 }
 0x1e6   : > { %v2337_v0 = vadd.f32 %v2336_v51, %v2335_v59  ;;  %v2373_v15 = vrot.slane %v2372_v62, 4 }
 0x1e7   : > { %v2277_v5 = vrot.slane %v2276_v29, 2  ;;  %v2313_v56 = vadd.f32 %v2312_v50, %v2311_v61 }
 0x1e8   : > { %v2338_v6 = vrot.slane %v2337_v0, 2  ;;  %v2374_v32 = vadd.f32 %v2373_v15, %v2372_v62 }
 0x1e9   : > { %v2278_v14 = vadd.f32 %v2277_v5, %v2276_v29  ;;  %v2314_v34 = vrot.slane %v2313_v56, 2 }
 0x1ea   : > { %v2339_v17 = vadd.f32 %v2338_v6, %v2337_v0  ;;  %v2375_v18 = vrot.slane %v2374_v32, 2 }
 0x1eb   : > { %v2279_v24 = vrot.slane %v2278_v14, 1  ;;  %v2315_v27 = vadd.f32 %v2314_v34, %v2313_v56 }
 0x1ec   : > { %v2340_v38 = vrot.slane %v2339_v17, 1  ;;  %v2376_v10 = vadd.f32 %v2375_v18, %v2374_v32 }
 0x1ed   : > { %v2316_v13 = vrot.slane %v2315_v27, 1  ;;  %v2280_v47 = vadd.f32 %v2279_v24, %v2278_v14 }
 0x1ee   : > { %v2377_v44 = vrot.slane %v2376_v10, 1  ;;  %v2341_v36 = vadd.f32 %v2340_v38, %v2339_v17 }
 0x1ef   : > { %v2317_v37 = vadd.f32 %v2316_v13, %v2315_v27 }
 0x1f0   : > { %v2378_v35 = vadd.f32 %v2377_v44, %v2376_v10 }
 0x1f1   : > { %v2319_v48 = vsel %vm2318_vm1, %v2280_v47, %v2317_v37 }
 0x1f2   : > { %2320 = vst [vmem:[%s519_s14] sm:$0x3] %v2319_v48  ;;  %v2379_v58 = vsel %vm2318_vm1, %v2341_v36, %v2378_v35 }
 0x1f3   : > { %2380 = vst [vmem:[%s527_s19] sm:$0x3] %v2379_v58 }
 0x1f4 PF: > { %s19_s28 = sadd.s32 1, %s3715_s28   ;;  %s4333_s24 = smov %s3707_s26 }
 0x1f5   : > { %p16_p1 = scmp.ge.s32.totalorder %s19_s28, 6   ;;  %s4334_s25 = smov %s3711_s27 }
 0x1f6   : > { %s4335_s26 = smov %s4338_s30  ;;  %s4336_s27 = smov %s4342_s8 }
 0x1f7   :  { %18 = sbr.rel (!%p16_p1) target bundleno = 3 (0x3), region = 116 }
 0x1fe   :  { %2644 = vsyncpa [#allocation4], 1 }
 0x1ff   :  { %2646 = vsyncpa [#allocation4 + $0x1], 1 }

</bundles_post_ra>
